<compile_context>
chip_gen: v7x
topology: tpu7x:2x2x1
jax: 0.10.0
libtpu: 0.0.40
codegen_flags: <defaults>
</compile_context>

<pallas_src>
import functools

import jax
import jax.numpy as jnp
from jax.experimental import pallas as pl
from jax.experimental.pallas import tpu as pltpu

# ---------------- small, ViT-consistent config ----------------
IMG = 16          # img_size
PATCH = 8         # patch_size
IN_CHANS = 3
EMBED_DIM = 32
DEPTH = 2
NUM_HEADS = 4
HEAD_DIM = EMBED_DIM // NUM_HEADS
MLP_RATIO = 4
NUM_PATCHES = (IMG // PATCH) * (IMG // PATCH)   # 4
SEQ_LEN = NUM_PATCHES + 1                       # cls token + patches = 5
MLP_HIDDEN = EMBED_DIM * MLP_RATIO              # 128
PATCH_FEATS = IN_CHANS * PATCH * PATCH          # 192
EPS = 1e-5                                      # nn.LayerNorm default
INV_SQRT2 = 0.7071067811865476

VEC_W = 128                                     # lane width of the packed vector slab
NVEC = 7 * DEPTH + 2                            # 7 vectors per layer + final norm w/b
WMAT_COLS = 4 * EMBED_DIM + MLP_HIDDEN          # [Wqkv | Wproj | fc1] = 96+32+128


# ---------------- in-kernel helpers ----------------
def _layernorm(x, w, b):
    # x: [M, D], w/b: [1, D]   (PyTorch LayerNorm: biased variance, eps=1e-5)
    mu = jnp.mean(x, axis=-1, keepdims=True)
    var = jnp.mean((x - mu) ** 2, axis=-1, keepdims=True)
    return (x - mu) * jax.lax.rsqrt(var + EPS) * w + b


# ---------------- the single fused Pallas kernel ----------------
def fused_vit_kernel(p_ref, prefix_ref, pw_ref, wmat_ref, fc2_ref, vec_ref, o_ref,
                     *, depth, num_heads, head_dim, bb, seq, dim, hidden):
    m = bb * seq                                  # flattened token rows per grid step
    scale = head_dim ** -0.5

    # Block-diagonal additive attention mask (tokens only attend within their own
    # image).  Built once with 2-D iotas; float floor-divide avoids vector int-div.
    ri = jax.lax.broadcasted_iota(jnp.int32, (m, m), 0).astype(jnp.float32)
    ci = jax.lax.broadcasted_iota(jnp.int32, (m, m), 1).astype(jnp.float32)
    inv_seq = 1.0 / seq
    neg_mask = jnp.where(jnp.floor(ri * inv_seq) == jnp.floor(ci * inv_seq),
                         0.0, -1e30)

    # cls-row selection matrix: row b picks flattened token row b*seq.
    sr = jax.lax.broadcasted_iota(jnp.int32, (bb, m), 0)
    sc = jax.lax.broadcasted_iota(jnp.int32, (bb, m), 1)
    sel = (sc == sr * seq).astype(jnp.float32)

    vecs = vec_ref[...]                           # [NVEC, 128] - all LN / bias vectors

    # PatchEmbed + cls token + pos_embed in one go (prefix pre-folded & pre-tiled):
    #   row b*seq      : 0 @ W + (cls + pos[0])
    #   row b*seq + i  : patch_i @ W + (patch_bias + pos[i])
    x = (jnp.dot(p_ref[...], pw_ref[...], preferred_element_type=jnp.float32)
         + prefix_ref[...])                       # [m, D]

    for l in range(depth):                        # static unroll over layers
        wm = wmat_ref[l]                          # [D, 4D + hidden]
        w_qkv = wm[:, 0:3 * dim]                  # [D, 3D]
        w_proj = wm[:, 3 * dim:4 * dim]           # [D, D]
        w_fc1 = wm[:, 4 * dim:4 * dim + hidden]   # [D, hidden]
        w_fc2 = fc2_ref[l]                        # [hidden, D]

        base = 7 * l
        ln1_w = vecs[base + 0:base + 1, 0:dim]
        ln1_b = vecs[base + 1:base + 2, 0:dim]
        proj_b = vecs[base + 2:base + 3, 0:dim]
        ln2_w = vecs[base + 3:base + 4, 0:dim]
        ln2_b = vecs[base + 4:base + 5, 0:dim]
        fc1_b = vecs[base + 5:base + 6, 0:hidden]
        fc2_b = vecs[base + 6:base + 7, 0:dim]

        # ---- attention:  x = x + Attn(LN1(x)) ----
        xn = _layernorm(x, ln1_w, ln1_b)                                     # [m, D]
        qkv = jnp.dot(xn, w_qkv, preferred_element_type=jnp.float32)        # [m, 3D]

        ctx_heads = []
        for h in range(num_heads):                # static unroll over heads
            qh = qkv[:, h * head_dim:(h + 1) * head_dim]                     # [m, hd]
            kh = qkv[:, dim + h * head_dim:dim + (h + 1) * head_dim]
            vh = qkv[:, 2 * dim + h * head_dim:2 * dim + (h + 1) * head_dim]
            # q @ k^T over the whole flattened tile; block-diag mask restores
            # per-image attention.  (TRANS_B dot_general, as in the flash kernels.)
            s = jax.lax.dot_general(qh, kh, (((1,), (1,)), ((), ())),
                                    preferred_element_type=jnp.float32)     # [m, m]
            s = s * scale + neg_mask
            s = s - jnp.max(s, axis=-1, keepdims=True)
            p = jnp.exp(s)
            p = p / jnp.sum(p, axis=-1, keepdims=True)        # exact divide (parity)
            ctx_heads.append(jnp.dot(p, vh, preferred_element_type=jnp.float32))
        ctx = jnp.concatenate(ctx_heads, axis=-1)                            # [m, D]
        x = x + jnp.dot(ctx, w_proj, preferred_element_type=jnp.float32) + proj_b

        # ---- MLP:  x = x + MLP(LN2(x)) ----
        xn2 = _layernorm(x, ln2_w, ln2_b)
        h1 = jnp.dot(xn2, w_fc1, preferred_element_type=jnp.float32) + fc1_b
        # exact GELU (nn.GELU default): 0.5 * x * (1 + erf(x / sqrt(2)))
        h1 = 0.5 * h1 * (1.0 + jax.lax.erf(h1 * INV_SQRT2))
        x = x + jnp.dot(h1, w_fc2, preferred_element_type=jnp.float32) + fc2_b

    # cls-row readout (rows 0, seq, 2*seq, ...) via a tiny selection matmul, then
    # final LayerNorm only on those rows.
    x_cls = jnp.dot(sel, x, preferred_element_type=jnp.float32)              # [bb, D]
    norm_w = vecs[7 * depth + 0:7 * depth + 1, 0:dim]
    norm_b = vecs[7 * depth + 1:7 * depth + 2, 0:dim]
    o_ref[...] = _layernorm(x_cls, norm_w, norm_b)


# ---------------- wrapper (single pallas_call) ----------------
def _choose_bb(B):
    # Batch-tile size: a multiple of 8 so BB*SEQ_LEN rows and the (BB, D) output
    # block stay sublane-aligned; capped at 32 because the block-diagonal score
    # trick costs O((BB*SEQ_LEN)^2) per step.  Large batches automatically get
    # >= 2 grid steps (megacore sharding on v7x).
    bb = 8
    while bb < 32 and bb < B:
        bb *= 2
    return bb


def fused_forward(patches_flat, prefix_tiled, fp, bb, grid_n):
    N, K, D, Hd = SEQ_LEN, PATCH_FEATS, EMBED_DIM, MLP_HIDDEN
    bp = grid_n * bb
    kernel = functools.partial(
        fused_vit_kernel, depth=DEPTH, num_heads=NUM_HEADS, head_dim=HEAD_DIM,
        bb=bb, seq=N, dim=D, hidden=Hd)

    return pl.pallas_call(
        kernel,
        out_shape=jax.ShapeDtypeStruct((bp, D), jnp.float32),
        grid=(grid_n,),
        in_specs=[
            pl.BlockSpec((bb * N, K), lambda b: (b, 0)),          # patches (per tile)
            pl.BlockSpec((bb * N, D), lambda b: (0, 0)),          # tiled prefix
            pl.BlockSpec((K, D), lambda b: (0, 0)),               # patch_w
            pl.BlockSpec((DEPTH, D, WMAT_COLS), lambda b: (0, 0, 0)),  # Wqkv|Wproj|fc1
            pl.BlockSpec((DEPTH, Hd, D), lambda b: (0, 0, 0)),    # fc2
            pl.BlockSpec((NVEC, VEC_W), lambda b: (0, 0)),        # all LN / bias vecs
        ],
        out_specs=pl.BlockSpec((bb, D), lambda b: (b, 0)),        # cls readout
        compiler_params=pltpu.CompilerParams(
            dimension_semantics=("parallel",)),
    )(patches_flat, prefix_tiled, fp["patch_w"], fp["wmat"], fp["fc2_w"], fp["vecs"])


# ---------------- glue: parameter init + one-time fusing prep + forward ----------------
def init_params(key):
    ks = iter(jax.random.split(key, 8 + 8 * DEPTH))
    std = 0.02
    K = PATCH_FEATS

    params = {
        # Conv2d(in_chans, embed_dim, kernel=patch, stride=patch) as a matmul:
        # weight [D, C, ps, ps] -> flattened & transposed to [C*ps*ps, D]
        "patch_w": (jax.random.normal(next(ks), (EMBED_DIM, K)) * std).T
                   .astype(jnp.float32),
        "patch_b": jnp.zeros((1, EMBED_DIM), jnp.float32),
        "cls_token": jax.random.normal(next(ks), (1, 1, EMBED_DIM)).astype(jnp.float32) * std,
        "pos_embed": jax.random.normal(next(ks), (1, SEQ_LEN, EMBED_DIM)).astype(jnp.float32) * std,
        "norm_w": jnp.ones((1, EMBED_DIM), jnp.float32),
        "norm_b": jnp.zeros((1, EMBED_DIM), jnp.float32),
        "blocks": [],
    }
    for _ in range(DEPTH):
        blk = {
            "ln1_w": jnp.ones((1, EMBED_DIM), jnp.float32),
            "ln1_b": jnp.zeros((1, EMBED_DIM), jnp.float32),
            # nn.Linear stores [out, in]; kernels use x @ W, so keep [in, out]
            "qkv_w": (jax.random.normal(next(ks), (3 * EMBED_DIM, EMBED_DIM)) * std).T
                     .astype(jnp.float32),
            "proj_w": (jax.random.normal(next(ks), (EMBED_DIM, EMBED_DIM)) * std).T
                      .astype(jnp.float32),
            "proj_b": jnp.zeros((1, EMBED_DIM), jnp.float32),
            "ln2_w": jnp.ones((1, EMBED_DIM), jnp.float32),
            "ln2_b": jnp.zeros((1, EMBED_DIM), jnp.float32),
            "fc1_w": (jax.random.normal(next(ks), (MLP_HIDDEN, EMBED_DIM)) * std).T
                     .astype(jnp.float32),
            "fc1_b": jnp.zeros((1, MLP_HIDDEN), jnp.float32),
            "fc2_w": (jax.random.normal(next(ks), (EMBED_DIM, MLP_HIDDEN)) * std).T
                     .astype(jnp.float32),
            "fc2_b": jnp.zeros((1, EMBED_DIM), jnp.float32),
        }
        params["blocks"].append(blk)
    return params


def prepare_fused_params(params):
    """One-time pure-JAX re-layout of the PyTorch-style params into packed slabs."""
    # prefix[0]  = cls_token + pos_embed[0]
    # prefix[1:] = patch_bias + pos_embed[1:]
    prefix = params["pos_embed"][0]
    prefix = prefix.at[0].add(params["cls_token"][0, 0])
    prefix = prefix.at[1:].add(params["patch_b"][0])

    def padrow(v):
        v = v.reshape(1, -1)
        return jnp.pad(v, ((0, 0), (0, VEC_W - v.shape[1])))

    wmat_layers, fc2_layers, vec_rows = [], [], []
    for blk in params["blocks"]:
        # [D, 3D] | [D, D] | [D, Hd]  ->  [D, 4D + Hd]
        wmat_layers.append(jnp.concatenate(
            [blk["qkv_w"], blk["proj_w"], blk["fc1_w"]], axis=1))
        fc2_layers.append(blk["fc2_w"])                              # [Hd, D]
        vec_rows += [padrow(blk["ln1_w"]), padrow(blk["ln1_b"]),
                     padrow(blk["proj_b"]), padrow(blk["ln2_w"]),
                     padrow(blk["ln2_b"]), padrow(blk["fc1_b"]),
                     padrow(blk["fc2_b"])]
    vec_rows += [padrow(params["norm_w"]), padrow(params["norm_b"])]

    return {
        "prefix": prefix,                                   # [N, D]
        "patch_w": params["patch_w"],                       # [K, D]
        "wmat": jnp.stack(wmat_layers, axis=0),             # [DEPTH, D, 4D+Hd]
        "fc2_w": jnp.stack(fc2_layers, axis=0),             # [DEPTH, Hd, D]
        "vecs": jnp.concatenate(vec_rows, axis=0),          # [NVEC, 128]
    }


def extract_patches_nchw(x, ps):
    # [B, C, H, W] -> [B, Hp*Wp, C*ps*ps], matching Conv2d(stride=ps).flatten(2).T order
    B, C, H, W = x.shape
    Hp, Wp = H // ps, W // ps
    x = x.reshape(B, C, Hp, ps, Wp, ps)
    x = x.transpose(0, 2, 4, 1, 3, 5)
    return x.reshape(B, Hp * Wp, C * ps * ps)


@jax.jit
def masked_vit_forward(x_nchw, fused_params):
    B = x_nchw.shape[0]
    bb = _choose_bb(B)
    grid_n = -(-B // bb)                                     # cdiv
    bp = grid_n * bb

    patches = extract_patches_nchw(x_nchw, PATCH)            # [B, P, K]
    zero_cls_row = jnp.zeros((B, 1, PATCH_FEATS), jnp.float32)   # placeholder for cls token
    patches = jnp.concatenate([zero_cls_row, patches], axis=1)   # [B, N, K]
    if bp != B:                                              # pad batch to a tile multiple
        patches = jnp.pad(patches, ((0, bp - B), (0, 0), (0, 0)))
    patches_flat = patches.reshape(bp * SEQ_LEN, PATCH_FEATS)

    prefix_tiled = jnp.tile(fused_params["prefix"], (bb, 1)) # [bb*N, D]
    out = fused_forward(patches_flat, prefix_tiled, fused_params, bb, grid_n)
    return out[:B]                                           # [B, D] (cls readout)


if __name__ == "__main__":
    key = jax.random.PRNGKey(0)
    k_params, k_x = jax.random.split(key)
    params = init_params(k_params)
    fused_params = prepare_fused_params(params)
    x = jax.random.normal(k_x, (2, IN_CHANS, IMG, IMG), dtype=jnp.float32)  # NCHW

    out = masked_vit_forward(x, fused_params)
    out = jax.block_until_ready(out)
    assert out.shape == (2, EMBED_DIM)
    assert bool(jnp.all(jnp.isfinite(out)))
    print("KERNEL_OK")
</pallas_src>

<mosaic_0001>
module attributes {stable_mosaic.version = 11 : i64} {
  func.func @fused_vit_kernel(%arg0: i32, %arg1: memref<40x192xf32, #tpu.memory_space<vmem>>, %arg2: memref<40x32xf32, #tpu.memory_space<vmem>>, %arg3: memref<192x32xf32, #tpu.memory_space<vmem>>, %arg4: memref<2x32x256xf32, #tpu.memory_space<vmem>>, %arg5: memref<2x128x32xf32, #tpu.memory_space<vmem>>, %arg6: memref<16x128xf32, #tpu.memory_space<vmem>>, %arg7: memref<8x32xf32, #tpu.memory_space<vmem>>) attributes {dimension_semantics = [#tpu.dimension_semantics<parallel>], iteration_bounds = array<i64: 1>, scalar_prefetch = 0 : i64, scratch_operands = 0 : i64, tpu.core_type = #tpu.core_type<tc>, window_params = [{transform_indices = @transform_0, window_bounds = array<i64: 40, 192>}, {pipeline_mode = #tpu.pipeline_mode<synchronous>, transform_indices = @transform_1, window_bounds = array<i64: 40, 32>}, {pipeline_mode = #tpu.pipeline_mode<synchronous>, transform_indices = @transform_2, window_bounds = array<i64: 192, 32>}, {pipeline_mode = #tpu.pipeline_mode<synchronous>, transform_indices = @transform_3, window_bounds = array<i64: 2, 32, 256>}, {pipeline_mode = #tpu.pipeline_mode<synchronous>, transform_indices = @transform_4, window_bounds = array<i64: 2, 128, 32>}, {pipeline_mode = #tpu.pipeline_mode<synchronous>, transform_indices = @transform_5, window_bounds = array<i64: 16, 128>}, {transform_indices = @transform_6, window_bounds = array<i64: 8, 32>}]} {
    %0 = tpu.iota {dimensions = array<i32: 0>} : vector<40x40xi32>
    %1 = arith.sitofp %0 : vector<40x40xi32> to vector<40x40xf32>
    %2 = tpu.iota {dimensions = array<i32: 1>} : vector<40x40xi32>
    %3 = arith.sitofp %2 : vector<40x40xi32> to vector<40x40xf32>
    %cst = arith.constant 2.000000e-01 : f32
    %4 = vector.broadcast %cst : f32 to vector<40x40xf32>
    %5 = arith.mulf %1, %4 : vector<40x40xf32>
    %6 = math.floor %5 : vector<40x40xf32>
    %cst_0 = arith.constant 2.000000e-01 : f32
    %7 = vector.broadcast %cst_0 : f32 to vector<40x40xf32>
    %8 = arith.mulf %3, %7 : vector<40x40xf32>
    %9 = math.floor %8 : vector<40x40xf32>
    %10 = arith.cmpf oeq, %6, %9 : vector<40x40xf32>
    %cst_1 = arith.constant 0.000000e+00 : f32
    %cst_2 = arith.constant -1.000000e+30 : f32
    %11 = vector.broadcast %cst_1 : f32 to vector<40x40xf32>
    %12 = vector.broadcast %cst_2 : f32 to vector<40x40xf32>
    %13 = arith.select %10, %11, %12 : vector<40x40xi1>, vector<40x40xf32>
    %14 = tpu.iota {dimensions = array<i32: 0>} : vector<8x40xi32>
    %15 = tpu.iota {dimensions = array<i32: 1>} : vector<8x40xi32>
    %c5_i32 = arith.constant 5 : i32
    %16 = vector.broadcast %c5_i32 : i32 to vector<8x40xi32>
    %17 = arith.muli %14, %16 : vector<8x40xi32>
    %18 = arith.cmpi eq, %15, %17 : vector<8x40xi32>
    %19 = arith.extui %18 : vector<8x40xi1> to vector<8x40xi32>
    %20 = arith.sitofp %19 : vector<8x40xi32> to vector<8x40xf32>
    %c0 = arith.constant 0 : index
    %c0_3 = arith.constant 0 : index
    %21 = vector.load %arg6[%c0, %c0_3] : memref<16x128xf32, #tpu.memory_space<vmem>>, vector<16x128xf32>
    %c0_4 = arith.constant 0 : index
    %c0_5 = arith.constant 0 : index
    %22 = vector.load %arg1[%c0_4, %c0_5] : memref<40x192xf32, #tpu.memory_space<vmem>>, vector<40x192xf32>
    %c0_6 = arith.constant 0 : index
    %c0_7 = arith.constant 0 : index
    %23 = vector.load %arg3[%c0_6, %c0_7] : memref<192x32xf32, #tpu.memory_space<vmem>>, vector<192x32xf32>
    %cst_8 = arith.constant dense<0.000000e+00> : vector<40x32xf32>
    %24 = tpu.matmul %22, %23, %cst_8 {dimension_numbers = #tpu.dot_dimension_numbers<[1], [0], [0], [1], [0, 0, 1, 1], [], []>} : vector<40x192xf32>, vector<192x32xf32>, vector<40x32xf32> -> vector<40x32xf32>
    %c0_9 = arith.constant 0 : index
    %c0_10 = arith.constant 0 : index
    %25 = vector.load %arg2[%c0_9, %c0_10] : memref<40x32xf32, #tpu.memory_space<vmem>>, vector<40x32xf32>
    %26 = arith.addf %24, %25 : vector<40x32xf32>
    %c0_11 = arith.constant 0 : index
    %c0_12 = arith.constant 0 : index
    %c0_13 = arith.constant 0 : index
    %27 = vector.load %arg4[%c0_11, %c0_12, %c0_13] : memref<2x32x256xf32, #tpu.memory_space<vmem>>, vector<1x32x256xf32>
    %28 = vector.shape_cast %27 : vector<1x32x256xf32> to vector<32x256xf32>
    %29 = vector.extract_strided_slice %28 {offsets = [0, 0], sizes = [32, 96], strides = [1, 1]} : vector<32x256xf32> to vector<32x96xf32>
    %30 = vector.extract_strided_slice %28 {offsets = [0, 96], sizes = [32, 32], strides = [1, 1]} : vector<32x256xf32> to vector<32x32xf32>
    %31 = vector.extract_strided_slice %28 {offsets = [0, 128], sizes = [32, 128], strides = [1, 1]} : vector<32x256xf32> to vector<32x128xf32>
    %c0_14 = arith.constant 0 : index
    %c0_15 = arith.constant 0 : index
    %c0_16 = arith.constant 0 : index
    %32 = vector.load %arg5[%c0_14, %c0_15, %c0_16] : memref<2x128x32xf32, #tpu.memory_space<vmem>>, vector<1x128x32xf32>
    %33 = vector.shape_cast %32 : vector<1x128x32xf32> to vector<128x32xf32>
    %34 = vector.extract_strided_slice %21 {offsets = [0, 0], sizes = [1, 32], strides = [1, 1]} : vector<16x128xf32> to vector<1x32xf32>
    %35 = vector.extract_strided_slice %21 {offsets = [1, 0], sizes = [1, 32], strides = [1, 1]} : vector<16x128xf32> to vector<1x32xf32>
    %36 = vector.extract_strided_slice %21 {offsets = [2, 0], sizes = [1, 32], strides = [1, 1]} : vector<16x128xf32> to vector<1x32xf32>
    %37 = vector.extract_strided_slice %21 {offsets = [3, 0], sizes = [1, 32], strides = [1, 1]} : vector<16x128xf32> to vector<1x32xf32>
    %38 = vector.extract_strided_slice %21 {offsets = [4, 0], sizes = [1, 32], strides = [1, 1]} : vector<16x128xf32> to vector<1x32xf32>
    %39 = vector.extract_strided_slice %21 {offsets = [5, 0], sizes = [1, 128], strides = [1, 1]} : vector<16x128xf32> to vector<1x128xf32>
    %40 = vector.extract_strided_slice %21 {offsets = [6, 0], sizes = [1, 32], strides = [1, 1]} : vector<16x128xf32> to vector<1x32xf32>
    %cst_17 = arith.constant dense<0.000000e+00> : vector<40xf32>
    %41 = vector.multi_reduction <add>, %26, %cst_17 [1] : vector<40x32xf32> to vector<40xf32>
    %42 = vector.shape_cast %41 : vector<40xf32> to vector<40x1xf32>
    %cst_18 = arith.constant 3.200000e+01 : f32
    %43 = vector.broadcast %cst_18 : f32 to vector<40x1xf32>
    %44 = arith.divf %42, %43 : vector<40x1xf32>
    %45 = vector.broadcast %44 : vector<40x1xf32> to vector<40x32xf32>
    %46 = arith.subf %26, %45 : vector<40x32xf32>
    %47 = arith.mulf %46, %46 : vector<40x32xf32>
    %cst_19 = arith.constant dense<0.000000e+00> : vector<40xf32>
    %48 = vector.multi_reduction <add>, %47, %cst_19 [1] : vector<40x32xf32> to vector<40xf32>
    %49 = vector.shape_cast %48 : vector<40xf32> to vector<40x1xf32>
    %cst_20 = arith.constant 3.200000e+01 : f32
    %50 = vector.broadcast %cst_20 : f32 to vector<40x1xf32>
    %51 = arith.divf %49, %50 : vector<40x1xf32>
    %52 = vector.broadcast %44 : vector<40x1xf32> to vector<40x32xf32>
    %53 = arith.subf %26, %52 : vector<40x32xf32>
    %cst_21 = arith.constant 9.99999974E-6 : f32
    %54 = vector.broadcast %cst_21 : f32 to vector<40x1xf32>
    %55 = arith.addf %51, %54 : vector<40x1xf32>
    %56 = math.rsqrt %55 : vector<40x1xf32>
    %57 = vector.broadcast %56 : vector<40x1xf32> to vector<40x32xf32>
    %58 = arith.mulf %53, %57 : vector<40x32xf32>
    %59 = vector.broadcast %34 : vector<1x32xf32> to vector<40x32xf32>
    %60 = arith.mulf %58, %59 : vector<40x32xf32>
    %61 = vector.broadcast %35 : vector<1x32xf32> to vector<40x32xf32>
    %62 = arith.addf %60, %61 : vector<40x32xf32>
    %cst_22 = arith.constant dense<0.000000e+00> : vector<40x96xf32>
    %63 = tpu.matmul %62, %29, %cst_22 {dimension_numbers = #tpu.dot_dimension_numbers<[1], [0], [0], [1], [0, 0, 1, 1], [], []>} : vector<40x32xf32>, vector<32x96xf32>, vector<40x96xf32> -> vector<40x96xf32>
    %64 = vector.extract_strided_slice %63 {offsets = [0, 0], sizes = [40, 8], strides = [1, 1]} : vector<40x96xf32> to vector<40x8xf32>
    %65 = vector.extract_strided_slice %63 {offsets = [0, 32], sizes = [40, 8], strides = [1, 1]} : vector<40x96xf32> to vector<40x8xf32>
    %66 = vector.extract_strided_slice %63 {offsets = [0, 64], sizes = [40, 8], strides = [1, 1]} : vector<40x96xf32> to vector<40x8xf32>
    %cst_23 = arith.constant dense<0.000000e+00> : vector<40x40xf32>
    %67 = tpu.matmul %64, %65, %cst_23 {dimension_numbers = #tpu.dot_dimension_numbers<[1], [1], [0], [0], [0, 0, 1, 0], [], []>} : vector<40x8xf32>, vector<40x8xf32>, vector<40x40xf32> -> vector<40x40xf32>
    %cst_24 = arith.constant 0.353553385 : f32
    %68 = vector.broadcast %cst_24 : f32 to vector<40x40xf32>
    %69 = arith.mulf %67, %68 : vector<40x40xf32>
    %70 = arith.addf %69, %13 : vector<40x40xf32>
    %cst_25 = arith.constant dense<0xFF800000> : vector<40xf32>
    %71 = vector.multi_reduction <maximumf>, %70, %cst_25 [1] : vector<40x40xf32> to vector<40xf32>
    %72 = vector.shape_cast %71 : vector<40xf32> to vector<40x1xf32>
    %73 = vector.broadcast %72 : vector<40x1xf32> to vector<40x40xf32>
    %74 = arith.subf %70, %73 : vector<40x40xf32>
    %75 = math.exp %74 : vector<40x40xf32>
    %cst_26 = arith.constant dense<0.000000e+00> : vector<40xf32>
    %76 = vector.multi_reduction <add>, %75, %cst_26 [1] : vector<40x40xf32> to vector<40xf32>
    %77 = vector.shape_cast %76 : vector<40xf32> to vector<40x1xf32>
    %78 = vector.broadcast %77 : vector<40x1xf32> to vector<40x40xf32>
    %79 = arith.divf %75, %78 : vector<40x40xf32>
    %cst_27 = arith.constant dense<0.000000e+00> : vector<40x8xf32>
    %80 = tpu.matmul %79, %66, %cst_27 {dimension_numbers = #tpu.dot_dimension_numbers<[1], [0], [0], [1], [0, 0, 1, 1], [], []>} : vector<40x40xf32>, vector<40x8xf32>, vector<40x8xf32> -> vector<40x8xf32>
    %81 = vector.extract_strided_slice %63 {offsets = [0, 8], sizes = [40, 8], strides = [1, 1]} : vector<40x96xf32> to vector<40x8xf32>
    %82 = vector.extract_strided_slice %63 {offsets = [0, 40], sizes = [40, 8], strides = [1, 1]} : vector<40x96xf32> to vector<40x8xf32>
    %83 = vector.extract_strided_slice %63 {offsets = [0, 72], sizes = [40, 8], strides = [1, 1]} : vector<40x96xf32> to vector<40x8xf32>
    %cst_28 = arith.constant dense<0.000000e+00> : vector<40x40xf32>
    %84 = tpu.matmul %81, %82, %cst_28 {dimension_numbers = #tpu.dot_dimension_numbers<[1], [1], [0], [0], [0, 0, 1, 0], [], []>} : vector<40x8xf32>, vector<40x8xf32>, vector<40x40xf32> -> vector<40x40xf32>
    %cst_29 = arith.constant 0.353553385 : f32
    %85 = vector.broadcast %cst_29 : f32 to vector<40x40xf32>
    %86 = arith.mulf %84, %85 : vector<40x40xf32>
    %87 = arith.addf %86, %13 : vector<40x40xf32>
    %cst_30 = arith.constant dense<0xFF800000> : vector<40xf32>
    %88 = vector.multi_reduction <maximumf>, %87, %cst_30 [1] : vector<40x40xf32> to vector<40xf32>
    %89 = vector.shape_cast %88 : vector<40xf32> to vector<40x1xf32>
    %90 = vector.broadcast %89 : vector<40x1xf32> to vector<40x40xf32>
    %91 = arith.subf %87, %90 : vector<40x40xf32>
    %92 = math.exp %91 : vector<40x40xf32>
    %cst_31 = arith.constant dense<0.000000e+00> : vector<40xf32>
    %93 = vector.multi_reduction <add>, %92, %cst_31 [1] : vector<40x40xf32> to vector<40xf32>
    %94 = vector.shape_cast %93 : vector<40xf32> to vector<40x1xf32>
    %95 = vector.broadcast %94 : vector<40x1xf32> to vector<40x40xf32>
    %96 = arith.divf %92, %95 : vector<40x40xf32>
    %cst_32 = arith.constant dense<0.000000e+00> : vector<40x8xf32>
    %97 = tpu.matmul %96, %83, %cst_32 {dimension_numbers = #tpu.dot_dimension_numbers<[1], [0], [0], [1], [0, 0, 1, 1], [], []>} : vector<40x40xf32>, vector<40x8xf32>, vector<40x8xf32> -> vector<40x8xf32>
    %98 = vector.extract_strided_slice %63 {offsets = [0, 16], sizes = [40, 8], strides = [1, 1]} : vector<40x96xf32> to vector<40x8xf32>
    %99 = vector.extract_strided_slice %63 {offsets = [0, 48], sizes = [40, 8], strides = [1, 1]} : vector<40x96xf32> to vector<40x8xf32>
    %100 = vector.extract_strided_slice %63 {offsets = [0, 80], sizes = [40, 8], strides = [1, 1]} : vector<40x96xf32> to vector<40x8xf32>
    %cst_33 = arith.constant dense<0.000000e+00> : vector<40x40xf32>
    %101 = tpu.matmul %98, %99, %cst_33 {dimension_numbers = #tpu.dot_dimension_numbers<[1], [1], [0], [0], [0, 0, 1, 0], [], []>} : vector<40x8xf32>, vector<40x8xf32>, vector<40x40xf32> -> vector<40x40xf32>
    %cst_34 = arith.constant 0.353553385 : f32
    %102 = vector.broadcast %cst_34 : f32 to vector<40x40xf32>
    %103 = arith.mulf %101, %102 : vector<40x40xf32>
    %104 = arith.addf %103, %13 : vector<40x40xf32>
    %cst_35 = arith.constant dense<0xFF800000> : vector<40xf32>
    %105 = vector.multi_reduction <maximumf>, %104, %cst_35 [1] : vector<40x40xf32> to vector<40xf32>
    %106 = vector.shape_cast %105 : vector<40xf32> to vector<40x1xf32>
    %107 = vector.broadcast %106 : vector<40x1xf32> to vector<40x40xf32>
    %108 = arith.subf %104, %107 : vector<40x40xf32>
    %109 = math.exp %108 : vector<40x40xf32>
    %cst_36 = arith.constant dense<0.000000e+00> : vector<40xf32>
    %110 = vector.multi_reduction <add>, %109, %cst_36 [1] : vector<40x40xf32> to vector<40xf32>
    %111 = vector.shape_cast %110 : vector<40xf32> to vector<40x1xf32>
    %112 = vector.broadcast %111 : vector<40x1xf32> to vector<40x40xf32>
    %113 = arith.divf %109, %112 : vector<40x40xf32>
    %cst_37 = arith.constant dense<0.000000e+00> : vector<40x8xf32>
    %114 = tpu.matmul %113, %100, %cst_37 {dimension_numbers = #tpu.dot_dimension_numbers<[1], [0], [0], [1], [0, 0, 1, 1], [], []>} : vector<40x40xf32>, vector<40x8xf32>, vector<40x8xf32> -> vector<40x8xf32>
    %115 = vector.extract_strided_slice %63 {offsets = [0, 24], sizes = [40, 8], strides = [1, 1]} : vector<40x96xf32> to vector<40x8xf32>
    %116 = vector.extract_strided_slice %63 {offsets = [0, 56], sizes = [40, 8], strides = [1, 1]} : vector<40x96xf32> to vector<40x8xf32>
    %117 = vector.extract_strided_slice %63 {offsets = [0, 88], sizes = [40, 8], strides = [1, 1]} : vector<40x96xf32> to vector<40x8xf32>
    %cst_38 = arith.constant dense<0.000000e+00> : vector<40x40xf32>
    %118 = tpu.matmul %115, %116, %cst_38 {dimension_numbers = #tpu.dot_dimension_numbers<[1], [1], [0], [0], [0, 0, 1, 0], [], []>} : vector<40x8xf32>, vector<40x8xf32>, vector<40x40xf32> -> vector<40x40xf32>
    %cst_39 = arith.constant 0.353553385 : f32
    %119 = vector.broadcast %cst_39 : f32 to vector<40x40xf32>
    %120 = arith.mulf %118, %119 : vector<40x40xf32>
    %121 = arith.addf %120, %13 : vector<40x40xf32>
    %cst_40 = arith.constant dense<0xFF800000> : vector<40xf32>
    %122 = vector.multi_reduction <maximumf>, %121, %cst_40 [1] : vector<40x40xf32> to vector<40xf32>
    %123 = vector.shape_cast %122 : vector<40xf32> to vector<40x1xf32>
    %124 = vector.broadcast %123 : vector<40x1xf32> to vector<40x40xf32>
    %125 = arith.subf %121, %124 : vector<40x40xf32>
    %126 = math.exp %125 : vector<40x40xf32>
    %cst_41 = arith.constant dense<0.000000e+00> : vector<40xf32>
    %127 = vector.multi_reduction <add>, %126, %cst_41 [1] : vector<40x40xf32> to vector<40xf32>
    %128 = vector.shape_cast %127 : vector<40xf32> to vector<40x1xf32>
    %129 = vector.broadcast %128 : vector<40x1xf32> to vector<40x40xf32>
    %130 = arith.divf %126, %129 : vector<40x40xf32>
    %cst_42 = arith.constant dense<0.000000e+00> : vector<40x8xf32>
    %131 = tpu.matmul %130, %117, %cst_42 {dimension_numbers = #tpu.dot_dimension_numbers<[1], [0], [0], [1], [0, 0, 1, 1], [], []>} : vector<40x40xf32>, vector<40x8xf32>, vector<40x8xf32> -> vector<40x8xf32>
    %132 = tpu.concatenate %80, %97, %114, %131 in 1 : vector<40x8xf32>, vector<40x8xf32>, vector<40x8xf32>, vector<40x8xf32> -> vector<40x32xf32>
    %cst_43 = arith.constant dense<0.000000e+00> : vector<40x32xf32>
    %133 = tpu.matmul %132, %30, %cst_43 {dimension_numbers = #tpu.dot_dimension_numbers<[1], [0], [0], [1], [0, 0, 1, 1], [], []>} : vector<40x32xf32>, vector<32x32xf32>, vector<40x32xf32> -> vector<40x32xf32>
    %134 = arith.addf %26, %133 : vector<40x32xf32>
    %135 = vector.broadcast %36 : vector<1x32xf32> to vector<40x32xf32>
    %136 = arith.addf %134, %135 : vector<40x32xf32>
    %cst_44 = arith.constant dense<0.000000e+00> : vector<40xf32>
    %137 = vector.multi_reduction <add>, %136, %cst_44 [1] : vector<40x32xf32> to vector<40xf32>
    %138 = vector.shape_cast %137 : vector<40xf32> to vector<40x1xf32>
    %cst_45 = arith.constant 3.200000e+01 : f32
    %139 = vector.broadcast %cst_45 : f32 to vector<40x1xf32>
    %140 = arith.divf %138, %139 : vector<40x1xf32>
    %141 = vector.broadcast %140 : vector<40x1xf32> to vector<40x32xf32>
    %142 = arith.subf %136, %141 : vector<40x32xf32>
    %143 = arith.mulf %142, %142 : vector<40x32xf32>
    %cst_46 = arith.constant dense<0.000000e+00> : vector<40xf32>
    %144 = vector.multi_reduction <add>, %143, %cst_46 [1] : vector<40x32xf32> to vector<40xf32>
    %145 = vector.shape_cast %144 : vector<40xf32> to vector<40x1xf32>
    %cst_47 = arith.constant 3.200000e+01 : f32
    %146 = vector.broadcast %cst_47 : f32 to vector<40x1xf32>
    %147 = arith.divf %145, %146 : vector<40x1xf32>
    %148 = vector.broadcast %140 : vector<40x1xf32> to vector<40x32xf32>
    %149 = arith.subf %136, %148 : vector<40x32xf32>
    %cst_48 = arith.constant 9.99999974E-6 : f32
    %150 = vector.broadcast %cst_48 : f32 to vector<40x1xf32>
    %151 = arith.addf %147, %150 : vector<40x1xf32>
    %152 = math.rsqrt %151 : vector<40x1xf32>
    %153 = vector.broadcast %152 : vector<40x1xf32> to vector<40x32xf32>
    %154 = arith.mulf %149, %153 : vector<40x32xf32>
    %155 = vector.broadcast %37 : vector<1x32xf32> to vector<40x32xf32>
    %156 = arith.mulf %154, %155 : vector<40x32xf32>
    %157 = vector.broadcast %38 : vector<1x32xf32> to vector<40x32xf32>
    %158 = arith.addf %156, %157 : vector<40x32xf32>
    %cst_49 = arith.constant dense<0.000000e+00> : vector<40x128xf32>
    %159 = tpu.matmul %158, %31, %cst_49 {dimension_numbers = #tpu.dot_dimension_numbers<[1], [0], [0], [1], [0, 0, 1, 1], [], []>} : vector<40x32xf32>, vector<32x128xf32>, vector<40x128xf32> -> vector<40x128xf32>
    %160 = vector.broadcast %39 : vector<1x128xf32> to vector<40x128xf32>
    %161 = arith.addf %159, %160 : vector<40x128xf32>
    %cst_50 = arith.constant 5.000000e-01 : f32
    %162 = vector.broadcast %cst_50 : f32 to vector<40x128xf32>
    %163 = arith.mulf %162, %161 : vector<40x128xf32>
    %cst_51 = arith.constant 0.707106769 : f32
    %164 = vector.broadcast %cst_51 : f32 to vector<40x128xf32>
    %165 = arith.mulf %161, %164 : vector<40x128xf32>
    %166 = math.erf %165 : vector<40x128xf32>
    %cst_52 = arith.constant 1.000000e+00 : f32
    %167 = vector.broadcast %cst_52 : f32 to vector<40x128xf32>
    %168 = arith.addf %167, %166 : vector<40x128xf32>
    %169 = arith.mulf %163, %168 : vector<40x128xf32>
    %cst_53 = arith.constant dense<0.000000e+00> : vector<40x32xf32>
    %170 = tpu.matmul %169, %33, %cst_53 {dimension_numbers = #tpu.dot_dimension_numbers<[1], [0], [0], [1], [0, 0, 1, 1], [], []>} : vector<40x128xf32>, vector<128x32xf32>, vector<40x32xf32> -> vector<40x32xf32>
    %171 = arith.addf %136, %170 : vector<40x32xf32>
    %172 = vector.broadcast %40 : vector<1x32xf32> to vector<40x32xf32>
    %173 = arith.addf %171, %172 : vector<40x32xf32>
    %c1 = arith.constant 1 : index
    %c0_54 = arith.constant 0 : index
    %c0_55 = arith.constant 0 : index
    %174 = vector.load %arg4[%c1, %c0_54, %c0_55] : memref<2x32x256xf32, #tpu.memory_space<vmem>>, vector<1x32x256xf32>
    %175 = vector.shape_cast %174 : vector<1x32x256xf32> to vector<32x256xf32>
    %176 = vector.extract_strided_slice %175 {offsets = [0, 0], sizes = [32, 96], strides = [1, 1]} : vector<32x256xf32> to vector<32x96xf32>
    %177 = vector.extract_strided_slice %175 {offsets = [0, 96], sizes = [32, 32], strides = [1, 1]} : vector<32x256xf32> to vector<32x32xf32>
    %178 = vector.extract_strided_slice %175 {offsets = [0, 128], sizes = [32, 128], strides = [1, 1]} : vector<32x256xf32> to vector<32x128xf32>
    %c1_56 = arith.constant 1 : index
    %c0_57 = arith.constant 0 : index
    %c0_58 = arith.constant 0 : index
    %179 = vector.load %arg5[%c1_56, %c0_57, %c0_58] : memref<2x128x32xf32, #tpu.memory_space<vmem>>, vector<1x128x32xf32>
    %180 = vector.shape_cast %179 : vector<1x128x32xf32> to vector<128x32xf32>
    %181 = vector.extract_strided_slice %21 {offsets = [7, 0], sizes = [1, 32], strides = [1, 1]} : vector<16x128xf32> to vector<1x32xf32>
    %182 = vector.extract_strided_slice %21 {offsets = [8, 0], sizes = [1, 32], strides = [1, 1]} : vector<16x128xf32> to vector<1x32xf32>
    %183 = vector.extract_strided_slice %21 {offsets = [9, 0], sizes = [1, 32], strides = [1, 1]} : vector<16x128xf32> to vector<1x32xf32>
    %184 = vector.extract_strided_slice %21 {offsets = [10, 0], sizes = [1, 32], strides = [1, 1]} : vector<16x128xf32> to vector<1x32xf32>
    %185 = vector.extract_strided_slice %21 {offsets = [11, 0], sizes = [1, 32], strides = [1, 1]} : vector<16x128xf32> to vector<1x32xf32>
    %186 = vector.extract_strided_slice %21 {offsets = [12, 0], sizes = [1, 128], strides = [1, 1]} : vector<16x128xf32> to vector<1x128xf32>
    %187 = vector.extract_strided_slice %21 {offsets = [13, 0], sizes = [1, 32], strides = [1, 1]} : vector<16x128xf32> to vector<1x32xf32>
    %cst_59 = arith.constant dense<0.000000e+00> : vector<40xf32>
    %188 = vector.multi_reduction <add>, %173, %cst_59 [1] : vector<40x32xf32> to vector<40xf32>
    %189 = vector.shape_cast %188 : vector<40xf32> to vector<40x1xf32>
    %cst_60 = arith.constant 3.200000e+01 : f32
    %190 = vector.broadcast %cst_60 : f32 to vector<40x1xf32>
    %191 = arith.divf %189, %190 : vector<40x1xf32>
    %192 = vector.broadcast %191 : vector<40x1xf32> to vector<40x32xf32>
    %193 = arith.subf %173, %192 : vector<40x32xf32>
    %194 = arith.mulf %193, %193 : vector<40x32xf32>
    %cst_61 = arith.constant dense<0.000000e+00> : vector<40xf32>
    %195 = vector.multi_reduction <add>, %194, %cst_61 [1] : vector<40x32xf32> to vector<40xf32>
    %196 = vector.shape_cast %195 : vector<40xf32> to vector<40x1xf32>
    %cst_62 = arith.constant 3.200000e+01 : f32
    %197 = vector.broadcast %cst_62 : f32 to vector<40x1xf32>
    %198 = arith.divf %196, %197 : vector<40x1xf32>
    %199 = vector.broadcast %191 : vector<40x1xf32> to vector<40x32xf32>
    %200 = arith.subf %173, %199 : vector<40x32xf32>
    %cst_63 = arith.constant 9.99999974E-6 : f32
    %201 = vector.broadcast %cst_63 : f32 to vector<40x1xf32>
    %202 = arith.addf %198, %201 : vector<40x1xf32>
    %203 = math.rsqrt %202 : vector<40x1xf32>
    %204 = vector.broadcast %203 : vector<40x1xf32> to vector<40x32xf32>
    %205 = arith.mulf %200, %204 : vector<40x32xf32>
    %206 = vector.broadcast %181 : vector<1x32xf32> to vector<40x32xf32>
    %207 = arith.mulf %205, %206 : vector<40x32xf32>
    %208 = vector.broadcast %182 : vector<1x32xf32> to vector<40x32xf32>
    %209 = arith.addf %207, %208 : vector<40x32xf32>
    %cst_64 = arith.constant dense<0.000000e+00> : vector<40x96xf32>
    %210 = tpu.matmul %209, %176, %cst_64 {dimension_numbers = #tpu.dot_dimension_numbers<[1], [0], [0], [1], [0, 0, 1, 1], [], []>} : vector<40x32xf32>, vector<32x96xf32>, vector<40x96xf32> -> vector<40x96xf32>
    %211 = vector.extract_strided_slice %210 {offsets = [0, 0], sizes = [40, 8], strides = [1, 1]} : vector<40x96xf32> to vector<40x8xf32>
    %212 = vector.extract_strided_slice %210 {offsets = [0, 32], sizes = [40, 8], strides = [1, 1]} : vector<40x96xf32> to vector<40x8xf32>
    %213 = vector.extract_strided_slice %210 {offsets = [0, 64], sizes = [40, 8], strides = [1, 1]} : vector<40x96xf32> to vector<40x8xf32>
    %cst_65 = arith.constant dense<0.000000e+00> : vector<40x40xf32>
    %214 = tpu.matmul %211, %212, %cst_65 {dimension_numbers = #tpu.dot_dimension_numbers<[1], [1], [0], [0], [0, 0, 1, 0], [], []>} : vector<40x8xf32>, vector<40x8xf32>, vector<40x40xf32> -> vector<40x40xf32>
    %cst_66 = arith.constant 0.353553385 : f32
    %215 = vector.broadcast %cst_66 : f32 to vector<40x40xf32>
    %216 = arith.mulf %214, %215 : vector<40x40xf32>
    %217 = arith.addf %216, %13 : vector<40x40xf32>
    %cst_67 = arith.constant dense<0xFF800000> : vector<40xf32>
    %218 = vector.multi_reduction <maximumf>, %217, %cst_67 [1] : vector<40x40xf32> to vector<40xf32>
    %219 = vector.shape_cast %218 : vector<40xf32> to vector<40x1xf32>
    %220 = vector.broadcast %219 : vector<40x1xf32> to vector<40x40xf32>
    %221 = arith.subf %217, %220 : vector<40x40xf32>
    %222 = math.exp %221 : vector<40x40xf32>
    %cst_68 = arith.constant dense<0.000000e+00> : vector<40xf32>
    %223 = vector.multi_reduction <add>, %222, %cst_68 [1] : vector<40x40xf32> to vector<40xf32>
    %224 = vector.shape_cast %223 : vector<40xf32> to vector<40x1xf32>
    %225 = vector.broadcast %224 : vector<40x1xf32> to vector<40x40xf32>
    %226 = arith.divf %222, %225 : vector<40x40xf32>
    %cst_69 = arith.constant dense<0.000000e+00> : vector<40x8xf32>
    %227 = tpu.matmul %226, %213, %cst_69 {dimension_numbers = #tpu.dot_dimension_numbers<[1], [0], [0], [1], [0, 0, 1, 1], [], []>} : vector<40x40xf32>, vector<40x8xf32>, vector<40x8xf32> -> vector<40x8xf32>
    %228 = vector.extract_strided_slice %210 {offsets = [0, 8], sizes = [40, 8], strides = [1, 1]} : vector<40x96xf32> to vector<40x8xf32>
    %229 = vector.extract_strided_slice %210 {offsets = [0, 40], sizes = [40, 8], strides = [1, 1]} : vector<40x96xf32> to vector<40x8xf32>
    %230 = vector.extract_strided_slice %210 {offsets = [0, 72], sizes = [40, 8], strides = [1, 1]} : vector<40x96xf32> to vector<40x8xf32>
    %cst_70 = arith.constant dense<0.000000e+00> : vector<40x40xf32>
    %231 = tpu.matmul %228, %229, %cst_70 {dimension_numbers = #tpu.dot_dimension_numbers<[1], [1], [0], [0], [0, 0, 1, 0], [], []>} : vector<40x8xf32>, vector<40x8xf32>, vector<40x40xf32> -> vector<40x40xf32>
    %cst_71 = arith.constant 0.353553385 : f32
    %232 = vector.broadcast %cst_71 : f32 to vector<40x40xf32>
    %233 = arith.mulf %231, %232 : vector<40x40xf32>
    %234 = arith.addf %233, %13 : vector<40x40xf32>
    %cst_72 = arith.constant dense<0xFF800000> : vector<40xf32>
    %235 = vector.multi_reduction <maximumf>, %234, %cst_72 [1] : vector<40x40xf32> to vector<40xf32>
    %236 = vector.shape_cast %235 : vector<40xf32> to vector<40x1xf32>
    %237 = vector.broadcast %236 : vector<40x1xf32> to vector<40x40xf32>
    %238 = arith.subf %234, %237 : vector<40x40xf32>
    %239 = math.exp %238 : vector<40x40xf32>
    %cst_73 = arith.constant dense<0.000000e+00> : vector<40xf32>
    %240 = vector.multi_reduction <add>, %239, %cst_73 [1] : vector<40x40xf32> to vector<40xf32>
    %241 = vector.shape_cast %240 : vector<40xf32> to vector<40x1xf32>
    %242 = vector.broadcast %241 : vector<40x1xf32> to vector<40x40xf32>
    %243 = arith.divf %239, %242 : vector<40x40xf32>
    %cst_74 = arith.constant dense<0.000000e+00> : vector<40x8xf32>
    %244 = tpu.matmul %243, %230, %cst_74 {dimension_numbers = #tpu.dot_dimension_numbers<[1], [0], [0], [1], [0, 0, 1, 1], [], []>} : vector<40x40xf32>, vector<40x8xf32>, vector<40x8xf32> -> vector<40x8xf32>
    %245 = vector.extract_strided_slice %210 {offsets = [0, 16], sizes = [40, 8], strides = [1, 1]} : vector<40x96xf32> to vector<40x8xf32>
    %246 = vector.extract_strided_slice %210 {offsets = [0, 48], sizes = [40, 8], strides = [1, 1]} : vector<40x96xf32> to vector<40x8xf32>
    %247 = vector.extract_strided_slice %210 {offsets = [0, 80], sizes = [40, 8], strides = [1, 1]} : vector<40x96xf32> to vector<40x8xf32>
    %cst_75 = arith.constant dense<0.000000e+00> : vector<40x40xf32>
    %248 = tpu.matmul %245, %246, %cst_75 {dimension_numbers = #tpu.dot_dimension_numbers<[1], [1], [0], [0], [0, 0, 1, 0], [], []>} : vector<40x8xf32>, vector<40x8xf32>, vector<40x40xf32> -> vector<40x40xf32>
    %cst_76 = arith.constant 0.353553385 : f32
    %249 = vector.broadcast %cst_76 : f32 to vector<40x40xf32>
    %250 = arith.mulf %248, %249 : vector<40x40xf32>
    %251 = arith.addf %250, %13 : vector<40x40xf32>
    %cst_77 = arith.constant dense<0xFF800000> : vector<40xf32>
    %252 = vector.multi_reduction <maximumf>, %251, %cst_77 [1] : vector<40x40xf32> to vector<40xf32>
    %253 = vector.shape_cast %252 : vector<40xf32> to vector<40x1xf32>
    %254 = vector.broadcast %253 : vector<40x1xf32> to vector<40x40xf32>
    %255 = arith.subf %251, %254 : vector<40x40xf32>
    %256 = math.exp %255 : vector<40x40xf32>
    %cst_78 = arith.constant dense<0.000000e+00> : vector<40xf32>
    %257 = vector.multi_reduction <add>, %256, %cst_78 [1] : vector<40x40xf32> to vector<40xf32>
    %258 = vector.shape_cast %257 : vector<40xf32> to vector<40x1xf32>
    %259 = vector.broadcast %258 : vector<40x1xf32> to vector<40x40xf32>
    %260 = arith.divf %256, %259 : vector<40x40xf32>
    %cst_79 = arith.constant dense<0.000000e+00> : vector<40x8xf32>
    %261 = tpu.matmul %260, %247, %cst_79 {dimension_numbers = #tpu.dot_dimension_numbers<[1], [0], [0], [1], [0, 0, 1, 1], [], []>} : vector<40x40xf32>, vector<40x8xf32>, vector<40x8xf32> -> vector<40x8xf32>
    %262 = vector.extract_strided_slice %210 {offsets = [0, 24], sizes = [40, 8], strides = [1, 1]} : vector<40x96xf32> to vector<40x8xf32>
    %263 = vector.extract_strided_slice %210 {offsets = [0, 56], sizes = [40, 8], strides = [1, 1]} : vector<40x96xf32> to vector<40x8xf32>
    %264 = vector.extract_strided_slice %210 {offsets = [0, 88], sizes = [40, 8], strides = [1, 1]} : vector<40x96xf32> to vector<40x8xf32>
    %cst_80 = arith.constant dense<0.000000e+00> : vector<40x40xf32>
    %265 = tpu.matmul %262, %263, %cst_80 {dimension_numbers = #tpu.dot_dimension_numbers<[1], [1], [0], [0], [0, 0, 1, 0], [], []>} : vector<40x8xf32>, vector<40x8xf32>, vector<40x40xf32> -> vector<40x40xf32>
    %cst_81 = arith.constant 0.353553385 : f32
    %266 = vector.broadcast %cst_81 : f32 to vector<40x40xf32>
    %267 = arith.mulf %265, %266 : vector<40x40xf32>
    %268 = arith.addf %267, %13 : vector<40x40xf32>
    %cst_82 = arith.constant dense<0xFF800000> : vector<40xf32>
    %269 = vector.multi_reduction <maximumf>, %268, %cst_82 [1] : vector<40x40xf32> to vector<40xf32>
    %270 = vector.shape_cast %269 : vector<40xf32> to vector<40x1xf32>
    %271 = vector.broadcast %270 : vector<40x1xf32> to vector<40x40xf32>
    %272 = arith.subf %268, %271 : vector<40x40xf32>
    %273 = math.exp %272 : vector<40x40xf32>
    %cst_83 = arith.constant dense<0.000000e+00> : vector<40xf32>
    %274 = vector.multi_reduction <add>, %273, %cst_83 [1] : vector<40x40xf32> to vector<40xf32>
    %275 = vector.shape_cast %274 : vector<40xf32> to vector<40x1xf32>
    %276 = vector.broadcast %275 : vector<40x1xf32> to vector<40x40xf32>
    %277 = arith.divf %273, %276 : vector<40x40xf32>
    %cst_84 = arith.constant dense<0.000000e+00> : vector<40x8xf32>
    %278 = tpu.matmul %277, %264, %cst_84 {dimension_numbers = #tpu.dot_dimension_numbers<[1], [0], [0], [1], [0, 0, 1, 1], [], []>} : vector<40x40xf32>, vector<40x8xf32>, vector<40x8xf32> -> vector<40x8xf32>
    %279 = tpu.concatenate %227, %244, %261, %278 in 1 : vector<40x8xf32>, vector<40x8xf32>, vector<40x8xf32>, vector<40x8xf32> -> vector<40x32xf32>
    %cst_85 = arith.constant dense<0.000000e+00> : vector<40x32xf32>
    %280 = tpu.matmul %279, %177, %cst_85 {dimension_numbers = #tpu.dot_dimension_numbers<[1], [0], [0], [1], [0, 0, 1, 1], [], []>} : vector<40x32xf32>, vector<32x32xf32>, vector<40x32xf32> -> vector<40x32xf32>
    %281 = arith.addf %173, %280 : vector<40x32xf32>
    %282 = vector.broadcast %183 : vector<1x32xf32> to vector<40x32xf32>
    %283 = arith.addf %281, %282 : vector<40x32xf32>
    %cst_86 = arith.constant dense<0.000000e+00> : vector<40xf32>
    %284 = vector.multi_reduction <add>, %283, %cst_86 [1] : vector<40x32xf32> to vector<40xf32>
    %285 = vector.shape_cast %284 : vector<40xf32> to vector<40x1xf32>
    %cst_87 = arith.constant 3.200000e+01 : f32
    %286 = vector.broadcast %cst_87 : f32 to vector<40x1xf32>
    %287 = arith.divf %285, %286 : vector<40x1xf32>
    %288 = vector.broadcast %287 : vector<40x1xf32> to vector<40x32xf32>
    %289 = arith.subf %283, %288 : vector<40x32xf32>
    %290 = arith.mulf %289, %289 : vector<40x32xf32>
    %cst_88 = arith.constant dense<0.000000e+00> : vector<40xf32>
    %291 = vector.multi_reduction <add>, %290, %cst_88 [1] : vector<40x32xf32> to vector<40xf32>
    %292 = vector.shape_cast %291 : vector<40xf32> to vector<40x1xf32>
    %cst_89 = arith.constant 3.200000e+01 : f32
    %293 = vector.broadcast %cst_89 : f32 to vector<40x1xf32>
    %294 = arith.divf %292, %293 : vector<40x1xf32>
    %295 = vector.broadcast %287 : vector<40x1xf32> to vector<40x32xf32>
    %296 = arith.subf %283, %295 : vector<40x32xf32>
    %cst_90 = arith.constant 9.99999974E-6 : f32
    %297 = vector.broadcast %cst_90 : f32 to vector<40x1xf32>
    %298 = arith.addf %294, %297 : vector<40x1xf32>
    %299 = math.rsqrt %298 : vector<40x1xf32>
    %300 = vector.broadcast %299 : vector<40x1xf32> to vector<40x32xf32>
    %301 = arith.mulf %296, %300 : vector<40x32xf32>
    %302 = vector.broadcast %184 : vector<1x32xf32> to vector<40x32xf32>
    %303 = arith.mulf %301, %302 : vector<40x32xf32>
    %304 = vector.broadcast %185 : vector<1x32xf32> to vector<40x32xf32>
    %305 = arith.addf %303, %304 : vector<40x32xf32>
    %cst_91 = arith.constant dense<0.000000e+00> : vector<40x128xf32>
    %306 = tpu.matmul %305, %178, %cst_91 {dimension_numbers = #tpu.dot_dimension_numbers<[1], [0], [0], [1], [0, 0, 1, 1], [], []>} : vector<40x32xf32>, vector<32x128xf32>, vector<40x128xf32> -> vector<40x128xf32>
    %307 = vector.broadcast %186 : vector<1x128xf32> to vector<40x128xf32>
    %308 = arith.addf %306, %307 : vector<40x128xf32>
    %cst_92 = arith.constant 5.000000e-01 : f32
    %309 = vector.broadcast %cst_92 : f32 to vector<40x128xf32>
    %310 = arith.mulf %309, %308 : vector<40x128xf32>
    %cst_93 = arith.constant 0.707106769 : f32
    %311 = vector.broadcast %cst_93 : f32 to vector<40x128xf32>
    %312 = arith.mulf %308, %311 : vector<40x128xf32>
    %313 = math.erf %312 : vector<40x128xf32>
    %cst_94 = arith.constant 1.000000e+00 : f32
    %314 = vector.broadcast %cst_94 : f32 to vector<40x128xf32>
    %315 = arith.addf %314, %313 : vector<40x128xf32>
    %316 = arith.mulf %310, %315 : vector<40x128xf32>
    %cst_95 = arith.constant dense<0.000000e+00> : vector<40x32xf32>
    %317 = tpu.matmul %316, %180, %cst_95 {dimension_numbers = #tpu.dot_dimension_numbers<[1], [0], [0], [1], [0, 0, 1, 1], [], []>} : vector<40x128xf32>, vector<128x32xf32>, vector<40x32xf32> -> vector<40x32xf32>
    %318 = arith.addf %283, %317 : vector<40x32xf32>
    %319 = vector.broadcast %187 : vector<1x32xf32> to vector<40x32xf32>
    %320 = arith.addf %318, %319 : vector<40x32xf32>
    %cst_96 = arith.constant dense<0.000000e+00> : vector<8x32xf32>
    %321 = tpu.matmul %20, %320, %cst_96 {dimension_numbers = #tpu.dot_dimension_numbers<[1], [0], [0], [1], [0, 0, 1, 1], [], []>} : vector<8x40xf32>, vector<40x32xf32>, vector<8x32xf32> -> vector<8x32xf32>
    %322 = vector.extract_strided_slice %21 {offsets = [14, 0], sizes = [1, 32], strides = [1, 1]} : vector<16x128xf32> to vector<1x32xf32>
    %323 = vector.extract_strided_slice %21 {offsets = [15, 0], sizes = [1, 32], strides = [1, 1]} : vector<16x128xf32> to vector<1x32xf32>
    %cst_97 = arith.constant dense<0.000000e+00> : vector<8xf32>
    %324 = vector.multi_reduction <add>, %321, %cst_97 [1] : vector<8x32xf32> to vector<8xf32>
    %325 = vector.shape_cast %324 : vector<8xf32> to vector<8x1xf32>
    %cst_98 = arith.constant 3.200000e+01 : f32
    %326 = vector.broadcast %cst_98 : f32 to vector<8x1xf32>
    %327 = arith.divf %325, %326 : vector<8x1xf32>
    %328 = vector.broadcast %327 : vector<8x1xf32> to vector<8x32xf32>
    %329 = arith.subf %321, %328 : vector<8x32xf32>
    %330 = arith.mulf %329, %329 : vector<8x32xf32>
    %cst_99 = arith.constant dense<0.000000e+00> : vector<8xf32>
    %331 = vector.multi_reduction <add>, %330, %cst_99 [1] : vector<8x32xf32> to vector<8xf32>
    %332 = vector.shape_cast %331 : vector<8xf32> to vector<8x1xf32>
    %cst_100 = arith.constant 3.200000e+01 : f32
    %333 = vector.broadcast %cst_100 : f32 to vector<8x1xf32>
    %334 = arith.divf %332, %333 : vector<8x1xf32>
    %335 = vector.broadcast %327 : vector<8x1xf32> to vector<8x32xf32>
    %336 = arith.subf %321, %335 : vector<8x32xf32>
    %cst_101 = arith.constant 9.99999974E-6 : f32
    %337 = vector.broadcast %cst_101 : f32 to vector<8x1xf32>
    %338 = arith.addf %334, %337 : vector<8x1xf32>
    %339 = math.rsqrt %338 : vector<8x1xf32>
    %340 = vector.broadcast %339 : vector<8x1xf32> to vector<8x32xf32>
    %341 = arith.mulf %336, %340 : vector<8x32xf32>
    %342 = vector.broadcast %322 : vector<1x32xf32> to vector<8x32xf32>
    %343 = arith.mulf %341, %342 : vector<8x32xf32>
    %344 = vector.broadcast %323 : vector<1x32xf32> to vector<8x32xf32>
    %345 = arith.addf %343, %344 : vector<8x32xf32>
    %c0_102 = arith.constant 0 : index
    %c0_103 = arith.constant 0 : index
    %346 = vector.load %arg7[%c0_102, %c0_103] : memref<8x32xf32, #tpu.memory_space<vmem>>, vector<8x32xf32>
    tpu.vector_store %arg7[%c0_102, %c0_103], %345 {strides = array<i32>} : memref<8x32xf32, #tpu.memory_space<vmem>>, vector<8x32xf32>,
    return
  }
  func.func @transform_0(%arg0: i32) -> (i32, i32) {
    %c0_i32 = arith.constant 0 : i32
    %c0_i32_0 = arith.constant 0 : i32
    return %arg0, %c0_i32 : i32, i32
  }
  func.func @transform_1(%arg0: i32) -> (i32, i32) {
    %c0_i32 = arith.constant 0 : i32
    %c0_i32_0 = arith.constant 0 : i32
    %c0_i32_1 = arith.constant 0 : i32
    return %c0_i32, %c0_i32_0 : i32, i32
  }
  func.func @transform_2(%arg0: i32) -> (i32, i32) {
    %c0_i32 = arith.constant 0 : i32
    %c0_i32_0 = arith.constant 0 : i32
    %c0_i32_1 = arith.constant 0 : i32
    return %c0_i32, %c0_i32_0 : i32, i32
  }
  func.func @transform_3(%arg0: i32) -> (i32, i32, i32) {
    %c0_i32 = arith.constant 0 : i32
    %c0_i32_0 = arith.constant 0 : i32
    %c0_i32_1 = arith.constant 0 : i32
    %c0_i32_2 = arith.constant 0 : i32
    return %c0_i32, %c0_i32_0, %c0_i32_1 : i32, i32, i32
  }
  func.func @transform_4(%arg0: i32) -> (i32, i32, i32) {
    %c0_i32 = arith.constant 0 : i32
    %c0_i32_0 = arith.constant 0 : i32
    %c0_i32_1 = arith.constant 0 : i32
    %c0_i32_2 = arith.constant 0 : i32
    return %c0_i32, %c0_i32_0, %c0_i32_1 : i32, i32, i32
  }
  func.func @transform_5(%arg0: i32) -> (i32, i32) {
    %c0_i32 = arith.constant 0 : i32
    %c0_i32_0 = arith.constant 0 : i32
    %c0_i32_1 = arith.constant 0 : i32
    return %c0_i32, %c0_i32_0 : i32, i32
  }
  func.func @transform_6(%arg0: i32) -> (i32, i32) {
    %c0_i32 = arith.constant 0 : i32
    %c0_i32_0 = arith.constant 0 : i32
    return %arg0, %c0_i32 : i32, i32
  }
}

</mosaic_0001>

<bundles_post_ra>
// kernel: tile.9
= control target key start
LH: loop header
LB: loop body
LE: loop exit
PB: predicated region body
PF: predicated region fallthrough
CT: control target
= control target key end

     0   :  { %vm3_vm0 = vcmask 261120   ;;  %s120_s0 = inlined_call_operand.vmem [shape: f32[8,5,32], index: 0, kind: input, shape index: {}]   ;;  %s121_s1 = inlined_call_operand.vmem [shape: f32[40,32], index: 1, kind: output, shape index: {}]  }
   0x1   :  { %v2_v0 = vld [vmem:[%s120_s0] sm:$0x1f]   ;;  %v40_v1 = vld [vmem:[%s120_s0 + $0x8] sm:$0x1f]   ;;  %v42_v2 = vld [vmem:[%s120_s0 + $0x10] sm:$0x1f]  }
   0x2   :  { %4 = vst.msk [vmem:[%s121_s1] sm:$0x1f] %vm3_vm0, %v2_v0   ;;  %41 = vst.msk [vmem:[%s121_s1 + $0x5] sm:$0x1f] %vm3_vm0, %v40_v1   ;;  %v44_v3 = vld [vmem:[%s120_s0 + $0x18] sm:$0x1f]  }
   0x3   :  { %43 = vst.msk [vmem:[%s121_s1 + $0xa] sm:$0x1f] %vm3_vm0, %v42_v2   ;;  %v46_v4 = vld [vmem:[%s120_s0 + $0x20] sm:$0x1f]   ;;  %v48_v5 = vld [vmem:[%s120_s0 + $0x28] sm:$0x1f]  }
   0x4   :  { %45 = vst.msk [vmem:[%s121_s1 + $0xf] sm:$0x1f] %vm3_vm0, %v44_v3   ;;  %47 = vst.msk [vmem:[%s121_s1 + $0x14] sm:$0x1f] %vm3_vm0, %v46_v4   ;;  %v50_v6 = vld [vmem:[%s120_s0 + $0x30] sm:$0x1f]  }
   0x5   :  { %49 = vst.msk [vmem:[%s121_s1 + $0x19] sm:$0x1f] %vm3_vm0, %v48_v5   ;;  %v52_v7 = vld [vmem:[%s120_s0 + $0x38] sm:$0x1f]   ;;  %51 = vst.msk [vmem:[%s121_s1 + $0x1e] sm:$0x1f] %vm3_vm0, %v50_v6  }
   0x6   :  { %53 = vst.msk [vmem:[%s121_s1 + $0x23] sm:$0x1f] %vm3_vm0, %v52_v7  }

// kernel: masked_vit_forward.1
= control target key start
LH: loop header
LB: loop body
LE: loop exit
PB: predicated region body
PF: predicated region fallthrough
CT: control target
= control target key end

     0   :  { %v6076_v0 = vmov 0.0|0.0   ;;  %vm104_vm0 = vcmask 523264   ;;  %vm234_vm1 = vcmask 261120   ;;  %vm6077_vm2 = vmmov 0   ;;  %s6079_s9 = smov 96   ;;  %s6080_s10 = smov 88   ;;  %s8032_s2 = inlined_call_operand.vmem [shape: f32[192,32], index: 2, kind: input, shape index: {}]   ;;  %s8033_s0 = inlined_call_operand.vmem [shape: f32[40,192], index: 0, kind: input, shape index: {}]   ;;  %s8034_s1 = inlined_call_operand.vmem [shape: f32[40,32], index: 1, kind: input, shape index: {}]   ;;  %s8035_s3 = inlined_call_operand.vmem [shape: f32[2,32,256], index: 3, kind: input, shape index: {}]   ;;  %s8036_s5 = inlined_call_operand.vmem [shape: f32[16,128], index: 5, kind: input, shape index: {}]   ;;  %s8037_s4 = inlined_call_operand.vmem [shape: f32[2,128,32], index: 4, kind: input, shape index: {}]   ;;  %s8038_s6 = inlined_call_operand.vmem [shape: f32[8,32], index: 6, kind: output, shape index: {}]  }
   0x1   :  { %5403 = vmatprep.subr.bf16.mxu0 %v6076_v0  ;;  %v75_v1 = vld [vmem:[%s8032_s2] sm:$0xff]  ;;  %v76_v2 = vld [vmem:[%s8032_s2 + $0x8] sm:$0xff]  ;;  %v77_v3 = vld [vmem:[%s8032_s2 + $0x10] sm:$0xff]  ;;  %5439 = vmatprep.subr.bf16.mxu1 %v6076_v0  ;;  %s6081_s11 = smov 80   ;;  %s6082_s12 = smov 120   ;;  %vm439_vm3 = vcmask 64512  }
   0x2   :  { %v5404_v4 = vpack.c.bf16 %v76_v2, %v75_v1  ;;  %v78_v5 = vld [vmem:[%s8032_s2 + $0x18] sm:$0xff]  ;;  %v79_v7 = vld [vmem:[%s8032_s2 + $0x20] sm:$0xff]  ;;  %v80_v8 = vld [vmem:[%s8032_s2 + $0x28] sm:$0xff]  ;;  %s6083_s13 = smov 72   ;;  %s6084_s14 = smov 112   ;;  %vm560_vm6 = vcmask 326656  }
   0x3   :  { %v5407_v6 = vpack.c.bf16 %v78_v5, %v77_v3  ;;  %v5410_v9 = vpack.c.bf16 %v80_v8, %v79_v7  ;;  %v81_v10 = vld [vmem:[%s8032_s2 + $0x30] sm:$0xff]  ;;  %v82_v11 = vld [vmem:[%s8032_s2 + $0x38] sm:$0xff]  ;;  %v66_v12 = vld [vmem:[%s8033_s0 + $0x8] sm:$0xff]  ;;  %s6085_s15 = smov 104   ;;  %s6086_s16 = smov 64   ;;  %vm1746_vm11 = vcmask 130048  }
   0x4   :  { %5405 = vmatpush1.bf16.msra.mxu0 %v5404_v4  ;;  %4316 = vmatprep.mubr.msk.f32.mxu0 %vm104_vm0, %v66_v12  ;;  %v5413_v13 = vpack.c.bf16 %v82_v11, %v81_v10  ;;  %v83_v14 = vld [vmem:[%s8032_s2 + $0x40] sm:$0xff]  ;;  %v84_v15 = vld [vmem:[%s8032_s2 + $0x48] sm:$0xff]  ;;  %v85_v17 = vld [vmem:[%s8032_s2 + $0x50] sm:$0xff]  ;;  %s6087_s17 = smov 56   ;;  %s6089_s18 = smov 48   ;;  %vm1752_vm12 = vcmask 195584  }
   0x5   :  { %5406 = vmatprep.subr.bf16.mxu0 %v6076_v0  ;;  %v5416_v16 = vpack.c.bf16 %v84_v15, %v83_v14  ;;  %v86_v18 = vld [vmem:[%s8032_s2 + $0x58] sm:$0xff]  ;;  %v87_v20 = vld [vmem:[%s8032_s2 + $0x60] sm:$0xff]  ;;  %v88_v21 = vld [vmem:[%s8032_s2 + $0x68] sm:$0xff]  ;;  %s6090_s19 = smov 40   ;;  %s6092_s24 = smov 8  }
   0x6   :  { %v5419_v19 = vpack.c.bf16 %v86_v18, %v85_v17  ;;  %v5422_v22 = vpack.c.bf16 %v88_v21, %v87_v20  ;;  %v89_v23 = vld [vmem:[%s8032_s2 + $0x70] sm:$0xff]  ;;  %v90_v24 = vld [vmem:[%s8032_s2 + $0x78] sm:$0xff]  ;;  %v91_v26 = vld [vmem:[%s8032_s2 + $0x80] sm:$0xff]  ;;  %s6094_s25 = smov 24  }
   0x7   :  { %v5425_v25 = vpack.c.bf16 %v90_v24, %v89_v23  ;;  %v92_v27 = vld [vmem:[%s8032_s2 + $0x88] sm:$0xff]  ;;  %v93_v29 = vld [vmem:[%s8032_s2 + $0x90] sm:$0xff]  ;;  %v94_v30 = vld [vmem:[%s8032_s2 + $0x98] sm:$0xff] }
   0x8   :  { %5408 = vmatpush1.bf16.msra.mxu0 %v5407_v6  ;;  %v5428_v28 = vpack.c.bf16 %v92_v27, %v91_v26  ;;  %v5431_v31 = vpack.c.bf16 %v94_v30, %v93_v29  ;;  %v95_v32 = vld [vmem:[%s8032_s2 + $0xa0] sm:$0xff]  ;;  %v96_v33 = vld [vmem:[%s8032_s2 + $0xa8] sm:$0xff]  ;;  %v97_v35 = vld [vmem:[%s8032_s2 + $0xb0] sm:$0xff] }
   0x9   :  { %5409 = vmatprep.subr.bf16.mxu0 %v6076_v0  ;;  %v5434_v34 = vpack.c.bf16 %v96_v33, %v95_v32  ;;  %v98_v36 = vld [vmem:[%s8032_s2 + $0xb8] sm:$0xff]  ;;  %v65_v38 = vld [vmem:[%s8033_s0] sm:$0xff]  ;;  %v67_v40 = vld [vmem:[%s8033_s0 + $0x10] sm:$0xff] }
   0xa   :  { %v5437_v37 = vpack.c.bf16 %v98_v36, %v97_v35  ;;  %v68_v39 = vld [vmem:[%s8033_s0 + $0x18] sm:$0xff]  ;;  %v70_v41 = vld [vmem:[%s8033_s0 + $0x28] sm:$0xff]  ;;  %v69_v42 = vld [vmem:[%s8033_s0 + $0x20] sm:$0xff] }
   0xb   :  { %v72_v43 = vld [vmem:[%s8033_s0 + $0x38] sm:$0xff]  ;;  %v71_v44 = vld [vmem:[%s8033_s0 + $0x30] sm:$0xff]  ;;  %v74_v45 = vld [vmem:[%s8033_s0 + $0x48] sm:$0xff] }
   0xc   :  { %5411 = vmatpush1.bf16.msra.mxu0 %v5410_v9  ;;  %v73_v46 = vld [vmem:[%s8033_s0 + $0x40] sm:$0xff]  ;;  %v100_v51 = vld [vmem:[%s8034_s1 + $0x8] sm:$0xff]  ;;  %v101_v56 = vld [vmem:[%s8034_s1 + $0x10] sm:$0xff]  ;;  %s6091_s0 = smov 32  }
   0xd   :  { %5412 = vmatprep.subr.bf16.mxu0 %v6076_v0  ;;  %v99_v47 = vld [vmem:[%s8034_s1] sm:$0xff]  ;;  %v102_v61 = vld [vmem:[%s8034_s1 + $0x18] sm:$0xff]  ;;  %v6324_v35 = vld [vmem:[%s8035_s3 + $0x10] sm:$0xff] }
   0xe   :  { %v103_v3 = vld [vmem:[%s8034_s1 + $0x20] sm:$0xff]  ;;  %vm6460_vm4 = vmpackc.low %vm439_vm3, %vm439_vm3  ;;  %s6093_s1 = smov 16  }
  0x10   :  { %5414 = vmatpush1.bf16.msra.mxu0 %v5413_v13 }
  0x11   :  { %5415 = vmatprep.subr.bf16.mxu0 %v6076_v0 }
  0x14   :  { %5417 = vmatpush1.bf16.msra.mxu0 %v5416_v16 }
  0x15   :  { %5418 = vmatprep.subr.bf16.mxu0 %v6076_v0 }
  0x18   :  { %5420 = vmatpush1.bf16.msra.mxu0 %v5419_v19 }
  0x19   :  { %5421 = vmatprep.subr.bf16.mxu0 %v6076_v0 }
  0x1c   :  { %5423 = vmatpush1.bf16.msra.mxu0 %v5422_v22 }
  0x1d   :  { %5424 = vmatprep.subr.bf16.mxu0 %v6076_v0 }
  0x20   :  { %5426 = vmatpush1.bf16.msra.mxu0 %v5425_v25 }
  0x21   :  { %5427 = vmatprep.subr.bf16.mxu0 %v6076_v0 }
  0x24   :  { %5429 = vmatpush1.bf16.msra.mxu0 %v5428_v28 }
  0x25   :  { %5430 = vmatprep.subr.bf16.mxu0 %v6076_v0 }
  0x28   :  { %5432 = vmatpush1.bf16.msra.mxu0 %v5431_v31 }
  0x29   :  { %5433 = vmatprep.subr.bf16.mxu0 %v6076_v0 }
  0x2c   :  { %5435 = vmatpush1.bf16.msra.mxu0 %v5434_v34  ;;  %v6319_v34 = vld [vmem:[%s8035_s3] sm:$0xff] }
  0x2d   :  { %5436 = vmatprep.subr.bf16.mxu0 %v6076_v0  ;;  %v5440_v36 = vpack.c.bf16 %v6324_v35, %v6319_v34 }
  0x2f   :  { %5441 = vmatpush3.bf16.msra.mxu1 %v5440_v36 }
  0x30   :  { %5438 = vmatpush1.bf16.msra.mxu0 %v5437_v37  ;;  %5442 = vmatprep.subr.bf16.mxu1 %v6076_v0  ;;  %v214_v37 = vld [vmem:[%s8035_s3 + $0x20] sm:$0xff] }
  0x31   :  { %5459 = vmatprep.subr.bf16.mxu0 %v6076_v0 }
  0x33   :  { %185 = vmatmul.mubr.f32.vlgmr.msra.gmra.mrb[0].mxu0 %v65_v38  ;;  %v216_v38 = vld [vmem:[%s8035_s3 + $0x30] sm:$0xff] }
  0x34   :  { %4317 = vmatprep.mubr.msk.f32.mxu0 %vm104_vm0, %v68_v39  ;;  %v5746_v39 = vpack.i.bf16 %v6324_v35, %v6319_v34 }
  0x37   :  { %190 = vmatmul.mubr.f32.gmra.mrb[2].mxu0 %v67_v40  ;;  %v5443_v40 = vpack.c.bf16 %v216_v38, %v214_v37 }
  0x38   :  { %4318 = vmatprep.mubr.msk.f32.mxu0 %vm104_vm0, %v70_v41  ;;  %v6078_v41 = vmov 0.0  }
  0x39   :  { %5444 = vmatpush3.bf16.msra.mxu1 %v5443_v40  ;;  %4766 = vmatprep.mubr.msk.f32.mxu1 %vm6077_vm2, %v6078_v41 }
  0x3a   :  { %5445 = vmatprep.subr.bf16.mxu1 %v6076_v0 }
  0x3b   :  { %195 = vmatmul.mubr.f32.gmra.mrb[4].mxu0 %v69_v42 }
  0x3c   :  { %4319 = vmatprep.mubr.msk.f32.mxu0 %vm104_vm0, %v72_v43 }
  0x3f   :  { %200 = vmatmul.mubr.f32.gmra.mrb[6].mxu0 %v71_v44  ;;  %v23_v44 = vlaneseq }
  0x40   :  { %4320 = vmatprep.mubr.msk.f32.mxu0 %vm104_vm0, %v74_v45 }
  0x43   :  { %205 = vmatmul.mubr.f32.gmra.mrb[8].mxu0 %v73_v46 }
  0x44   :  { %4841 = vmatprep.mubr.msk.f32.mxu0 %vm6077_vm2, %v6078_v41 }
 0x106   :  { %v186_v48 = vpop.f32.mrb[0].mxu0 }
 0x107   :  { %v6254_v49 = vadd.f32 %v186_v48, %v99_v47  ;;  %v188_v50 = vpop.f32.mrb[1].mxu0  ;;  %v6343_v48 = vshrl.u32 %v23_v44, 7 }
 0x109   :  { %v235_v52 = vsel %vm234_vm1, %v6254_v49, 0.0 }
 0x10a   :  { %v191_v53 = vpop.f32.mrb[2].mxu0  ;;  %236 = vadd.xlane.f32.xlu0 %v235_v52 }
 0x10b   :  { %v6261_v54 = vadd.f32 %v191_v53, %v100_v51  ;;  %v193_v55 = vpop.f32.mrb[3].mxu0  ;;  %v303_v53 = vsub.s32 0, %v6343_v48 }
 0x10d   :  { %v238_v57 = vsel %vm234_vm1, %v6261_v54, 0.0 }
 0x10e   :  { %v196_v58 = vpop.f32.mrb[4].mxu0  ;;  %239 = vadd.xlane.f32.xlu0 %v238_v57 }
 0x10f   :  { %v6268_v59 = vadd.f32 %v196_v58, %v101_v56  ;;  %v198_v60 = vpop.f32.mrb[5].mxu0  ;;  %v63_v56 = vld [vmem:[%s8036_s5] sm:$0xff]  ;;  %v312_v58 = vsub.s32 1, %v6343_v48 }
 0x111   :  { %v241_v62 = vsel %vm234_vm1, %v6268_v59, 0.0 }
 0x112   :  { %v201_v63 = vpop.f32.mrb[6].mxu0  ;;  %242 = vadd.xlane.f32.xlu1 %v241_v62 }
 0x113   :  { %v6275_v1 = vadd.f32 %v201_v63, %v102_v61  ;;  %v203_v2 = vpop.f32.mrb[7].mxu0  ;;  %v304_v61 = vrot.slane %v63_v56, %v303_v53 }
 0x115   :  { %v244_v4 = vsel %vm234_vm1, %v6275_v1, 0.0 }
 0x116   :  { %v206_v5 = vpop.f32.mrb[8].mxu0  ;;  %245 = vadd.xlane.f32.xlu1 %v244_v4  ;;  %v313_v4 = vrot.slane %v63_v56, %v312_v58 }
 0x117   :  { %v6282_v6 = vadd.f32 %v206_v5, %v103_v3  ;;  %v208_v7 = vpop.f32.mrb[9].mxu0 }
 0x119   :  { %v247_v8 = vsel %vm234_vm1, %v6282_v6, 0.0 }
 0x11a   :  { %248 = vadd.xlane.f32.xlu0 %v247_v8 }
 0x197   :  { %v237_v9 = vpop.xlane.xlu0 %236 }
 0x198   :  { %v251_v10 = vmul.f32 0.03125, %v237_v9 }
 0x19a   :  { %v6287_v11 = vsub.f32 %v6254_v49, %v251_v10 }
 0x19b   :  { %v240_v12 = vpop.xlane.xlu0 %239 }
 0x19c   :  { %v252_v13 = vmul.f32 0.03125, %v240_v12  ;;  %v261_v14 = vmul.f32 %v6287_v11, %v6287_v11 }
 0x19e   :  { %v6292_v15 = vsub.f32 %v6261_v54, %v252_v13  ;;  %v266_v16 = vsel %vm234_vm1, %v261_v14, 0.0 }
 0x19f   :  { %v243_v17 = vpop.xlane.xlu1 %242  ;;  %267 = vadd.xlane.f32.xlu1 %v266_v16 }
 0x1a0   :  { %v253_v18 = vmul.f32 0.03125, %v243_v17  ;;  %v262_v19 = vmul.f32 %v6292_v15, %v6292_v15 }
 0x1a2   :  { %v6298_v20 = vsub.f32 %v6268_v59, %v253_v18  ;;  %v269_v21 = vsel %vm234_vm1, %v262_v19, 0.0 }
 0x1a3   :  { %v246_v22 = vpop.xlane.xlu1 %245  ;;  %270 = vadd.xlane.f32.xlu0 %v269_v21 }
 0x1a4   :  { %v254_v23 = vmul.f32 0.03125, %v246_v22  ;;  %v263_v24 = vmul.f32 %v6298_v20, %v6298_v20 }
 0x1a6   :  { %v6304_v25 = vsub.f32 %v6275_v1, %v254_v23  ;;  %v272_v26 = vsel %vm234_vm1, %v263_v24, 0.0 }
 0x1a7   :  { %273 = vadd.xlane.f32.xlu1 %v272_v26  ;;  %v249_v27 = vpop.xlane.xlu0 %248 }
 0x1a8   :  { %v255_v28 = vmul.f32 0.03125, %v249_v27  ;;  %v264_v29 = vmul.f32 %v6304_v25, %v6304_v25 }
 0x1aa   :  { %v6310_v30 = vsub.f32 %v6282_v6, %v255_v28  ;;  %v275_v31 = vsel %vm234_vm1, %v264_v29, 0.0 }
 0x1ab   :  { %276 = vadd.xlane.f32.xlu0 %v275_v31 }
 0x1ac   :  { %v265_v32 = vmul.f32 %v6310_v30, %v6310_v30 }
 0x1ae   :  { %v278_v33 = vsel %vm234_vm1, %v265_v32, 0.0 }
 0x1af   :  { %279 = vadd.xlane.f32.xlu1 %v278_v33 }
 0x22c   :  { %v268_v42 = vpop.xlane.xlu1 %267 }
 0x22d   :  { %v281_v43 = vmul.f32 0.03125, %v268_v42 }
 0x22f   :  { %v286_v45 = vadd.f32 1e-05, %v281_v43 }
 0x230   :  { %v271_v46 = vpop.xlane.xlu0 %270 }
 0x231   :  { %5846 = vrsqrt.f32 %v286_v45  ;;  %v282_v47 = vmul.f32 0.03125, %v271_v46 }
 0x233   :  { %v287_v50 = vadd.f32 1e-05, %v282_v47 }
 0x234   :  { %v274_v51 = vpop.xlane.xlu1 %273 }
 0x235   :  { %5848 = vrsqrt.f32 %v287_v50  ;;  %v283_v52 = vmul.f32 0.03125, %v274_v51 }
 0x237   :  { %v288_v55 = vadd.f32 1e-05, %v283_v52 }
 0x238   :  { %v277_v57 = vpop.xlane.xlu0 %276 }
 0x239   :  { %5850 = vrsqrt.f32 %v288_v55  ;;  %v284_v60 = vmul.f32 0.03125, %v277_v57 }
 0x23b   :  { %v5847_v62 = vpop.eup %5846  ;;  %v289_v63 = vadd.f32 1e-05, %v284_v60 }
 0x23c   :  { %v280_v2 = vpop.xlane.xlu1 %279  ;;  %v296_v3 = vmul.f32 %v5847_v62, %v6287_v11 }
 0x23d   :  { %5852 = vrsqrt.f32 %v289_v63  ;;  %v285_v5 = vmul.f32 0.03125, %v280_v2 }
 0x23e   :  { %v305_v7 = vmul.f32 %v304_v61, %v296_v3 }
 0x23f   :  { %v5849_v8 = vpop.eup %5848  ;;  %v290_v9 = vadd.f32 1e-05, %v285_v5 }
 0x240   :  { %v314_v10 = vadd.f32 %v313_v4, %v305_v7  ;;  %v297_v12 = vmul.f32 %v5849_v8, %v6292_v15 }
 0x241   :  { %5854 = vrsqrt.f32 %v290_v9 }
 0x242   :  { %4767 = vmatmul.mubr.msk.f32.vlgmr.msra.gmra.mrb[0].mxu1 %vm234_vm1, %v314_v10  ;;  %v306_v13 = vmul.f32 %v304_v61, %v297_v12 }
 0x243   :  { %v5851_v14 = vpop.eup %5850  ;;  %4769 = vmatprep.mubr.msk.f32.mxu1 %vm6077_vm2, %v6078_v41 }
 0x244   :  { %v315_v11 = vadd.f32 %v313_v4, %v306_v13  ;;  %v298_v16 = vmul.f32 %v5851_v14, %v6298_v20 }
 0x246   :  { %4770 = vmatmul.mubr.msk.f32.gmra.mrb[2].mxu1 %vm234_vm1, %v315_v11  ;;  %v307_v17 = vmul.f32 %v304_v61, %v298_v16 }
 0x247   :  { %v5853_v18 = vpop.eup %5852  ;;  %4772 = vmatprep.mubr.msk.f32.mxu1 %vm6077_vm2, %v6078_v41 }
 0x248   :  { %v316_v19 = vadd.f32 %v313_v4, %v307_v17  ;;  %v299_v15 = vmul.f32 %v5853_v18, %v6304_v25 }
 0x24a   :  { %4773 = vmatmul.mubr.msk.f32.gmra.mrb[4].mxu1 %vm234_vm1, %v316_v19  ;;  %v308_v21 = vmul.f32 %v304_v61, %v299_v15 }
 0x24b   :  { %v5855_v22 = vpop.eup %5854  ;;  %4775 = vmatprep.mubr.msk.f32.mxu1 %vm6077_vm2, %v6078_v41 }
 0x24c   :  { %v317_v23 = vadd.f32 %v313_v4, %v308_v21  ;;  %v300_v20 = vmul.f32 %v5855_v22, %v6310_v30 }
 0x24e   :  { %4776 = vmatmul.mubr.msk.f32.gmra.mrb[6].mxu1 %vm234_vm1, %v317_v23  ;;  %v309_v24 = vmul.f32 %v304_v61, %v300_v20 }
 0x24f   :  { %4778 = vmatprep.mubr.msk.f32.mxu1 %vm6077_vm2, %v6078_v41 }
 0x250   :  { %v318_v26 = vadd.f32 %v313_v4, %v309_v24 }
 0x252   :  { %4779 = vmatmul.mubr.msk.f32.gmra.mrb[8].mxu1 %vm234_vm1, %v318_v26 }
 0x253   :  { %4791 = vmatprep.mubr.msk.f32.mxu1 %vm6077_vm2, %v6078_v41 }
 0x315   :  { %v6374_v25 = vpop.f32.mrb[0].mxu1 }
 0x316   :  { %v4768_v27 = vpop.f32.mrb[1].mxu1 }
 0x319   :  { %v6376_v28 = vpop.f32.mrb[2].mxu1 }
 0x31a   :  { %v4771_v29 = vpop.f32.mrb[3].mxu1  ;;  %v6380_v30 = vpack.i.bf16 %v6376_v28, %v6374_v25 }
 0x31c   :  { %5667 = vrot.lane.b32.xlu0 %v6380_v30, %s6079_s9 }
 0x31d   :  { %v6384_v31 = vpop.f32.mrb[4].mxu1 }
 0x31e   :  { %v4774_v32 = vpop.f32.mrb[5].mxu1 }
 0x321   :  { %v6386_v33 = vpop.f32.mrb[6].mxu1 }
 0x322   :  { %v4777_v36 = vpop.f32.mrb[7].mxu1  ;;  %v6390_v37 = vpack.i.bf16 %v6386_v33, %v6384_v31 }
 0x324   :  { %5682 = vrot.lane.b32.xlu0 %v6390_v37, %s6080_s10  ;;  %5672 = vrot.lane.b32.xlu1 %v6390_v37, %s6079_s9 }
 0x325   :  { %v6396_v38 = vpop.f32.mrb[8].mxu1 }
 0x326   :  { %v4780_v40 = vpop.f32.mrb[9].mxu1 }
 0x328   :  { %5687 = vrot.lane.b32.xlu0 %v6380_v30, %s6081_s11  ;;  %5677 = vrot.lane.b32.xlu1 %v6380_v30, %s6080_s10 }
 0x32c   :  { %738 = vrot.lane.b32.xlu0 %v6376_v28, %s6082_s12  ;;  %437 = vrot.lane.b32.xlu1 %v6396_v38, %s6079_s9 }
 0x330   :  { %740 = vrot.lane.b32.xlu0 %v6384_v31, %s6082_s12  ;;  %754 = vrot.lane.b32.xlu1 %v6396_v38, %s6080_s10 }
 0x334   :  { %744 = vrot.lane.b32.xlu0 %v6396_v38, %s6082_s12  ;;  %736 = vrot.lane.b32.xlu1 %v6374_v25, %s6082_s12 }
 0x338   :  { %5697 = vrot.lane.b32.xlu0 %v6380_v30, %s6083_s13  ;;  %5692 = vrot.lane.b32.xlu1 %v6390_v37, %s6081_s11 }
 0x33c   :  { %1053 = vrot.lane.b32.xlu0 %v6376_v28, %s6084_s14  ;;  %742 = vrot.lane.b32.xlu1 %v6386_v33, %s6082_s12 }
 0x340   :  { %1055 = vrot.lane.b32.xlu0 %v6384_v31, %s6084_s14  ;;  %1069 = vrot.lane.b32.xlu1 %v6396_v38, %s6081_s11 }
 0x344   :  { %1059 = vrot.lane.b32.xlu0 %v6396_v38, %s6084_s14  ;;  %1051 = vrot.lane.b32.xlu1 %v6374_v25, %s6084_s14 }
 0x348   :  { %1366 = vrot.lane.b32.xlu0 %v6374_v25, %s6085_s15  ;;  %5702 = vrot.lane.b32.xlu1 %v6390_v37, %s6083_s13 }
 0x34c   :  { %1370 = vrot.lane.b32.xlu0 %v6384_v31, %s6085_s15  ;;  %1057 = vrot.lane.b32.xlu1 %v6386_v33, %s6084_s14 }
 0x350   :  { %1374 = vrot.lane.b32.xlu0 %v6396_v38, %s6085_s15  ;;  %1384 = vrot.lane.b32.xlu1 %v6396_v38, %s6083_s13 }
 0x354   :  { %5707 = vrot.lane.b32.xlu0 %v6380_v30, %s6086_s16  ;;  %1368 = vrot.lane.b32.xlu1 %v6376_v28, %s6085_s15 }
 0x358   :  { %5722 = vrot.lane.b32.xlu0 %v6390_v37, %s6087_s17  ;;  %1372 = vrot.lane.b32.xlu1 %v6386_v33, %s6085_s15 }
 0x35c   :  { %624 = vrot.lane.b32.xlu0 %v6396_v38, %s6086_s16  ;;  %5712 = vrot.lane.b32.xlu1 %v6390_v37, %s6086_s16 }
 0x360   :  { %939 = vrot.lane.b32.xlu0 %v6396_v38, %s6087_s17  ;;  %5717 = vrot.lane.b32.xlu1 %v6380_v30, %s6087_s17 }
 0x38e   :  { %v5668_v42 = vpop.permute.xlu0 %5667 }
 0x38f   :  { %v5670_v43 = vunpack.i.h.bf16 %v5668_v42  ;;  %v5669_v45 = vunpack.i.l.bf16 %v5668_v42 }
 0x391   :  { %v5446_v47 = vpack.c.bf16 %v5670_v43, %v5669_v45 }
 0x393   :  { %5448 = vmatpush3.bf16.xpose.msk.msra.mxu1 %vm6460_vm4, %v5446_v47 }
 0x394   :  { %5449 = vmatprep.subr.bf16.mxu1 %v6076_v0 }
 0x396   :  { %v5673_v50 = vpop.permute.xlu1 %5672  ;;  %v5683_v51 = vpop.permute.xlu0 %5682 }
 0x397   :  { %v5675_v52 = vunpack.i.h.bf16 %v5673_v50  ;;  %v5674_v55 = vunpack.i.l.bf16 %v5673_v50  ;;  %v5685_v4 = vunpack.i.h.bf16 %v5683_v51  ;;  %v5684_v5 = vunpack.i.l.bf16 %v5683_v51 }
 0x399   :  { %v5450_v56 = vpack.c.bf16 %v5675_v52, %v5674_v55  ;;  %v5464_v9 = vpack.c.bf16 %v5685_v4, %v5684_v5  ;;  %v29_v4 = vcvt.s32.f32 %v6343_v48 }
 0x39a   :  { %v5678_v57 = vpop.permute.xlu1 %5677  ;;  %v5688_v60 = vpop.permute.xlu0 %5687 }
 0x39b   :  { %v5680_v61 = vunpack.i.h.bf16 %v5678_v57  ;;  %v5679_v62 = vunpack.i.l.bf16 %v5678_v57  ;;  %5452 = vmatpush3.bf16.xpose.msk.msra.mxu1 %vm6460_vm4, %v5450_v56  ;;  %v5690_v11 = vunpack.i.h.bf16 %v5688_v60  ;;  %v5689_v16 = vunpack.i.l.bf16 %v5688_v60 }
 0x39c   :  { %4789 = vmatprep.subr.mxu1 %v6078_v41 }
 0x39d   :  { %v5460_v63 = vpack.c.bf16 %v5680_v61, %v5679_v62  ;;  %v5474_v19 = vpack.c.bf16 %v5690_v11, %v5689_v16 }
 0x39e   :  { %v438_v2 = vpop.permute.xlu1 %437  ;;  %v739_v3 = vpop.permute.xlu0 %738 }
 0x39f   :  { %5462 = vmatpush3.bf16.xpose.msk.msra.mxu0 %vm6460_vm4, %v5460_v63 }
 0x3a0   :  { %5463 = vmatprep.subr.bf16.mxu0 %v6076_v0 }
 0x3a2   :  { %v755_v7 = vpop.permute.xlu1 %754  ;;  %v741_v8 = vpop.permute.xlu0 %740 }
 0x3a3   :  { %4790 = vmatpush3.xpose.msk.msra.mxu1 %vm439_vm3, %v438_v2 }
 0x3a4   :  { %5453 = vmatprep.subr.bf16.mxu1 %v6076_v0 }
 0x3a6   :  { %v737_v10 = vpop.permute.xlu1 %736  ;;  %v745_v12 = vpop.permute.xlu0 %744  ;;  %4792 = vmatmul.mubr.msk.f32.vlgmr.msra.gmra.mrb[10].mxu1 %vm439_vm3, %v6374_v25 }
 0x3a7   :  { %5466 = vmatpush3.bf16.xpose.msk.msra.mxu0 %vm6460_vm4, %v5464_v9  ;;  %4794 = vmatprep.mubr.msk.f32.mxu1 %vm6077_vm2, %v6078_v41 }
 0x3a8   :  { %4839 = vmatprep.subr.mxu0 %v6078_v41 }
 0x3aa   :  { %v5693_v13 = vpop.permute.xlu1 %5692  ;;  %v5698_v14 = vpop.permute.xlu0 %5697  ;;  %4795 = vmatmul.mubr.msk.f32.gmra.mrb[12].mxu1 %vm439_vm3, %v6376_v28 }
 0x3ab   :  { %4797 = vmatprep.mubr.msk.f32.mxu1 %vm6077_vm2, %v6078_v41  ;;  %v5695_v22 = vunpack.i.h.bf16 %v5693_v13  ;;  %v5694_v23 = vunpack.i.l.bf16 %v5693_v13  ;;  %v5699_v32 = vunpack.i.l.bf16 %v5698_v14 }
 0x3ad   :  { %v5478_v26 = vpack.c.bf16 %v5695_v22, %v5694_v23 }
 0x3ae   :  { %v743_v17 = vpop.permute.xlu1 %742  ;;  %v1054_v18 = vpop.permute.xlu0 %1053  ;;  %4798 = vmatmul.mubr.msk.f32.gmra.mrb[14].mxu1 %vm439_vm3, %v6384_v31  ;;  %v5700_v31 = vunpack.i.h.bf16 %v5698_v14  ;;  %v6088_v14 = vmov -1e+30  }
 0x3af   :  { %4840 = vmatpush3.xpose.msk.msra.mxu0 %vm439_vm3, %v755_v7  ;;  %4800 = vmatprep.mubr.msk.f32.mxu1 %vm6077_vm2, %v6078_v41  ;;  %v37_v7 = vmul.f32 0.2, %v29_v4 }
 0x3b0   :  { %5473 = vmatprep.subr.bf16.mxu0 %v6076_v0  ;;  %v5488_v40 = vpack.c.bf16 %v5700_v31, %v5699_v32 }
 0x3b1   :  { %v42_v9 = vfloor.f32 %v37_v7 }
 0x3b2   :  { %v1070_v15 = vpop.permute.xlu1 %1069  ;;  %v1056_v21 = vpop.permute.xlu0 %1055  ;;  %4801 = vmatmul.mubr.msk.f32.gmra.mrb[16].mxu1 %vm439_vm3, %v6386_v33  ;;  %4842 = vmatmul.mubr.msk.f32.vlgmr.msra.gmra.mrb[10].mxu0 %vm439_vm3, %v737_v10 }
 0x3b3   :  { %5476 = vmatpush3.bf16.xpose.msk.msra.mxu0 %vm6460_vm4, %v5474_v19  ;;  %4803 = vmatprep.mubr.msk.f32.mxu1 %vm6077_vm2, %v6078_v41 }
 0x3b4   :  { %4844 = vmatprep.mubr.msk.f32.mxu0 %vm6077_vm2, %v6078_v41  ;;  %5477 = vmatprep.subr.bf16.mxu0 %v6076_v0 }
 0x3b6   :  { %v1052_v20 = vpop.permute.xlu1 %1051  ;;  %v1060_v24 = vpop.permute.xlu0 %1059  ;;  %4804 = vmatmul.mubr.msk.f32.gmra.mrb[18].mxu1 %vm439_vm3, %v6396_v38  ;;  %4845 = vmatmul.mubr.msk.f32.gmra.mrb[12].mxu0 %vm439_vm3, %v739_v3  ;;  %v6567_v3 = vand.u32 127, %v23_v44  ;;  %v26_v44 = vadd.s32 16, %v6343_v48 }
 0x3b7   :  { %4847 = vmatprep.mubr.msk.f32.mxu0 %vm6077_vm2, %v6078_v41  ;;  %4816 = vmatprep.mubr.msk.f32.mxu1 %vm6077_vm2, %v6078_v41 }
 0x3b8   :  { %v36_v5 = vcvt.s32.f32 %v6567_v3  ;;  %v31_v22 = vcvt.s32.f32 %v26_v44 }
 0x3ba   :  { %v5703_v25 = vpop.permute.xlu1 %5702  ;;  %v1367_v27 = vpop.permute.xlu0 %1366  ;;  %4848 = vmatmul.mubr.msk.f32.gmra.mrb[14].mxu0 %vm439_vm3, %v741_v8  ;;  %v47_v8 = vmul.f32 0.2, %v36_v5 }
 0x3bb   :  { %5480 = vmatpush3.bf16.xpose.msk.msra.mxu0 %vm6460_vm4, %v5478_v26  ;;  %4850 = vmatprep.mubr.msk.f32.mxu0 %vm6077_vm2, %v6078_v41  ;;  %v5705_v50 = vunpack.i.h.bf16 %v5703_v25  ;;  %v5704_v51 = vunpack.i.l.bf16 %v5703_v25  ;;  %v28_v26 = vadd.s32 32, %v6343_v48 }
 0x3bc   :  { %4889 = vmatprep.subr.mxu0 %v6078_v41  ;;  %v48_v10 = vfloor.f32 %v47_v8 }
 0x3bd   :  { %v5492_v56 = vpack.c.bf16 %v5705_v50, %v5704_v51  ;;  %v33_v32 = vcvt.s32.f32 %v28_v26 }
 0x3be   :  { %v1058_v28 = vpop.permute.xlu1 %1057  ;;  %v1371_v29 = vpop.permute.xlu0 %1370  ;;  %4851 = vmatmul.mubr.msk.f32.gmra.mrb[16].mxu0 %vm439_vm3, %v743_v17  ;;  %vm49_vm5 = vcmp.eq.f32.partialorder %v42_v9, %v48_v10 }
 0x3bf   :  { %4853 = vmatprep.mubr.msk.f32.mxu0 %vm6077_vm2, %v6078_v41  ;;  %v6573_v11 = vsel %vm49_vm5, 0.0, %v6088_v14 }
 0x3c2   :  { %v1385_v33 = vpop.permute.xlu1 %1384  ;;  %v1375_v36 = vpop.permute.xlu0 %1374  ;;  %4854 = vmatmul.mubr.msk.f32.gmra.mrb[18].mxu0 %vm439_vm3, %v745_v12  ;;  %v25_v12 = vadd.s32 8, %v6343_v48 }
 0x3c3   :  { %4890 = vmatpush3.xpose.msk.msra.mxu0 %vm439_vm3, %v1070_v15  ;;  %4891 = vmatprep.mubr.msk.f32.mxu0 %vm6077_vm2, %v6078_v41 }
 0x3c4   :  { %5487 = vmatprep.subr.bf16.mxu0 %v6076_v0  ;;  %v30_v16 = vcvt.s32.f32 %v25_v12 }
 0x3c6   :  { %v1369_v42 = vpop.permute.xlu1 %1368  ;;  %v5708_v43 = vpop.permute.xlu0 %5707  ;;  %4892 = vmatmul.mubr.msk.f32.vlgmr.msra.gmra.mrb[20].mxu0 %vm439_vm3, %v1052_v20 }
 0x3c7   :  { %v5710_v45 = vunpack.i.h.bf16 %v5708_v43  ;;  %v5709_v47 = vunpack.i.l.bf16 %v5708_v43  ;;  %5490 = vmatpush3.bf16.xpose.msk.msra.mxu0 %vm6460_vm4, %v5488_v40  ;;  %4894 = vmatprep.mubr.msk.f32.mxu0 %vm6077_vm2, %v6078_v41 }
 0x3c8   :  { %5491 = vmatprep.subr.bf16.mxu0 %v6076_v0 }
 0x3c9   :  { %v5454_v52 = vpack.c.bf16 %v5710_v45, %v5709_v47 }
 0x3ca   :  { %v1373_v55 = vpop.permute.xlu1 %1372  ;;  %4895 = vmatmul.mubr.msk.f32.gmra.mrb[22].mxu0 %vm439_vm3, %v1054_v18  ;;  %v6538_v62 = vpop.permute.xlu0 %5722 }
 0x3cb   :  { %5455 = vmatpush3.bf16.msra.mxu1 %v5454_v52  ;;  %4897 = vmatprep.mubr.msk.f32.mxu0 %vm6077_vm2, %v6078_v41 }
 0x3cc   :  { %5456 = vmatprep.subr.bf16.mxu1 %v6076_v0 }
 0x3ce   :  { %v5713_v57 = vpop.permute.xlu1 %5712  ;;  %4898 = vmatmul.mubr.msk.f32.gmra.mrb[24].mxu0 %vm439_vm3, %v1056_v21  ;;  %v625_v2 = vpop.permute.xlu0 %624  ;;  %v38_v21 = vmul.f32 0.2, %v30_v16 }
 0x3cf   :  { %v5715_v60 = vunpack.i.h.bf16 %v5713_v57  ;;  %v5714_v61 = vunpack.i.l.bf16 %v5713_v57  ;;  %5494 = vmatpush3.bf16.xpose.msk.msra.mxu0 %vm6460_vm4, %v5492_v56  ;;  %4900 = vmatprep.mubr.msk.f32.mxu0 %vm6077_vm2, %v6078_v41 }
 0x3d0   :  { %4939 = vmatprep.subr.mxu0 %v6078_v41 }
 0x3d1   :  { %v5457_v63 = vpack.c.bf16 %v5715_v60, %v5714_v61 }
 0x3d2   :  { %4901 = vmatmul.mubr.msk.f32.gmra.mrb[26].mxu0 %vm439_vm3, %v1058_v28  ;;  %v39_v28 = vmul.f32 0.2, %v31_v22 }
 0x3d3   :  { %5458 = vmatpush3.bf16.msra.mxu1 %v5457_v63  ;;  %4903 = vmatprep.mubr.msk.f32.mxu0 %vm6077_vm2, %v6078_v41 }
 0x3d4   :  { %4814 = vmatprep.subr.mxu1 %v6078_v41  ;;  %v44_v40 = vfloor.f32 %v39_v28 }
 0x3d6   :  { %4904 = vmatmul.mubr.msk.f32.gmra.mrb[28].mxu0 %vm439_vm3, %v1060_v24  ;;  %v27_v24 = vadd.s32 24, %v6343_v48  ;;  %vm51_vm8 = vcmp.eq.f32.partialorder %v44_v40, %v48_v10 }
 0x3d7   :  { %4815 = vmatpush3.msra.mxu1 %v625_v2  ;;  %4940 = vmatpush3.xpose.msk.msra.mxu0 %vm439_vm3, %v1385_v33  ;;  %v6598_v9 = vsel %vm51_vm8, 0.0, %v6088_v14 }
 0x3d8   :  { %4941 = vmatprep.mubr.msk.f32.mxu0 %vm6077_vm2, %v6078_v41  ;;  %5467 = vmatprep.subr.bf16.mxu1 %v6076_v0  ;;  %v32_v31 = vcvt.s32.f32 %v27_v24 }
 0x3d9   :  { %5495 = vmatprep.subr.bf16.mxu0 %v6076_v0 }
 0x3da   :  { %4942 = vmatmul.mubr.msk.f32.vlgmr.msra.gmra.mrb[30].mxu0 %vm439_vm3, %v1367_v27  ;;  %v43_v27 = vfloor.f32 %v38_v21  ;;  %v40_v50 = vmul.f32 0.2, %v32_v31 }
 0x3db   :  { %4944 = vmatprep.mubr.msk.f32.mxu0 %vm6077_vm2, %v6078_v41 }
 0x3dc   :  { %vm50_vm7 = vcmp.eq.f32.partialorder %v43_v27, %v48_v10  ;;  %v45_v7 = vfloor.f32 %v40_v50 }
 0x3dd   :  { %v6587_v52 = vsel %vm50_vm7, 0.0, %v6088_v14 }
 0x3de   :  { %4945 = vmatmul.mubr.msk.f32.gmra.mrb[32].mxu0 %vm439_vm3, %v1369_v42  ;;  %vm52_vm9 = vcmp.eq.f32.partialorder %v45_v7, %v48_v10 }
 0x3df   :  { %4947 = vmatprep.mubr.msk.f32.mxu0 %vm6077_vm2, %v6078_v41  ;;  %v6608_v24 = vsel %vm52_vm9, 0.0, %v6088_v14 }
 0x3e2   :  { %4948 = vmatmul.mubr.msk.f32.gmra.mrb[34].mxu0 %vm439_vm3, %v1371_v29 }
 0x3e3   :  { %4950 = vmatprep.mubr.msk.f32.mxu0 %vm6077_vm2, %v6078_v41 }
 0x3e6   :  { %4951 = vmatmul.mubr.msk.f32.gmra.mrb[36].mxu0 %vm439_vm3, %v1373_v55  ;;  %v41_v55 = vmul.f32 0.2, %v33_v32 }
 0x3e7   :  { %4953 = vmatprep.mubr.msk.f32.mxu0 %vm6077_vm2, %v6078_v41 }
 0x3e8   :  { %v46_v12 = vfloor.f32 %v41_v55 }
 0x3ea   :  { %4954 = vmatmul.mubr.msk.f32.gmra.mrb[38].mxu0 %vm439_vm3, %v1375_v36  ;;  %vm53_vm10 = vcmp.eq.f32.partialorder %v46_v12, %v48_v10 }
 0x3eb   :  { %4966 = vmatprep.mubr.msk.f32.mxu0 %vm6077_vm2, %v6078_v41  ;;  %v6616_v28 = vsel %vm53_vm10, 0.0, %v6088_v14 }
 0x479   :  { %v526_v13 = vpop.f32.mrb[10].mxu1 }
 0x47a   :  { %v550_v17 = vmul.f32 0.35355338, %v526_v13  ;;  %v4793_v18 = vpop.f32.mrb[11].mxu1 }
 0x47c   :  { %v6577_v19 = vadd.f32 %v550_v17, %v6573_v11 }
 0x47d   :  { %v531_v15 = vpop.f32.mrb[12].mxu1 }
 0x47e   :  { %v4796_v23 = vpop.f32.mrb[13].mxu1  ;;  %v561_v20 = vsel %vm560_vm6, %v6577_v19, -inf  ;;  %v551_v47 = vmul.f32 0.35355338, %v531_v15 }
 0x47f   :  { %562 = vmax.xlane.f32.xlu1 %v561_v20 }
 0x480   :  { %v6592_v5 = vadd.f32 %v551_v47, %v6587_v52 }
 0x481   :  { %v536_v25 = vpop.f32.mrb[14].mxu1 }
 0x482   :  { %v4799_v29 = vpop.f32.mrb[15].mxu1  ;;  %v552_v2 = vmul.f32 0.35355338, %v536_v25  ;;  %v564_v18 = vsel %vm560_vm6, %v6592_v5, -inf }
 0x484   :  { %v6605_v15 = vadd.f32 %v552_v2, %v6598_v9 }
 0x485   :  { %v541_v33 = vpop.f32.mrb[16].mxu1  ;;  %v842_v36 = vpop.f32.mrb[10].mxu0 }
 0x486   :  { %v866_v42 = vmul.f32 0.35355338, %v842_v36  ;;  %v4802_v43 = vpop.f32.mrb[17].mxu1  ;;  %v4843_v45 = vpop.f32.mrb[11].mxu0  ;;  %v553_v26 = vmul.f32 0.35355338, %v541_v33 }
 0x487   :  { %v567_v25 = vsel %vm560_vm6, %v6605_v15, -inf }
 0x488   :  { %v6584_v51 = vadd.f32 %v866_v42, %v6573_v11  ;;  %v6629_v14 = vadd.f32 %v553_v26, %v6608_v24 }
 0x489   :  { %v546_v56 = vpop.f32.mrb[18].mxu1  ;;  %v847_v57 = vpop.f32.mrb[12].mxu0 }
 0x48a   :  { %v867_v60 = vmul.f32 0.35355338, %v847_v57  ;;  %v4805_v61 = vpop.f32.mrb[19].mxu1  ;;  %v4846_v63 = vpop.f32.mrb[13].mxu0  ;;  %v876_v4 = vsel %vm560_vm6, %v6584_v51, -inf  ;;  %v570_v50 = vsel %vm560_vm6, %v6629_v14, -inf }
 0x48b   :  { %877 = vmax.xlane.f32.xlu0 %v876_v4  ;;  %v554_v22 = vmul.f32 0.35355338, %v546_v56 }
 0x48c   :  { %v6595_v8 = vadd.f32 %v867_v60, %v6587_v52 }
 0x48d   :  { %v852_v13 = vpop.f32.mrb[14].mxu0  ;;  %v6624_v33 = vadd.f32 %v554_v22, %v6616_v28 }
 0x48e   :  { %v4849_v16 = vpop.f32.mrb[15].mxu0  ;;  %v879_v44 = vsel %vm560_vm6, %v6595_v8, -inf  ;;  %v868_v17 = vmul.f32 0.35355338, %v852_v13 }
 0x48f   :  { %880 = vmax.xlane.f32.xlu1 %v879_v44  ;;  %565 = vmax.xlane.f32.xlu0 %v564_v18  ;;  %v573_v47 = vsel %vm560_vm6, %v6624_v33, -inf }
 0x490   :  { %v6613_v27 = vadd.f32 %v868_v17, %v6598_v9 }
 0x491   :  { %v857_v21 = vpop.f32.mrb[16].mxu0 }
 0x492   :  { %v869_v23 = vmul.f32 0.35355338, %v857_v21  ;;  %v4852_v20 = vpop.f32.mrb[17].mxu0  ;;  %v882_v40 = vsel %vm560_vm6, %v6613_v27, -inf }
 0x493   :  { %568 = vmax.xlane.f32.xlu0 %v567_v25 }
 0x494   :  { %v6619_v10 = vadd.f32 %v869_v23, %v6608_v24 }
 0x495   :  { %v862_v29 = vpop.f32.mrb[18].mxu0 }
 0x496   :  { %v4855_v31 = vpop.f32.mrb[19].mxu0  ;;  %v885_v32 = vsel %vm560_vm6, %v6619_v10, -inf  ;;  %v870_v36 = vmul.f32 0.35355338, %v862_v29 }
 0x497   :  { %886 = vmax.xlane.f32.xlu1 %v885_v32  ;;  %883 = vmax.xlane.f32.xlu0 %v882_v40 }
 0x498   :  { %v6636_v55 = vadd.f32 %v870_v36, %v6616_v28 }
 0x499   :  { %v1157_v42 = vpop.f32.mrb[20].mxu0 }
 0x49a   :  { %v1181_v43 = vmul.f32 0.35355338, %v1157_v42  ;;  %v4893_v45 = vpop.f32.mrb[21].mxu0  ;;  %v888_v2 = vsel %vm560_vm6, %v6636_v55, -inf }
 0x49b   :  { %574 = vmax.xlane.f32.xlu1 %v573_v47  ;;  %571 = vmax.xlane.f32.xlu0 %v570_v50 }
 0x49c   :  { %v6639_v56 = vadd.f32 %v1181_v43, %v6573_v11 }
 0x49d   :  { %v1162_v57 = vpop.f32.mrb[22].mxu0 }
 0x49e   :  { %v1182_v60 = vmul.f32 0.35355338, %v1162_v57  ;;  %v4896_v61 = vpop.f32.mrb[23].mxu0  ;;  %v1191_v63 = vsel %vm560_vm6, %v6639_v56, -inf }
 0x49f   :  { %1192 = vmax.xlane.f32.xlu1 %v1191_v63  ;;  %889 = vmax.xlane.f32.xlu0 %v888_v2 }
 0x4a0   :  { %v6646_v4 = vadd.f32 %v1182_v60, %v6587_v52 }
 0x4a1   :  { %v1167_v7 = vpop.f32.mrb[24].mxu0 }
 0x4a2   :  { %v1183_v12 = vmul.f32 0.35355338, %v1167_v7  ;;  %v4899_v13 = vpop.f32.mrb[25].mxu0  ;;  %v1194_v16 = vsel %vm560_vm6, %v6646_v4, -inf }
 0x4a3   :  { %1195 = vmax.xlane.f32.xlu0 %v1194_v16 }
 0x4a4   :  { %v6651_v44 = vadd.f32 %v1183_v12, %v6598_v9 }
 0x4a5   :  { %v1172_v17 = vpop.f32.mrb[26].mxu0 }
 0x4a6   :  { %v1184_v18 = vmul.f32 0.35355338, %v1172_v17  ;;  %v4902_v21 = vpop.f32.mrb[27].mxu0  ;;  %v1197_v22 = vsel %vm560_vm6, %v6651_v44, -inf }
 0x4a7   :  { %1198 = vmax.xlane.f32.xlu1 %v1197_v22 }
 0x4a8   :  { %v6656_v23 = vadd.f32 %v1184_v18, %v6608_v24 }
 0x4a9   :  { %v1177_v20 = vpop.f32.mrb[28].mxu0 }
 0x4aa   :  { %v1185_v26 = vmul.f32 0.35355338, %v1177_v20  ;;  %v4905_v25 = vpop.f32.mrb[29].mxu0  ;;  %v1200_v29 = vsel %vm560_vm6, %v6656_v23, -inf }
 0x4ab   :  { %1201 = vmax.xlane.f32.xlu0 %v1200_v29 }
 0x4ac   :  { %v6661_v31 = vadd.f32 %v1185_v26, %v6616_v28 }
 0x4ad   :  { %v1472_v32 = vpop.f32.mrb[30].mxu0 }
 0x4ae   :  { %v1496_v36 = vmul.f32 0.35355338, %v1472_v32  ;;  %v4943_v40 = vpop.f32.mrb[31].mxu0  ;;  %v1203_v42 = vsel %vm560_vm6, %v6661_v31, -inf }
 0x4af   :  { %1204 = vmax.xlane.f32.xlu0 %v1203_v42 }
 0x4b0   :  { %v6666_v43 = vadd.f32 %v1496_v36, %v6573_v11  ;;  %v6692_v36 = vpop.permute.xlu1 %5717 }
 0x4b1   :  { %v1477_v45 = vpop.f32.mrb[32].mxu0 }
 0x4b2   :  { %v1497_v47 = vmul.f32 0.35355338, %v1477_v45  ;;  %v4946_v50 = vpop.f32.mrb[33].mxu0  ;;  %v1506_v57 = vsel %vm560_vm6, %v6666_v43, -inf }
 0x4b3   :  { %1507 = vmax.xlane.f32.xlu1 %v1506_v57 }
 0x4b4   :  { %v6671_v60 = vadd.f32 %v1497_v47, %v6587_v52  ;;  %v6695_v47 = vpop.permute.xlu0 %939 }
 0x4b5   :  { %v1482_v61 = vpop.f32.mrb[34].mxu0 }
 0x4b6   :  { %v1498_v63 = vmul.f32 0.35355338, %v1482_v61  ;;  %v4949_v2 = vpop.f32.mrb[35].mxu0  ;;  %v1509_v7 = vsel %vm560_vm6, %v6671_v60, -inf }
 0x4b7   :  { %1510 = vmax.xlane.f32.xlu1 %v1509_v7 }
 0x4b8   :  { %v6676_v12 = vadd.f32 %v1498_v63, %v6598_v9 }
 0x4b9   :  { %v1487_v13 = vpop.f32.mrb[36].mxu0 }
 0x4ba   :  { %v1499_v16 = vmul.f32 0.35355338, %v1487_v13  ;;  %v4952_v17 = vpop.f32.mrb[37].mxu0  ;;  %v1512_v18 = vsel %vm560_vm6, %v6676_v12, -inf }
 0x4bb   :  { %1513 = vmax.xlane.f32.xlu0 %v1512_v18 }
 0x4bc   :  { %v6681_v21 = vadd.f32 %v1499_v16, %v6608_v24 }
 0x4bd   :  { %v1492_v22 = vpop.f32.mrb[38].mxu0 }
 0x4be   :  { %v4955_v20 = vpop.f32.mrb[39].mxu0  ;;  %v1515_v26 = vsel %vm560_vm6, %v6681_v21, -inf  ;;  %v1500_v25 = vmul.f32 0.35355338, %v1492_v22 }
 0x4bf   :  { %1516 = vmax.xlane.f32.xlu1 %v1515_v26 }
 0x4c0   :  { %v6688_v29 = vadd.f32 %v1500_v25, %v6616_v28 }
 0x4c2   :  { %v1518_v32 = vsel %vm560_vm6, %v6688_v29, -inf }
 0x4d1   :  { %5727 = vrot.lane.b32.xlu0 %v6380_v30, %s6089_s18 }
 0x4f0   :  { %1519 = vmax.xlane.f32.xlu0 %v1518_v32 }
 0x50c   :  { %v563_v40 = vpop.xlane.xlu1 %562 }
 0x50d   :  { %v576_v42 = vsub.f32 %v6577_v19, %v563_v40 }
 0x50f   :  { %v581_v45 = vmul.f32 1.442695, %v576_v42 }
 0x511   :  { %5856 = vpow2.f32 %v581_v45 }
 0x518   :  { %v878_v50 = vpop.xlane.xlu0 %877 }
 0x519   :  { %v891_v57 = vsub.f32 %v6584_v51, %v878_v50 }
 0x51b   :  { %v6698_v61 = vpop.eup %5856  ;;  %v896_v63 = vmul.f32 1.442695, %v891_v57 }
 0x51c   :  { %v881_v2 = vpop.xlane.xlu1 %880  ;;  %v591_v7 = vsel %vm560_vm6, %v6698_v61, 0.0  ;;  %v566_v16 = vpop.xlane.xlu0 %565 }
 0x51d   :  { %v892_v13 = vsub.f32 %v6595_v8, %v881_v2  ;;  %592 = vadd.xlane.f32.xlu1 %v591_v7  ;;  %5858 = vpow2.f32 %v896_v63  ;;  %v577_v19 = vsub.f32 %v6592_v5, %v566_v16 }
 0x51f   :  { %v898_v17 = vmul.f32 1.442695, %v892_v13  ;;  %v583_v18 = vmul.f32 1.442695, %v577_v19 }
 0x520   :  { %v569_v22 = vpop.xlane.xlu0 %568 }
 0x521   :  { %5860 = vpow2.f32 %v583_v18  ;;  %v578_v51 = vsub.f32 %v6605_v15, %v569_v22 }
 0x522   :  { %5862 = vpow2.f32 %v898_v17 }
 0x523   :  { %v585_v20 = vmul.f32 1.442695, %v578_v51 }
 0x524   :  { %v887_v26 = vpop.xlane.xlu1 %886  ;;  %v884_v32 = vpop.xlane.xlu0 %883 }
 0x525   :  { %v894_v25 = vsub.f32 %v6619_v10, %v887_v26  ;;  %5864 = vpow2.f32 %v585_v20  ;;  %v893_v8 = vsub.f32 %v6613_v27, %v884_v32 }
 0x527   :  { %v6707_v40 = vpop.eup %5858  ;;  %v902_v42 = vmul.f32 1.442695, %v894_v25  ;;  %v900_v45 = vmul.f32 1.442695, %v893_v8 }
 0x528   :  { %v575_v5 = vpop.xlane.xlu1 %574  ;;  %v572_v50 = vpop.xlane.xlu0 %571  ;;  %v906_v15 = vsel %vm560_vm6, %v6707_v40, 0.0 }
 0x529   :  { %v580_v57 = vsub.f32 %v6624_v33, %v575_v5  ;;  %5866 = vpow2.f32 %v900_v45  ;;  %v579_v63 = vsub.f32 %v6629_v14, %v572_v50  ;;  %907 = vadd.xlane.f32.xlu1 %v906_v15 }
 0x52a   :  { %5868 = vpow2.f32 %v902_v42 }
 0x52b   :  { %v6713_v10 = vpop.eup %5860  ;;  %v587_v2 = vmul.f32 1.442695, %v579_v63  ;;  %v589_v27 = vmul.f32 1.442695, %v580_v57 }
 0x52c   :  { %v1193_v7 = vpop.xlane.xlu1 %1192  ;;  %v890_v13 = vpop.xlane.xlu0 %889  ;;  %v594_v19 = vsel %vm560_vm6, %v6713_v10, 0.0 }
 0x52d   :  { %v1206_v16 = vsub.f32 %v6639_v56, %v1193_v7  ;;  %v6718_v33 = vpop.eup %5862  ;;  %5870 = vpow2.f32 %v587_v2  ;;  %v895_v17 = vsub.f32 %v6636_v55, %v890_v13  ;;  %595 = vadd.xlane.f32.xlu0 %v594_v19 }
 0x52e   :  { %5872 = vpow2.f32 %v589_v27  ;;  %v909_v51 = vsel %vm560_vm6, %v6718_v33, 0.0 }
 0x52f   :  { %v1211_v14 = vmul.f32 1.442695, %v1206_v16  ;;  %v6721_v18 = vpop.eup %5864  ;;  %v904_v22 = vmul.f32 1.442695, %v895_v17 }
 0x530   :  { %v597_v56 = vsel %vm560_vm6, %v6721_v18, 0.0  ;;  %v1196_v19 = vpop.xlane.xlu0 %1195 }
 0x531   :  { %5874 = vpow2.f32 %v1211_v14  ;;  %910 = vadd.xlane.f32.xlu0 %v909_v51  ;;  %598 = vadd.xlane.f32.xlu1 %v597_v56  ;;  %v1207_v17 = vsub.f32 %v6646_v4, %v1196_v19 }
 0x532   :  { %5876 = vpow2.f32 %v904_v22 }
 0x533   :  { %v6727_v20 = vpop.eup %5866  ;;  %v1213_v22 = vmul.f32 1.442695, %v1207_v17 }
 0x534   :  { %v912_v55 = vsel %vm560_vm6, %v6727_v20, 0.0  ;;  %v6731_v26 = vpop.eup %5868  ;;  %v1199_v63 = vpop.xlane.xlu1 %1198 }
 0x535   :  { %913 = vadd.xlane.f32.xlu1 %v912_v55  ;;  %v915_v8 = vsel %vm560_vm6, %v6731_v26, 0.0  ;;  %v1208_v51 = vsub.f32 %v6651_v44, %v1199_v63 }
 0x537   :  { %v6733_v25 = vpop.eup %5870  ;;  %v1215_v56 = vmul.f32 1.442695, %v1208_v51 }
 0x538   :  { %v600_v32 = vsel %vm560_vm6, %v6733_v25, 0.0  ;;  %v6739_v42 = vpop.eup %5872  ;;  %v1202_v14 = vpop.xlane.xlu0 %1201 }
 0x539   :  { %601 = vadd.xlane.f32.xlu0 %v600_v32  ;;  %916 = vadd.xlane.f32.xlu1 %v915_v8  ;;  %v603_v50 = vsel %vm560_vm6, %v6739_v42, 0.0  ;;  %v1209_v55 = vsub.f32 %v6656_v23, %v1202_v14 }
 0x53b   :  { %v6741_v45 = vpop.eup %5874 }
 0x53c   :  { %v1221_v5 = vsel %vm560_vm6, %v6741_v45, 0.0  ;;  %v6747_v57 = vpop.eup %5876  ;;  %v1205_v32 = vpop.xlane.xlu0 %1204 }
 0x53d   :  { %604 = vadd.xlane.f32.xlu1 %v603_v50  ;;  %1222 = vadd.xlane.f32.xlu0 %v1221_v5  ;;  %v918_v15 = vsel %vm560_vm6, %v6747_v57, 0.0 }
 0x540   :  { %v1508_v2 = vpop.xlane.xlu1 %1507 }
 0x541   :  { %919 = vadd.xlane.f32.xlu1 %v918_v15  ;;  %v1521_v50 = vsub.f32 %v6666_v43, %v1508_v2 }
 0x543   :  { %v1526_v15 = vmul.f32 1.442695, %v1521_v50 }
 0x544   :  { %v1511_v27 = vpop.xlane.xlu1 %1510 }
 0x545   :  { %v1522_v23 = vsub.f32 %v6671_v60, %v1511_v27 }
 0x548   :  { %v1514_v63 = vpop.xlane.xlu0 %1513 }
 0x54c   :  { %v1517_v7 = vpop.xlane.xlu1 %1516 }
 0x54d   :  { %v1524_v13 = vsub.f32 %v6681_v21, %v1517_v7  ;;  %v1210_v21 = vsub.f32 %v6661_v31, %v1205_v32  ;;  %v1528_v31 = vmul.f32 1.442695, %v1522_v23  ;;  %v6801_v32 = vpop.permute.xlu0 %5727 }
 0x54f   :  { %v1532_v16 = vmul.f32 1.442695, %v1524_v13  ;;  %v1219_v4 = vmul.f32 1.442695, %v1210_v21 }
 0x551   :  { %5878 = vpow2.f32 %v1532_v16  ;;  %v1523_v16 = vsub.f32 %v6676_v12, %v1514_v63  ;;  %v5725_v63 = vunpack.i.h.bf16 %v6538_v62 }
 0x552   :  { %1254 = vrot.lane.b32.xlu1 %v6396_v38, %s6089_s18  ;;  %5880 = vpow2.f32 %v1213_v22 }
 0x553   :  { %5732 = vrot.lane.b32.xlu0 %v6390_v37, %s6089_s18  ;;  %5882 = vpow2.f32 %v1215_v56  ;;  %v1530_v19 = vmul.f32 1.442695, %v1523_v16 }
 0x556   :  { %5737 = vrot.lane.b32.xlu1 %v6380_v30, %s6090_s19  ;;  %v1217_v30 = vmul.f32 1.442695, %v1209_v55 }
 0x558   :  { %5884 = vpow2.f32 %v1217_v30 }
 0x559   :  { %5886 = vpow2.f32 %v1219_v4  ;;  %v5719_v4 = vunpack.i.l.bf16 %v6692_v36 }
 0x55a   :  { %5888 = vpow2.f32 %v1526_v15 }
 0x55b   :  { %v6761_v8 = vpop.eup %5878  ;;  %5890 = vpow2.f32 %v1528_v31 }
 0x55c   :  { %v1545_v5 = vsel %vm560_vm6, %v6761_v8, 0.0  ;;  %v6767_v44 = vpop.eup %5880  ;;  %5892 = vpow2.f32 %v1530_v19 }
 0x55d   :  { %v1224_v7 = vsel %vm560_vm6, %v6767_v44, 0.0  ;;  %v6772_v13 = vpop.eup %5882 }
 0x55e   :  { %v1227_v43 = vsel %vm560_vm6, %v6772_v13, 0.0 }
 0x562   :  { %v6777_v2 = vpop.eup %5884 }
 0x563   :  { %v1230_v60 = vsel %vm560_vm6, %v6777_v2, 0.0  ;;  %v6781_v27 = vpop.eup %5886 }
 0x564   :  { %v1233_v17 = vsel %vm560_vm6, %v6781_v27, 0.0  ;;  %v6785_v14 = vpop.eup %5888 }
 0x565   :  { %v1536_v12 = vsel %vm560_vm6, %v6785_v14, 0.0  ;;  %v6791_v22 = vpop.eup %5890 }
 0x566   :  { %v1539_v51 = vsel %vm560_vm6, %v6791_v22, 0.0  ;;  %v6795_v56 = vpop.eup %5892 }
 0x567   :  { %v1542_v55 = vsel %vm560_vm6, %v6795_v56, 0.0 }
 0x572   :  { %1546 = vadd.xlane.f32.xlu0 %v1545_v5  ;;  %v5720_v5 = vunpack.i.h.bf16 %v6692_v36 }
 0x57a   :  { %1225 = vadd.xlane.f32.xlu1 %v1224_v7  ;;  %v5724_v7 = vunpack.i.l.bf16 %v6538_v62 }
 0x57d   :  { %v1520_v30 = vpop.xlane.xlu0 %1519 }
 0x57e   :  { %1228 = vadd.xlane.f32.xlu1 %v1227_v43  ;;  %v1525_v21 = vsub.f32 %v6688_v29, %v1520_v30  ;;  %v5471_v29 = vpack.c.bf16 %v5725_v63, %v5724_v7 }
 0x580   :  { %v1534_v15 = vmul.f32 1.442695, %v1525_v21 }
 0x582   :  { %1231 = vadd.xlane.f32.xlu1 %v1230_v60 }
 0x586   :  { %1234 = vadd.xlane.f32.xlu1 %v1233_v17 }
 0x588   :  { %1569 = vrot.lane.b32.xlu0 %v6396_v38, %s6090_s19 }
 0x58a   :  { %1537 = vadd.xlane.f32.xlu1 %v1536_v12 }
 0x58c   :  { %5747 = vrot.lane.b32.xlu0 %v5746_v39, %s6091_s0 }
 0x58e   :  { %1540 = vadd.xlane.f32.xlu1 %v1539_v51 }
 0x592   :  { %1543 = vadd.xlane.f32.xlu1 %v1542_v55 }
 0x5a3   :  { %5742 = vrot.lane.b32.xlu1 %v6390_v37, %s6090_s19  ;;  %v5468_v37 = vpack.c.bf16 %v5720_v5, %v5719_v4 }
 0x5aa   :  { %v593_v38 = vpop.xlane.xlu1 %592 }
 0x5ab   :  { %5894 = vrcp.f32 %v593_v38 }
 0x5ac   :  { %5896 = vpow2.f32 %v1534_v15 }
 0x5b5   :  { %v5895_v50 = vpop.eup %5894 }
 0x5b6   :  { %v607_v23 = vmul.f32 %v5895_v50, %v6698_v61  ;;  %v908_v36 = vpop.xlane.xlu1 %907  ;;  %v6816_v43 = vpop.eup %5896 }
 0x5b7   :  { %v1548_v12 = vsel %vm560_vm6, %v6816_v43, 0.0 }
 0x5b8   :  { %4817 = vmatmul.mubr.msk.f32.vlgmr.msra.gmra.mrb[20].mxu1 %vm560_vm6, %v607_v23 }
 0x5b9   :  { %5469 = vmatpush3.bf16.msra.mxu1 %v5468_v37  ;;  %4819 = vmatprep.mubr.msk.f32.mxu1 %vm6077_vm2, %v6078_v41  ;;  %v5730_v37 = vunpack.i.h.bf16 %v6801_v32 }
 0x5ba   :  { %5470 = vmatprep.subr.bf16.mxu1 %v6076_v0  ;;  %v596_v31 = vpop.xlane.xlu0 %595 }
 0x5bb   :  { %5898 = vrcp.f32 %v596_v31 }
 0x5bd   :  { %5472 = vmatpush3.bf16.msra.mxu1 %v5471_v29  ;;  %v5729_v29 = vunpack.i.l.bf16 %v6801_v32 }
 0x5be   :  { %4864 = vmatprep.subr.mxu1 %v6078_v41  ;;  %v599_v61 = vpop.xlane.xlu1 %598  ;;  %v911_v62 = vpop.xlane.xlu0 %910 }
 0x5bf   :  { %5900 = vrcp.f32 %v599_v61 }
 0x5c1   :  { %4865 = vmatpush3.msra.mxu1 %v6695_v47 }
 0x5c2   :  { %5481 = vmatprep.subr.bf16.mxu1 %v6076_v0  ;;  %v914_v16 = vpop.xlane.xlu1 %913 }
 0x5c5   :  { %v5899_v19 = vpop.eup %5898 }
 0x5c6   :  { %v602_v60 = vpop.xlane.xlu0 %601  ;;  %v917_v17 = vpop.xlane.xlu1 %916  ;;  %v609_v51 = vmul.f32 %v5899_v19, %v6713_v10 }
 0x5c7   :  { %5902 = vrcp.f32 %v602_v60  ;;  %1549 = vadd.xlane.f32.xlu1 %v1548_v12 }
 0x5c8   :  { %4820 = vmatmul.mubr.msk.f32.gmra.mrb[22].mxu1 %vm560_vm6, %v609_v51 }
 0x5c9   :  { %4822 = vmatprep.mubr.msk.f32.mxu1 %vm6077_vm2, %v6078_v41  ;;  %v5901_v47 = vpop.eup %5900 }
 0x5ca   :  { %v605_v55 = vpop.xlane.xlu1 %604  ;;  %v611_v38 = vmul.f32 %v5901_v47, %v6721_v18  ;;  %v1223_v4 = vpop.xlane.xlu0 %1222 }
 0x5cb   :  { %5904 = vrcp.f32 %v605_v55 }
 0x5cc   :  { %4823 = vmatmul.mubr.msk.f32.gmra.mrb[24].mxu1 %vm560_vm6, %v611_v38  ;;  %5906 = vrcp.f32 %v908_v36 }
 0x5cd   :  { %4825 = vmatprep.mubr.msk.f32.mxu1 %vm6077_vm2, %v6078_v41  ;;  %5908 = vrcp.f32 %v911_v62  ;;  %v5482_v62 = vpack.c.bf16 %v5730_v37, %v5729_v29 }
 0x5ce   :  { %v920_v30 = vpop.xlane.xlu1 %919  ;;  %5910 = vrcp.f32 %v914_v16  ;;  %v5733_v36 = vpop.permute.xlu0 %5732 }
 0x5cf   :  { %5912 = vrcp.f32 %v917_v17  ;;  %v5735_v16 = vunpack.i.h.bf16 %v5733_v36 }
 0x5d0   :  { %5914 = vrcp.f32 %v920_v30 }
 0x5d1   :  { %v5903_v10 = vpop.eup %5902  ;;  %5916 = vrcp.f32 %v1223_v4 }
 0x5d2   :  { %v1255_v21 = vpop.permute.xlu1 %1254  ;;  %v613_v5 = vmul.f32 %v5903_v10, %v6733_v25 }
 0x5d4   :  { %4826 = vmatmul.mubr.msk.f32.gmra.mrb[26].mxu1 %vm560_vm6, %v613_v5 }
 0x5d5   :  { %4828 = vmatprep.mubr.msk.f32.mxu1 %vm6077_vm2, %v6078_v41  ;;  %v5905_v18 = vpop.eup %5904 }
 0x5d6   :  { %v5738_v50 = vpop.permute.xlu1 %5737  ;;  %v615_v63 = vmul.f32 %v5905_v18, %v6739_v42  ;;  %v5907_v7 = vpop.eup %5906  ;;  %v5734_v42 = vunpack.i.l.bf16 %v5733_v36 }
 0x5d7   :  { %v5740_v15 = vunpack.i.h.bf16 %v5738_v50  ;;  %v5739_v23 = vunpack.i.l.bf16 %v5738_v50  ;;  %v922_v31 = vmul.f32 %v5907_v7, %v6707_v40  ;;  %v5909_v61 = vpop.eup %5908 }
 0x5d8   :  { %4829 = vmatmul.mubr.msk.f32.gmra.mrb[28].mxu1 %vm560_vm6, %v615_v63  ;;  %v924_v32 = vmul.f32 %v5909_v61, %v6718_v33  ;;  %v5911_v19 = vpop.eup %5910  ;;  %v5485_v40 = vpack.c.bf16 %v5735_v16, %v5734_v42  ;;  %v6068_v16 = vld [vmem:[%s8035_s3 + $0x20] sm:$0xff]  ;;  %v6069_v42 = vld [vmem:[%s8035_s3 + $0x30] sm:$0xff] }
 0x5d9   :  { %v5496_v25 = vpack.c.bf16 %v5740_v15, %v5739_v23  ;;  %4866 = vmatprep.mubr.msk.f32.mxu1 %vm6077_vm2, %v6078_v41  ;;  %v926_v60 = vmul.f32 %v5911_v19, %v6727_v20  ;;  %v5913_v17 = vpop.eup %5912 }
 0x5da   :  { %v928_v33 = vmul.f32 %v5913_v17, %v6731_v26  ;;  %v5915_v12 = vpop.eup %5914 }
 0x5db   :  { %5497 = vmatpush3.bf16.msra.mxu0 %v5496_v25  ;;  %v930_v51 = vmul.f32 %v5915_v12, %v6747_v57  ;;  %v5917_v20 = vpop.eup %5916 }
 0x5dc   :  { %5498 = vmatprep.subr.bf16.mxu0 %v6076_v0  ;;  %4867 = vmatmul.mubr.msk.f32.vlgmr.msra.gmra.mrb[30].mxu1 %vm560_vm6, %v922_v31  ;;  %v1237_v47 = vmul.f32 %v5917_v20, %v6741_v45 }
 0x5dd   :  { %5483 = vmatpush3.bf16.msra.mxu1 %v5482_v62  ;;  %4869 = vmatprep.mubr.msk.f32.mxu1 %vm6077_vm2, %v6078_v41 }
 0x5de   :  { %5484 = vmatprep.subr.bf16.mxu1 %v6076_v0 }
 0x5e0   :  { %4870 = vmatmul.mubr.msk.f32.gmra.mrb[32].mxu1 %vm560_vm6, %v924_v32  ;;  %v5751_v32 = vpack.i.bf16 %v6069_v42, %v6068_v16 }
 0x5e1   :  { %5486 = vmatpush3.bf16.msra.mxu1 %v5485_v40  ;;  %4872 = vmatprep.mubr.msk.f32.mxu1 %vm6077_vm2, %v6078_v41 }
 0x5e2   :  { %4914 = vmatprep.subr.mxu1 %v6078_v41  ;;  %5752 = vrot.lane.b32.xlu0 %v5751_v32, %s6091_s0 }
 0x5e4   :  { %4873 = vmatmul.mubr.msk.f32.gmra.mrb[34].mxu1 %vm560_vm6, %v926_v60 }
 0x5e5   :  { %4915 = vmatpush3.msra.mxu1 %v1255_v21  ;;  %4875 = vmatprep.mubr.msk.f32.mxu1 %vm6077_vm2, %v6078_v41 }
 0x5e6   :  { %5641 = vmatprep.subr.bf16.mxu1 %v6076_v0 }
 0x5e8   :  { %4876 = vmatmul.mubr.msk.f32.gmra.mrb[36].mxu1 %vm560_vm6, %v928_v33 }
 0x5e9   :  { %4878 = vmatprep.mubr.msk.f32.mxu1 %vm6077_vm2, %v6078_v41 }
 0x5ec   :  { %4879 = vmatmul.mubr.msk.f32.gmra.mrb[38].mxu1 %vm560_vm6, %v930_v51 }
 0x5ed   :  { %4916 = vmatprep.mubr.msk.f32.mxu1 %vm6077_vm2, %v6078_v41 }
 0x5f0   :  { %4917 = vmatmul.mubr.msk.f32.vlgmr.msra.gmra.mrb[40].mxu1 %vm560_vm6, %v1237_v47 }
 0x5f1   :  { %5644 = vmatpush3.bf16.msra.mxu1 %v5496_v25  ;;  %4919 = vmatprep.mubr.msk.f32.mxu1 %vm6077_vm2, %v6078_v41 }
 0x5f2   :  { %5642 = vmatprep.subr.bf16.mxu1 %v6076_v0 }
 0x5ff   :  { %v1547_v15 = vpop.xlane.xlu0 %1546 }
 0x603   :  { %v1570_v25 = vpop.permute.xlu0 %1569 }
 0x607   :  { %v1226_v26 = vpop.xlane.xlu1 %1225  ;;  %v5748_v60 = vpop.permute.xlu0 %5747 }
 0x608   :  { %5918 = vrcp.f32 %v1226_v26  ;;  %v5750_v17 = vunpack.i.h.bf16 %v5748_v60  ;;  %v5749_v33 = vunpack.i.l.bf16 %v5748_v60 }
 0x60a   :  { %v5502_v12 = vpack.c.bf16 %v5750_v17, %v5749_v33 }
 0x60b   :  { %v1229_v55 = vpop.xlane.xlu1 %1228 }
 0x60c   :  { %5920 = vrcp.f32 %v1229_v55 }
 0x60f   :  { %v1232_v57 = vpop.xlane.xlu1 %1231 }
 0x610   :  { %5922 = vrcp.f32 %v1232_v57 }
 0x612   :  { %v5919_v38 = vpop.eup %5918 }
 0x613   :  { %v1235_v30 = vpop.xlane.xlu1 %1234  ;;  %v1239_v10 = vmul.f32 %v5919_v38, %v6767_v44 }
 0x614   :  { %5924 = vrcp.f32 %v1235_v30 }
 0x615   :  { %4920 = vmatmul.mubr.msk.f32.gmra.mrb[42].mxu1 %vm560_vm6, %v1239_v10 }
 0x616   :  { %v5921_v45 = vpop.eup %5920  ;;  %4922 = vmatprep.mubr.msk.f32.mxu1 %vm6077_vm2, %v6078_v41 }
 0x617   :  { %v1538_v21 = vpop.xlane.xlu1 %1537  ;;  %v1241_v5 = vmul.f32 %v5921_v45, %v6772_v13 }
 0x618   :  { %5926 = vrcp.f32 %v1538_v21 }
 0x619   :  { %4923 = vmatmul.mubr.msk.f32.gmra.mrb[44].mxu1 %vm560_vm6, %v1241_v5 }
 0x61a   :  { %v5923_v4 = vpop.eup %5922  ;;  %4925 = vmatprep.mubr.msk.f32.mxu1 %vm6077_vm2, %v6078_v41 }
 0x61b   :  { %v1541_v18 = vpop.xlane.xlu1 %1540  ;;  %v1243_v50 = vmul.f32 %v5923_v4, %v6777_v2 }
 0x61d   :  { %4926 = vmatmul.mubr.msk.f32.gmra.mrb[46].mxu1 %vm560_vm6, %v1243_v50 }
 0x61e   :  { %v5925_v44 = vpop.eup %5924  ;;  %4928 = vmatprep.mubr.msk.f32.mxu1 %vm6077_vm2, %v6078_v41 }
 0x61f   :  { %v1544_v23 = vpop.xlane.xlu1 %1543  ;;  %v1245_v13 = vmul.f32 %v5925_v44, %v6781_v27 }
 0x620   :  { %5928 = vrcp.f32 %v1544_v23 }
 0x621   :  { %5930 = vrcp.f32 %v1547_v15  ;;  %4929 = vmatmul.mubr.msk.f32.gmra.mrb[48].mxu1 %vm560_vm6, %v1245_v13 }
 0x622   :  { %5932 = vrcp.f32 %v1541_v18  ;;  %4972 = vmatprep.mubr.msk.f32.mxu1 %vm6077_vm2, %v6078_v41  ;;  %v5927_v29 = vpop.eup %5926 }
 0x623   :  { %v5743_v2 = vpop.permute.xlu1 %5742  ;;  %v1552_v31 = vmul.f32 %v5927_v29, %v6785_v14 }
 0x624   :  { %v5745_v63 = vunpack.i.h.bf16 %v5743_v2  ;;  %v5744_v7 = vunpack.i.l.bf16 %v5743_v2 }
 0x626   :  { %v5499_v37 = vpack.c.bf16 %v5745_v63, %v5744_v7 }
 0x628   :  { %5500 = vmatpush3.bf16.msra.mxu0 %v5499_v37  ;;  %5645 = vmatpush3.bf16.msra.mxu1 %v5499_v37 }
 0x629   :  { %4964 = vmatprep.subr.mxu0 %v6078_v41  ;;  %5643 = vmatprep.subr.mxu1 %v6078_v41 }
 0x62a   :  { %v5929_v27 = vpop.eup %5928 }
 0x62b   :  { %v5931_v36 = vpop.eup %5930  ;;  %v1556_v61 = vmul.f32 %v5929_v27, %v6795_v56 }
 0x62c   :  { %v5933_v62 = vpop.eup %5932  ;;  %4965 = vmatpush3.msra.mxu0 %v1570_v25  ;;  %5646 = vmatpush3.msra.mxu1 %v1570_v25  ;;  %v1558_v35 = vmul.f32 %v5931_v36, %v6761_v8 }
 0x62d   :  { %4967 = vmatmul.mubr.msk.f32.vlgmr.msra.gmra.mrb[40].mxu0 %vm560_vm6, %v1552_v31  ;;  %4973 = vmatmul.mubr.msk.f32.vlgmr.msra.gmra.mrb[50].mxu1 %vm560_vm6, %v1556_v61  ;;  %v1554_v34 = vmul.f32 %v5933_v62, %v6791_v22 }
 0x62e   :  { %4969 = vmatprep.mubr.msk.f32.mxu0 %vm6077_vm2, %v6078_v41  ;;  %4975 = vmatprep.mubr.msk.f32.mxu1 %vm6077_vm2, %v6078_v41 }
 0x62f   :  { %5501 = vmatprep.subr.bf16.mxu0 %v6076_v0  ;;  %5507 = vmatprep.subr.bf16.mxu1 %v6076_v0 }
 0x630   :  { %5503 = vmatpush3.bf16.msra.mxu0 %v5502_v12 }
 0x631   :  { %4970 = vmatmul.mubr.msk.f32.gmra.mrb[42].mxu0 %vm560_vm6, %v1554_v34  ;;  %4976 = vmatmul.mubr.msk.f32.gmra.mrb[52].mxu1 %vm560_vm6, %v1558_v35 }
 0x632   :  { %4978 = vmatprep.mubr.msk.f32.mxu1 %vm6077_vm2, %v6078_v41  ;;  %4989 = vmatprep.mubr.msk.f32.mxu0 %vm6077_vm2, %v6078_v41 }
 0x633   :  { %5504 = vmatprep.subr.bf16.mxu0 %v6076_v0 }
 0x654   :  { %v1550_v39 = vpop.xlane.xlu1 %1549  ;;  %v5753_v47 = vpop.permute.xlu0 %5752 }
 0x655   :  { %5934 = vrcp.f32 %v1550_v39  ;;  %v5754_v26 = vunpack.i.l.bf16 %v5753_v47 }
 0x65f   :  { %v5935_v14 = vpop.eup %5934 }
 0x660   :  { %v1560_v8 = vmul.f32 %v5935_v14, %v6816_v43  ;;  %v5755_v43 = vunpack.i.h.bf16 %v5753_v47 }
 0x662   :  { %4979 = vmatmul.mubr.msk.f32.gmra.mrb[54].mxu1 %vm560_vm6, %v1560_v8  ;;  %v5505_v55 = vpack.c.bf16 %v5755_v43, %v5754_v26 }
 0x663   :  { %5012 = vmatprep.mubr.msk.f32.mxu1 %vm6077_vm2, %v6078_v41 }
 0x664   :  { %5506 = vmatpush3.bf16.msra.mxu0 %v5505_v55 }
 0x665   :  { %5513 = vmatprep.subr.bf16.mxu0 %v6076_v0 }
 0x68b   :  { %v6918_v22 = vpop.f32.mrb[20].mxu1 }
 0x68c   :  { %v4818_v56 = vpop.f32.mrb[21].mxu1 }
 0x69b   :  { %v6920_v19 = vpop.f32.mrb[22].mxu1 }
 0x69c   :  { %v4821_v40 = vpop.f32.mrb[23].mxu1 }
 0x69f   :  { %v6922_v51 = vpop.f32.mrb[24].mxu1 }
 0x6a0   :  { %v4824_v20 = vpop.f32.mrb[25].mxu1 }
 0x6a7   :  { %v6925_v57 = vpop.f32.mrb[26].mxu1 }
 0x6a8   :  { %v4827_v38 = vpop.f32.mrb[27].mxu1 }
 0x6ab   :  { %v6928_v30 = vpop.f32.mrb[28].mxu1 }
 0x6ac   :  { %v4830_v10 = vpop.f32.mrb[29].mxu1 }
 0x6af   :  { %v1027_v45 = vpop.f32.mrb[30].mxu1 }
 0x6b0   :  { %1686 = vrot.lane.b32.xlu0 %v1027_v45, %s6092_s24  ;;  %v4868_v21 = vpop.f32.mrb[31].mxu1 }
 0x6b3   :  { %v1032_v5 = vpop.f32.mrb[32].mxu1 }
 0x6b4   :  { %1688 = vrot.lane.b32.xlu0 %v1032_v5, %s6092_s24  ;;  %v4871_v4 = vpop.f32.mrb[33].mxu1 }
 0x6b7   :  { %v1037_v18 = vpop.f32.mrb[34].mxu1 }
 0x6b8   :  { %v4874_v50 = vpop.f32.mrb[35].mxu1 }
 0x6bb   :  { %v1042_v44 = vpop.f32.mrb[36].mxu1 }
 0x6bc   :  { %v4877_v15 = vpop.f32.mrb[37].mxu1 }
 0x6bf   :  { %v1047_v23 = vpop.f32.mrb[38].mxu1 }
 0x6c0   :  { %v4880_v13 = vpop.f32.mrb[39].mxu1 }
 0x6c3   :  { %v1342_v2 = vpop.f32.mrb[40].mxu1 }
 0x6c4   :  { %1706 = vrot.lane.b32.xlu1 %v1342_v2, %s6093_s1  ;;  %v4918_v63 = vpop.f32.mrb[41].mxu1 }
 0x6c8   :  { %1690 = vrot.lane.b32.xlu1 %v1037_v18, %s6092_s24 }
 0x6e8   :  { %v1347_v7 = vpop.f32.mrb[42].mxu1 }
 0x6e9   :  { %v4921_v37 = vpop.f32.mrb[43].mxu1 }
 0x6ec   :  { %v1352_v29 = vpop.f32.mrb[44].mxu1 }
 0x6ed   :  { %v4924_v27 = vpop.f32.mrb[45].mxu1 }
 0x6ee   :  { %v6984_v27 = vld [vmem:[%s8036_s5] sm:$0xff] }
 0x6f0   :  { %v1357_v36 = vpop.f32.mrb[46].mxu1 }
 0x6f1   :  { %v4927_v25 = vpop.f32.mrb[47].mxu1 }
 0x6f4   :  { %v1362_v31 = vpop.f32.mrb[48].mxu1 }
 0x6f5   :  { %v4930_v61 = vpop.f32.mrb[49].mxu1 }
 0x700   :  { %v1657_v62 = vpop.f32.mrb[40].mxu0  ;;  %v1667_v16 = vpop.f32.mrb[50].mxu1 }
 0x701   :  { %v4968_v42 = vpop.f32.mrb[41].mxu0  ;;  %1726 = vrot.lane.b32.xlu0 %v1657_v62, %s6094_s25  ;;  %1730 = vrot.lane.b32.xlu1 %v1667_v16, %s6094_s25  ;;  %v4974_v32 = vpop.f32.mrb[51].mxu1 }
 0x704   :  { %v1662_v34 = vpop.f32.mrb[42].mxu0  ;;  %v1672_v35 = vpop.f32.mrb[52].mxu1 }
 0x705   :  { %v4971_v39 = vpop.f32.mrb[43].mxu0  ;;  %1708 = vrot.lane.b32.xlu0 %v1347_v7, %s6093_s1  ;;  %1712 = vrot.lane.b32.xlu1 %v1357_v36, %s6093_s1  ;;  %v4977_v14 = vpop.f32.mrb[53].mxu1 }
 0x709   :  { %1728 = vrot.lane.b32.xlu0 %v1662_v34, %s6094_s25  ;;  %1694 = vrot.lane.b32.xlu1 %v1047_v23, %s6092_s24 }
 0x70d   :  { %1710 = vrot.lane.b32.xlu0 %v1352_v29, %s6093_s1  ;;  %v1886_v29 = vsub.s32 2, %v6343_v48 }
 0x711   :  { %1692 = vrot.lane.b32.xlu0 %v1042_v44, %s6092_s24 }
 0x715   :  { %1732 = vrot.lane.b32.xlu0 %v1672_v35, %s6094_s25 }
 0x719   :  { %1714 = vrot.lane.b32.xlu0 %v1362_v31, %s6093_s1 }
 0x722   :  { %v1687_v40 = vpop.permute.xlu0 %1686 }
 0x723   :  { %v1741_v33 = vsel %vm439_vm3, %v6918_v22, %v1687_v40 }
 0x726   :  { %v1689_v60 = vpop.permute.xlu0 %1688 }
 0x727   :  { %v1742_v26 = vsel %vm439_vm3, %v6920_v19, %v1689_v60 }
 0x735   :  { %v1677_v8 = vpop.f32.mrb[54].mxu1 }
 0x736   :  { %1734 = vrot.lane.b32.xlu1 %v1677_v8, %s6094_s25  ;;  %v4980_v56 = vpop.f32.mrb[55].mxu1  ;;  %v1707_v17 = vpop.permute.xlu1 %1706 }
 0x737   :  { %v1747_v12 = vsel %vm1746_vm11, %v1741_v33, %v1707_v17 }
 0x73a   :  { %v1691_v10 = vpop.permute.xlu1 %1690 }
 0x73b   :  { %v1743_v45 = vsel %vm439_vm3, %v6922_v51, %v1691_v10 }
 0x773   :  { %v1727_v20 = vpop.permute.xlu0 %1726  ;;  %v1731_v5 = vpop.permute.xlu1 %1730 }
 0x774   :  { %v1753_v47 = vsel %vm1752_vm12, %v1747_v12, %v1727_v20 }
 0x775   :  { %4990 = vmatmul.mubr.msk.f32.vlgmr.msra.gmra.mrb[44].mxu0 %vm234_vm1, %v1753_v47 }
 0x776   :  { %4992 = vmatprep.mubr.msk.f32.mxu0 %vm6077_vm2, %v6078_v41 }
 0x777   :  { %v1709_v43 = vpop.permute.xlu0 %1708  ;;  %v1713_v44 = vpop.permute.xlu1 %1712 }
 0x778   :  { %v1748_v55 = vsel %vm1746_vm11, %v1742_v26, %v1709_v43 }
 0x77b   :  { %v1729_v38 = vpop.permute.xlu0 %1728  ;;  %v1695_v13 = vpop.permute.xlu1 %1694 }
 0x77c   :  { %v1754_v22 = vsel %vm1752_vm12, %v1748_v55, %v1729_v38  ;;  %v1745_v63 = vsel %vm439_vm3, %v6928_v30, %v1695_v13  ;;  %v1887_v30 = vrot.slane %v6984_v27, %v1886_v29 }
 0x77d   :  { %4993 = vmatmul.mubr.msk.f32.gmra.mrb[46].mxu0 %vm234_vm1, %v1754_v22 }
 0x77e   :  { %4995 = vmatprep.mubr.msk.f32.mxu0 %vm6077_vm2, %v6078_v41 }
 0x77f   :  { %v1711_v21 = vpop.permute.xlu0 %1710 }
 0x780   :  { %v1749_v4 = vsel %vm1746_vm11, %v1743_v45, %v1711_v21 }
 0x781   :  { %v1755_v19 = vsel %vm1752_vm12, %v1749_v4, %v1731_v5 }
 0x782   :  { %4996 = vmatmul.mubr.msk.f32.gmra.mrb[48].mxu0 %vm234_vm1, %v1755_v19 }
 0x783   :  { %v1693_v18 = vpop.permute.xlu0 %1692  ;;  %4998 = vmatprep.mubr.msk.f32.mxu0 %vm6077_vm2, %v6078_v41 }
 0x784   :  { %v1744_v50 = vsel %vm439_vm3, %v6925_v57, %v1693_v18 }
 0x785   :  { %v1750_v15 = vsel %vm1746_vm11, %v1744_v50, %v1713_v44 }
 0x787   :  { %v1733_v23 = vpop.permute.xlu0 %1732 }
 0x788   :  { %v1756_v51 = vsel %vm1752_vm12, %v1750_v15, %v1733_v23 }
 0x789   :  { %4999 = vmatmul.mubr.msk.f32.gmra.mrb[50].mxu0 %vm234_vm1, %v1756_v51 }
 0x78a   :  { %5001 = vmatprep.mubr.msk.f32.mxu0 %vm6077_vm2, %v6078_v41 }
 0x78b   :  { %v1715_v2 = vpop.permute.xlu0 %1714 }
 0x78c   :  { %v1751_v7 = vsel %vm1746_vm11, %v1745_v63, %v1715_v2  ;;  %v211_v63 = vld [vmem:[%s8035_s3 + $0x8] sm:$0xff] }
 0x7a8   :  { %v1735_v37 = vpop.permute.xlu1 %1734 }
 0x7a9   :  { %v1757_v57 = vsel %vm1752_vm12, %v1751_v7, %v1735_v37  ;;  %v213_v7 = vld [vmem:[%s8035_s3 + $0x18] sm:$0xff] }
 0x7aa   :  { %5002 = vmatmul.mubr.msk.f32.gmra.mrb[52].mxu0 %vm234_vm1, %v1757_v57  ;;  %v5508_v37 = vpack.c.bf16 %v213_v7, %v211_v63  ;;  %v215_v57 = vld [vmem:[%s8035_s3 + $0x28] sm:$0xff] }
 0x7ab   :  { %5059 = vmatprep.mubr.msk.f32.mxu0 %vm6077_vm2, %v6078_v41 }
 0x7ac   :  { %5509 = vmatpush3.bf16.msra.mxu1 %v5508_v37 }
 0x7ad   :  { %5510 = vmatprep.subr.bf16.mxu1 %v6076_v0 }
 0x848   :  { %v1855_v36 = vpop.f32.mrb[44].mxu0 }
 0x849   :  { %v1879_v25 = vadd.f32 %v1855_v36, %v6254_v49  ;;  %v4991_v31 = vpop.f32.mrb[45].mxu0 }
 0x84b   :  { %v6990_v61 = vadd.f32 %v1887_v30, %v1879_v25 }
 0x84d   :  { %v1893_v62 = vsel %vm234_vm1, %v6990_v61, 0.0 }
 0x84e   :  { %1894 = vadd.xlane.f32.xlu0 %v1893_v62 }
 0x850   :  { %v1860_v16 = vpop.f32.mrb[46].mxu0 }
 0x851   :  { %v1880_v42 = vadd.f32 %v1860_v16, %v6261_v54  ;;  %v4994_v32 = vpop.f32.mrb[47].mxu0 }
 0x852   :  { %v218_v32 = vld [vmem:[%s8037_s4] sm:$0xff] }
 0x853   :  { %v6995_v34 = vadd.f32 %v1887_v30, %v1880_v42 }
 0x855   :  { %v1865_v35 = vpop.f32.mrb[48].mxu0  ;;  %v1896_v39 = vsel %vm234_vm1, %v6995_v34, 0.0 }
 0x856   :  { %v1881_v14 = vadd.f32 %v1865_v35, %v6268_v59  ;;  %v4997_v49 = vpop.f32.mrb[49].mxu0  ;;  %1897 = vadd.xlane.f32.xlu1 %v1896_v39  ;;  %v219_v35 = vld [vmem:[%s8037_s4 + $0x8] sm:$0xff]  ;;  %v220_v39 = vld [vmem:[%s8037_s4 + $0x10] sm:$0xff] }
 0x857   :  { %v221_v49 = vld [vmem:[%s8037_s4 + $0x18] sm:$0xff] }
 0x858   :  { %v7000_v8 = vadd.f32 %v1887_v30, %v1881_v14  ;;  %v5514_v14 = vpack.c.bf16 %v219_v35, %v218_v32 }
 0x85a   :  { %v1899_v56 = vsel %vm234_vm1, %v7000_v8, 0.0  ;;  %5515 = vmatpush3.bf16.msra.mxu0 %v5514_v14 }
 0x85b   :  { %1900 = vadd.xlane.f32.xlu0 %v1899_v56  ;;  %v5517_v56 = vpack.c.bf16 %v221_v49, %v220_v39  ;;  %5516 = vmatprep.subr.bf16.mxu0 %v6076_v0 }
 0x85c   :  { %v1870_v40 = vpop.f32.mrb[50].mxu0 }
 0x85d   :  { %v1882_v54 = vadd.f32 %v1870_v40, %v6275_v1  ;;  %v5000_v60 = vpop.f32.mrb[51].mxu0  ;;  %v222_v40 = vld [vmem:[%s8037_s4 + $0x20] sm:$0xff] }
 0x85e   :  { %5518 = vmatpush3.bf16.msra.mxu0 %v5517_v56  ;;  %v225_v56 = vld [vmem:[%s8037_s4 + $0x38] sm:$0xff] }
 0x85f   :  { %v7005_v17 = vadd.f32 %v1887_v30, %v1882_v54  ;;  %v223_v54 = vld [vmem:[%s8037_s4 + $0x28] sm:$0xff]  ;;  %5519 = vmatprep.subr.bf16.mxu0 %v6076_v0 }
 0x860   :  { %v5520_v60 = vpack.c.bf16 %v223_v54, %v222_v40  ;;  %v227_v54 = vld [vmem:[%s8037_s4 + $0x48] sm:$0xff] }
 0x861   :  { %v1902_v33 = vsel %vm234_vm1, %v7005_v17, 0.0 }
 0x862   :  { %1903 = vadd.xlane.f32.xlu0 %v1902_v33  ;;  %5521 = vmatpush3.bf16.msra.mxu0 %v5520_v60 }
 0x863   :  { %5522 = vmatprep.subr.bf16.mxu0 %v6076_v0 }
 0x87d   :  { %v1875_v12 = vpop.f32.mrb[52].mxu0 }
 0x87e   :  { %v1883_v59 = vadd.f32 %v1875_v12, %v6282_v6  ;;  %v5003_v20 = vpop.f32.mrb[53].mxu0 }
 0x880   :  { %v7010_v47 = vadd.f32 %v1887_v30, %v1883_v59  ;;  %v217_v30 = vld [vmem:[%s8035_s3 + $0x38] sm:$0xff] }
 0x881   :  { %v5511_v36 = vpack.c.bf16 %v217_v30, %v215_v57 }
 0x882   :  { %v1905_v43 = vsel %vm234_vm1, %v7010_v47, 0.0 }
 0x883   :  { %1906 = vadd.xlane.f32.xlu0 %v1905_v43  ;;  %5512 = vmatpush3.bf16.msra.mxu1 %v5511_v36 }
 0x884   :  { %5537 = vmatprep.subr.bf16.mxu1 %v6076_v0 }
 0x8db   :  { %v1895_v26 = vpop.xlane.xlu0 %1894 }
 0x8dc   :  { %v1908_v55 = vmul.f32 0.03125, %v1895_v26  ;;  %v1960_v26 = vsub.s32 3, %v6343_v48 }
 0x8de   :  { %v7015_v1 = vsub.f32 %v6990_v61, %v1908_v55 }
 0x8e0   :  { %v1918_v38 = vmul.f32 %v7015_v1, %v7015_v1 }
 0x8e2   :  { %v1923_v10 = vsel %vm234_vm1, %v1918_v38, 0.0  ;;  %v1969_v38 = vsub.s32 4, %v6343_v48 }
 0x8e3   :  { %1924 = vadd.xlane.f32.xlu1 %v1923_v10  ;;  %v1898_v22 = vpop.xlane.xlu1 %1897 }
 0x8e4   :  { %v1909_v6 = vmul.f32 0.03125, %v1898_v22  ;;  %v1961_v22 = vrot.slane %v6984_v27, %v1960_v26 }
 0x8e6   :  { %v7021_v45 = vsub.f32 %v6995_v34, %v1909_v6 }
 0x8e8   :  { %v1901_v21 = vpop.xlane.xlu0 %1900  ;;  %v1919_v5 = vmul.f32 %v7021_v45, %v7021_v45 }
 0x8e9   :  { %v1910_v4 = vmul.f32 0.03125, %v1901_v21 }
 0x8ea   :  { %v1926_v19 = vsel %vm234_vm1, %v1919_v5, 0.0 }
 0x8eb   :  { %v7027_v18 = vsub.f32 %v7000_v8, %v1910_v4  ;;  %1927 = vadd.xlane.f32.xlu0 %v1926_v19  ;;  %v1970_v19 = vrot.slane %v6984_v27, %v1969_v38 }
 0x8ed   :  { %v1920_v50 = vmul.f32 %v7027_v18, %v7027_v18 }
 0x8ef   :  { %v1904_v44 = vpop.xlane.xlu0 %1903  ;;  %v1929_v15 = vsel %vm234_vm1, %v1920_v50, 0.0 }
 0x8f0   :  { %v1911_v23 = vmul.f32 0.03125, %v1904_v44  ;;  %1930 = vadd.xlane.f32.xlu1 %v1929_v15 }
 0x8f2   :  { %v7033_v51 = vsub.f32 %v7005_v17, %v1911_v23 }
 0x8f4   :  { %v1921_v13 = vmul.f32 %v7033_v51, %v7033_v51 }
 0x8f6   :  { %v1932_v2 = vsel %vm234_vm1, %v1921_v13, 0.0 }
 0x8f7   :  { %1933 = vadd.xlane.f32.xlu0 %v1932_v2 }
 0x910   :  { %v1907_v25 = vpop.xlane.xlu0 %1906 }
 0x911   :  { %v1912_v31 = vmul.f32 0.03125, %v1907_v25 }
 0x913   :  { %v7053_v62 = vsub.f32 %v7010_v47, %v1912_v31 }
 0x915   :  { %v1922_v16 = vmul.f32 %v7053_v62, %v7053_v62 }
 0x917   :  { %v1935_v42 = vsel %vm234_vm1, %v1922_v16, 0.0 }
 0x918   :  { %1936 = vadd.xlane.f32.xlu1 %v1935_v42 }
 0x970   :  { %v1925_v33 = vpop.xlane.xlu1 %1924 }
 0x971   :  { %v1938_v12 = vmul.f32 0.03125, %v1925_v33  ;;  %v228_v33 = vld [vmem:[%s8037_s4 + $0x50] sm:$0xff] }
 0x973   :  { %v1943_v59 = vadd.f32 1e-05, %v1938_v12  ;;  %v229_v12 = vld [vmem:[%s8037_s4 + $0x58] sm:$0xff] }
 0x975   :  { %5936 = vrsqrt.f32 %v1943_v59  ;;  %v5529_v59 = vpack.c.bf16 %v229_v12, %v228_v33 }
 0x978   :  { %v1928_v20 = vpop.xlane.xlu0 %1927 }
 0x979   :  { %v1939_v43 = vmul.f32 0.03125, %v1928_v20  ;;  %v230_v20 = vld [vmem:[%s8037_s4 + $0x60] sm:$0xff] }
 0x97b   :  { %v1944_v55 = vadd.f32 1e-05, %v1939_v43  ;;  %v231_v43 = vld [vmem:[%s8037_s4 + $0x68] sm:$0xff] }
 0x97d   :  { %5938 = vrsqrt.f32 %v1944_v55  ;;  %v1931_v10 = vpop.xlane.xlu1 %1930  ;;  %v5532_v55 = vpack.c.bf16 %v231_v43, %v230_v20 }
 0x97e   :  { %v1940_v6 = vmul.f32 0.03125, %v1931_v10  ;;  %v232_v10 = vld [vmem:[%s8037_s4 + $0x70] sm:$0xff] }
 0x97f   :  { %v5937_v21 = vpop.eup %5936 }
 0x980   :  { %v1953_v5 = vmul.f32 %v5937_v21, %v7015_v1  ;;  %v1945_v4 = vadd.f32 1e-05, %v1940_v6  ;;  %v1978_v21 = vsub.s32 5, %v6343_v48 }
 0x982   :  { %v1962_v50 = vmul.f32 %v1961_v22, %v1953_v5  ;;  %5940 = vrsqrt.f32 %v1945_v4  ;;  %v1979_v5 = vrot.slane %v6984_v27, %v1978_v21 }
 0x984   :  { %v1934_v44 = vpop.xlane.xlu0 %1933  ;;  %v1971_v15 = vadd.f32 %v1970_v19, %v1962_v50 }
 0x985   :  { %v1941_v23 = vmul.f32 0.03125, %v1934_v44 }
 0x986   :  { %5013 = vmatmul.mubr.msk.f32.vlgmr.msra.gmra.mrb[56].mxu1 %vm234_vm1, %v1971_v15 }
 0x987   :  { %v5939_v13 = vpop.eup %5938  ;;  %v1946_v2 = vadd.f32 1e-05, %v1941_v23  ;;  %5015 = vmatprep.mubr.msk.f32.mxu1 %vm6077_vm2, %v6078_v41 }
 0x988   :  { %v1954_v63 = vmul.f32 %v5939_v13, %v7021_v45 }
 0x989   :  { %5942 = vrsqrt.f32 %v1946_v2 }
 0x98a   :  { %v1963_v1 = vmul.f32 %v1961_v22, %v1954_v63 }
 0x98c   :  { %v5941_v7 = vpop.eup %5940  ;;  %v1972_v37 = vadd.f32 %v1970_v19, %v1963_v1 }
 0x98d   :  { %v1955_v57 = vmul.f32 %v5941_v7, %v7027_v18 }
 0x98e   :  { %5016 = vmatmul.mubr.msk.f32.gmra.mrb[58].mxu1 %vm234_vm1, %v1972_v37 }
 0x98f   :  { %5018 = vmatprep.mubr.msk.f32.mxu1 %vm6077_vm2, %v6078_v41  ;;  %v1964_v30 = vmul.f32 %v1961_v22, %v1955_v57 }
 0x991   :  { %v1973_v36 = vadd.f32 %v1970_v19, %v1964_v30 }
 0x993   :  { %v5943_v25 = vpop.eup %5942  ;;  %5019 = vmatmul.mubr.msk.f32.gmra.mrb[60].mxu1 %vm234_vm1, %v1973_v36 }
 0x994   :  { %5021 = vmatprep.mubr.msk.f32.mxu1 %vm6077_vm2, %v6078_v41  ;;  %v1956_v45 = vmul.f32 %v5943_v25, %v7033_v51  ;;  %v224_v51 = vld [vmem:[%s8037_s4 + $0x30] sm:$0xff] }
 0x995   :  { %v5523_v40 = vpack.c.bf16 %v225_v56, %v224_v51 }
 0x996   :  { %v1965_v31 = vmul.f32 %v1961_v22, %v1956_v45 }
 0x997   :  { %5524 = vmatpush3.bf16.msra.mxu0 %v5523_v40 }
 0x998   :  { %v1974_v16 = vadd.f32 %v1970_v19, %v1965_v31  ;;  %5525 = vmatprep.subr.bf16.mxu0 %v6076_v0 }
 0x99a   :  { %5022 = vmatmul.mubr.msk.f32.gmra.mrb[62].mxu1 %vm234_vm1, %v1974_v16 }
 0x99b   :  { %5024 = vmatprep.mubr.msk.f32.mxu1 %vm6077_vm2, %v6078_v41 }
 0x9a5   :  { %v1937_v18 = vpop.xlane.xlu1 %1936 }
 0x9a6   :  { %v1942_v42 = vmul.f32 0.03125, %v1937_v18 }
 0x9a8   :  { %v1947_v32 = vadd.f32 1e-05, %v1942_v42 }
 0x9aa   :  { %5944 = vrsqrt.f32 %v1947_v32 }
 0x9b4   :  { %v5945_v35 = vpop.eup %5944 }
 0x9b5   :  { %v1957_v39 = vmul.f32 %v5945_v35, %v7053_v62  ;;  %v226_v62 = vld [vmem:[%s8037_s4 + $0x40] sm:$0xff] }
 0x9b6   :  { %v5526_v60 = vpack.c.bf16 %v227_v54, %v226_v62 }
 0x9b7   :  { %v1966_v14 = vmul.f32 %v1961_v22, %v1957_v39  ;;  %v233_v22 = vld [vmem:[%s8037_s4 + $0x78] sm:$0xff] }
 0x9b8   :  { %5527 = vmatpush3.bf16.msra.mxu0 %v5526_v60  ;;  %v5535_v6 = vpack.c.bf16 %v233_v22, %v232_v10 }
 0x9b9   :  { %v1975_v49 = vadd.f32 %v1970_v19, %v1966_v14  ;;  %5528 = vmatprep.subr.bf16.mxu0 %v6076_v0 }
 0x9bb   :  { %5025 = vmatmul.mubr.msk.f32.gmra.mrb[64].mxu1 %vm234_vm1, %v1975_v49 }
 0x9bc   :  { %5082 = vmatprep.mubr.msk.f32.mxu1 %vm6077_vm2, %v6078_v41  ;;  %5530 = vmatpush3.bf16.msra.mxu0 %v5529_v59 }
 0x9bd   :  { %5531 = vmatprep.subr.bf16.mxu0 %v6076_v0 }
 0x9c0   :  { %5533 = vmatpush3.bf16.msra.mxu0 %v5532_v55 }
 0x9c1   :  { %5534 = vmatprep.subr.bf16.mxu0 %v6076_v0 }
 0x9c4   :  { %5536 = vmatpush3.bf16.msra.mxu0 %v5535_v6  ;;  %v2207_v6 = vsub.s32 6, %v6343_v48 }
 0x9c5   :  { %5551 = vmatprep.subr.bf16.mxu0 %v6076_v0 }
 0xa59   :  { %v2061_v4 = vpop.f32.mrb[56].mxu1 }
 0xa5a   :  { %v2062_v19 = vadd.f32 %v2061_v4, %v1979_v5  ;;  %v5014_v50 = vpop.f32.mrb[57].mxu1  ;;  %v2208_v4 = vrot.slane %v6984_v27, %v2207_v6 }
 0xa5c   :  { %v2090_v44 = vmul.f32 0.70710677, %v2062_v19  ;;  %v2085_v57 = vmul.f32 0.5, %v2062_v19 }
 0xa5e   :  { %5946 = verf.f32 %v2090_v44 }
 0xa61   :  { %v2066_v15 = vpop.f32.mrb[58].mxu1 }
 0xa62   :  { %v2067_v23 = vadd.f32 %v2066_v15, %v1979_v5  ;;  %v5017_v13 = vpop.f32.mrb[59].mxu1 }
 0xa64   :  { %v2091_v2 = vmul.f32 0.70710677, %v2067_v23  ;;  %v2086_v32 = vmul.f32 0.5, %v2067_v23 }
 0xa66   :  { %5948 = verf.f32 %v2091_v2  ;;  %v2071_v63 = vpop.f32.mrb[60].mxu1 }
 0xa67   :  { %v2072_v1 = vadd.f32 %v2071_v63, %v1979_v5  ;;  %v5020_v7 = vpop.f32.mrb[61].mxu1 }
 0xa68   :  { %v5947_v37 = vpop.eup %5946 }
 0xa69   :  { %v2100_v30 = vadd.f32 1.0, %v5947_v37  ;;  %v2092_v36 = vmul.f32 0.70710677, %v2072_v1  ;;  %v2087_v49 = vmul.f32 0.5, %v2072_v1 }
 0xa6b   :  { %v2105_v25 = vmul.f32 %v2100_v30, %v2085_v57  ;;  %5950 = verf.f32 %v2092_v36 }
 0xa6d   :  { %v2076_v45 = vpop.f32.mrb[62].mxu1  ;;  %5060 = vmatmul.mubr.f32.vlgmr.msra.gmra.mrb[54].mxu0 %v2105_v25 }
 0xa6e   :  { %v2077_v31 = vadd.f32 %v2076_v45, %v1979_v5  ;;  %v5023_v16 = vpop.f32.mrb[63].mxu1  ;;  %5062 = vmatprep.mubr.msk.f32.mxu0 %vm6077_vm2, %v6078_v41 }
 0xa70   :  { %v5949_v18 = vpop.eup %5948  ;;  %v2093_v42 = vmul.f32 0.70710677, %v2077_v31  ;;  %v2088_v62 = vmul.f32 0.5, %v2077_v31 }
 0xa71   :  { %v2101_v35 = vadd.f32 1.0, %v5949_v18 }
 0xa72   :  { %5952 = verf.f32 %v2093_v42 }
 0xa73   :  { %v2106_v39 = vmul.f32 %v2101_v35, %v2086_v32 }
 0xa75   :  { %v5951_v14 = vpop.eup %5950  ;;  %5063 = vmatmul.mubr.f32.gmra.mrb[56].mxu0 %v2106_v39 }
 0xa76   :  { %v2102_v51 = vadd.f32 1.0, %v5951_v14  ;;  %5065 = vmatprep.mubr.msk.f32.mxu0 %vm6077_vm2, %v6078_v41 }
 0xa78   :  { %v2107_v56 = vmul.f32 %v2102_v51, %v2087_v49 }
 0xa7a   :  { %5066 = vmatmul.mubr.f32.gmra.mrb[58].mxu0 %v2107_v56 }
 0xa7b   :  { %5068 = vmatprep.mubr.msk.f32.mxu0 %vm6077_vm2, %v6078_v41 }
 0xa7c   :  { %v5953_v40 = vpop.eup %5952 }
 0xa7d   :  { %v2103_v54 = vadd.f32 1.0, %v5953_v40 }
 0xa7f   :  { %v2108_v60 = vmul.f32 %v2103_v54, %v2088_v62 }
 0xa81   :  { %5069 = vmatmul.mubr.f32.gmra.mrb[60].mxu0 %v2108_v60 }
 0xa82   :  { %5071 = vmatprep.mubr.msk.f32.mxu0 %vm6077_vm2, %v6078_v41 }
 0xa8e   :  { %v2081_v33 = vpop.f32.mrb[64].mxu1 }
 0xa8f   :  { %v2082_v12 = vadd.f32 %v2081_v33, %v1979_v5  ;;  %v5026_v59 = vpop.f32.mrb[65].mxu1 }
 0xa91   :  { %v2094_v20 = vmul.f32 0.70710677, %v2082_v12  ;;  %v2089_v55 = vmul.f32 0.5, %v2082_v12 }
 0xa93   :  { %5954 = verf.f32 %v2094_v20 }
 0xa9d   :  { %v5955_v43 = vpop.eup %5954 }
 0xa9e   :  { %v2104_v10 = vadd.f32 1.0, %v5955_v43 }
 0xaa0   :  { %v2109_v22 = vmul.f32 %v2104_v10, %v2089_v55 }
 0xaa2   :  { %5072 = vmatmul.mubr.f32.gmra.mrb[62].mxu0 %v2109_v22 }
 0xaa3   :  { %5132 = vmatprep.mubr.msk.f32.mxu0 %vm6077_vm2, %v6078_v41 }
 0xb40   :  { %v2176_v19 = vpop.f32.mrb[54].mxu0 }
 0xb41   :  { %v2200_v5 = vadd.f32 %v2176_v19, %v6990_v61  ;;  %v5061_v50 = vpop.f32.mrb[55].mxu0  ;;  %v4398_v19 = vld [vmem:[%s8035_s3 + $0x50] sm:$0xff] }
 0xb42   :  { %v4400_v50 = vld [vmem:[%s8035_s3 + $0x60] sm:$0xff] }
 0xb43   :  { %v7161_v44 = vadd.f32 %v2208_v4, %v2200_v5 }
 0xb45   :  { %v2240_v15 = vsel %vm234_vm1, %v7161_v44, 0.0 }
 0xb46   :  { %2241 = vadd.xlane.f32.xlu0 %v2240_v15  ;;  %v4402_v15 = vld [vmem:[%s8035_s3 + $0x70] sm:$0xff] }
 0xb48   :  { %v2181_v23 = vpop.f32.mrb[56].mxu0 }
 0xb49   :  { %v2201_v13 = vadd.f32 %v2181_v23, %v6995_v34  ;;  %v5064_v2 = vpop.f32.mrb[57].mxu0  ;;  %v5541_v23 = vpack.c.bf16 %v4402_v15, %v4400_v50 }
 0xb4b   :  { %v7166_v63 = vadd.f32 %v2208_v4, %v2201_v13 }
 0xb4d   :  { %v2186_v1 = vpop.f32.mrb[58].mxu0  ;;  %v2243_v7 = vsel %vm234_vm1, %v7166_v63, 0.0 }
 0xb4e   :  { %v2202_v37 = vadd.f32 %v2186_v1, %v7000_v8  ;;  %2244 = vadd.xlane.f32.xlu1 %v2243_v7  ;;  %v5067_v61 = vpop.f32.mrb[59].mxu0 }
 0xb50   :  { %v7171_v57 = vadd.f32 %v2208_v4, %v2202_v37 }
 0xb52   :  { %v2246_v30 = vsel %vm234_vm1, %v7171_v57, 0.0 }
 0xb53   :  { %2247 = vadd.xlane.f32.xlu0 %v2246_v30 }
 0xb54   :  { %v2191_v36 = vpop.f32.mrb[60].mxu0 }
 0xb55   :  { %v2203_v34 = vadd.f32 %v2191_v36, %v7005_v17  ;;  %v5070_v25 = vpop.f32.mrb[61].mxu0 }
 0xb57   :  { %v7176_v45 = vadd.f32 %v2208_v4, %v2203_v34 }
 0xb59   :  { %v2249_v31 = vsel %vm234_vm1, %v7176_v45, 0.0 }
 0xb5a   :  { %2250 = vadd.xlane.f32.xlu1 %v2249_v31  ;;  %v2307_v31 = vsub.s32 7, %v6343_v48 }
 0xb75   :  { %v2196_v16 = vpop.f32.mrb[62].mxu0 }
 0xb76   :  { %v2204_v8 = vadd.f32 %v2196_v16, %v7010_v47  ;;  %v5073_v18 = vpop.f32.mrb[63].mxu0 }
 0xb78   :  { %v7181_v42 = vadd.f32 %v2208_v4, %v2204_v8  ;;  %v4396_v4 = vld [vmem:[%s8035_s3 + $0x40] sm:$0xff]  ;;  %v64_v8 = vld [vmem:[%s8036_s5 + $0x8] sm:$0xff] }
 0xb79   :  { %v5538_v5 = vpack.c.bf16 %v4398_v19, %v4396_v4 }
 0xb7a   :  { %v2252_v32 = vsel %vm234_vm1, %v7181_v42, 0.0 }
 0xb7b   :  { %2253 = vadd.xlane.f32.xlu0 %v2252_v32  ;;  %5539 = vmatpush3.bf16.msra.mxu1 %v5538_v5  ;;  %v2308_v32 = vrot.slane %v6984_v27, %v2307_v31 }
 0xb7c   :  { %5540 = vmatprep.subr.bf16.mxu1 %v6076_v0 }
 0xb7f   :  { %5542 = vmatpush3.bf16.msra.mxu1 %v5541_v23 }
 0xb80   :  { %5543 = vmatprep.subr.bf16.mxu1 %v6076_v0 }
 0xbd3   :  { %v2242_v35 = vpop.xlane.xlu0 %2241 }
 0xbd4   :  { %v2255_v39 = vmul.f32 0.03125, %v2242_v35 }
 0xbd6   :  { %v2260_v17 = vsub.f32 %v7161_v44, %v2255_v39 }
 0xbd8   :  { %v2265_v14 = vmul.f32 %v2260_v17, %v2260_v17 }
 0xbda   :  { %v2270_v49 = vsel %vm234_vm1, %v2265_v14, 0.0  ;;  %v2317_v14 = vrot.slane %v64_v8, %v303_v53 }
 0xbdb   :  { %v2245_v51 = vpop.xlane.xlu1 %2244  ;;  %2271 = vadd.xlane.f32.xlu1 %v2270_v49 }
 0xbdc   :  { %v2256_v56 = vmul.f32 0.03125, %v2245_v51 }
 0xbde   :  { %v2261_v40 = vsub.f32 %v7166_v63, %v2256_v56 }
 0xbe0   :  { %v2248_v47 = vpop.xlane.xlu0 %2247  ;;  %v2266_v62 = vmul.f32 %v2261_v40, %v2261_v40 }
 0xbe1   :  { %v2257_v54 = vmul.f32 0.03125, %v2248_v47 }
 0xbe2   :  { %v2273_v60 = vsel %vm234_vm1, %v2266_v62, 0.0 }
 0xbe3   :  { %v2262_v33 = vsub.f32 %v7171_v57, %v2257_v54  ;;  %2274 = vadd.xlane.f32.xlu0 %v2273_v60 }
 0xbe5   :  { %v2267_v12 = vmul.f32 %v2262_v33, %v2262_v33 }
 0xbe7   :  { %v2251_v59 = vpop.xlane.xlu1 %2250  ;;  %v2276_v20 = vsel %vm234_vm1, %v2267_v12, 0.0 }
 0xbe8   :  { %v2258_v43 = vmul.f32 0.03125, %v2251_v59  ;;  %2277 = vadd.xlane.f32.xlu1 %v2276_v20 }
 0xbea   :  { %v2263_v55 = vsub.f32 %v7176_v45, %v2258_v43 }
 0xbec   :  { %v2268_v10 = vmul.f32 %v2263_v55, %v2263_v55 }
 0xbee   :  { %v2279_v22 = vsel %vm234_vm1, %v2268_v10, 0.0 }
 0xbef   :  { %2280 = vadd.xlane.f32.xlu0 %v2279_v22 }
 0xc08   :  { %v2254_v13 = vpop.xlane.xlu0 %2253 }
 0xc09   :  { %v2259_v2 = vmul.f32 0.03125, %v2254_v13 }
 0xc0b   :  { %v2264_v1 = vsub.f32 %v7181_v42, %v2259_v2 }
 0xc0d   :  { %v2269_v7 = vmul.f32 %v2264_v1, %v2264_v1 }
 0xc0f   :  { %v2282_v37 = vsel %vm234_vm1, %v2269_v7, 0.0 }
 0xc10   :  { %2283 = vadd.xlane.f32.xlu1 %v2282_v37 }
 0xc68   :  { %v2272_v61 = vpop.xlane.xlu1 %2271 }
 0xc69   :  { %v2285_v30 = vmul.f32 0.03125, %v2272_v61 }
 0xc6b   :  { %v2290_v36 = vadd.f32 1e-05, %v2285_v30 }
 0xc6d   :  { %5956 = vrsqrt.f32 %v2290_v36 }
 0xc70   :  { %v2275_v34 = vpop.xlane.xlu0 %2274 }
 0xc71   :  { %v2286_v25 = vmul.f32 0.03125, %v2275_v34 }
 0xc73   :  { %v2291_v16 = vadd.f32 1e-05, %v2286_v25 }
 0xc75   :  { %5958 = vrsqrt.f32 %v2291_v16  ;;  %v2278_v18 = vpop.xlane.xlu1 %2277 }
 0xc76   :  { %v2287_v35 = vmul.f32 0.03125, %v2278_v18 }
 0xc77   :  { %v5957_v39 = vpop.eup %5956 }
 0xc78   :  { %v2300_v49 = vmul.f32 %v5957_v39, %v2260_v17  ;;  %v2292_v51 = vadd.f32 1e-05, %v2287_v35 }
 0xc7a   :  { %v2309_v56 = vmul.f32 %v2308_v32, %v2300_v49  ;;  %5960 = vrsqrt.f32 %v2292_v51 }
 0xc7c   :  { %v2281_v47 = vpop.xlane.xlu0 %2280  ;;  %v2318_v62 = vadd.f32 %v2317_v14, %v2309_v56 }
 0xc7d   :  { %v2288_v54 = vmul.f32 0.03125, %v2281_v47 }
 0xc7e   :  { %5083 = vmatmul.mubr.msk.f32.vlgmr.msra.gmra.mrb[66].mxu1 %vm234_vm1, %v2318_v62 }
 0xc7f   :  { %v5959_v60 = vpop.eup %5958  ;;  %v2293_v12 = vadd.f32 1e-05, %v2288_v54  ;;  %5085 = vmatprep.mubr.msk.f32.mxu1 %vm6077_vm2, %v6078_v41 }
 0xc80   :  { %v2301_v27 = vmul.f32 %v5959_v60, %v2261_v40 }
 0xc81   :  { %5962 = vrsqrt.f32 %v2293_v12 }
 0xc82   :  { %v2310_v59 = vmul.f32 %v2308_v32, %v2301_v27 }
 0xc84   :  { %v5961_v20 = vpop.eup %5960  ;;  %v2319_v43 = vadd.f32 %v2317_v14, %v2310_v59 }
 0xc85   :  { %v2302_v53 = vmul.f32 %v5961_v20, %v2262_v33 }
 0xc86   :  { %5086 = vmatmul.mubr.msk.f32.gmra.mrb[68].mxu1 %vm234_vm1, %v2319_v43 }
 0xc87   :  { %5088 = vmatprep.mubr.msk.f32.mxu1 %vm6077_vm2, %v6078_v41  ;;  %v2311_v17 = vmul.f32 %v2308_v32, %v2302_v53 }
 0xc89   :  { %v2320_v10 = vadd.f32 %v2317_v14, %v2311_v17 }
 0xc8b   :  { %v5963_v22 = vpop.eup %5962  ;;  %5089 = vmatmul.mubr.msk.f32.gmra.mrb[70].mxu1 %vm234_vm1, %v2320_v10 }
 0xc8c   :  { %5091 = vmatprep.mubr.msk.f32.mxu1 %vm6077_vm2, %v6078_v41  ;;  %v2303_v4 = vmul.f32 %v5963_v22, %v2263_v55 }
 0xc8e   :  { %v2312_v40 = vmul.f32 %v2308_v32, %v2303_v4 }
 0xc90   :  { %v2321_v19 = vadd.f32 %v2317_v14, %v2312_v40 }
 0xc92   :  { %5092 = vmatmul.mubr.msk.f32.gmra.mrb[72].mxu1 %vm234_vm1, %v2321_v19 }
 0xc93   :  { %5094 = vmatprep.mubr.msk.f32.mxu1 %vm6077_vm2, %v6078_v41 }
 0xc9d   :  { %v2284_v33 = vpop.xlane.xlu1 %2283 }
 0xc9e   :  { %v2289_v5 = vmul.f32 0.03125, %v2284_v33 }
 0xca0   :  { %v2294_v50 = vadd.f32 1e-05, %v2289_v5 }
 0xca2   :  { %5964 = vrsqrt.f32 %v2294_v50 }
 0xcac   :  { %v5965_v15 = vpop.eup %5964 }
 0xcad   :  { %v2304_v23 = vmul.f32 %v5965_v15, %v2264_v1 }
 0xcaf   :  { %v2313_v13 = vmul.f32 %v2308_v32, %v2304_v23 }
 0xcb1   :  { %v2322_v2 = vadd.f32 %v2317_v14, %v2313_v13 }
 0xcb3   :  { %5095 = vmatmul.mubr.msk.f32.gmra.mrb[74].mxu1 %vm234_vm1, %v2322_v2 }
 0xcb4   :  { %5107 = vmatprep.mubr.msk.f32.mxu1 %vm6077_vm2, %v6078_v41 }
 0xd51   :  { %v7233_v55 = vpop.f32.mrb[66].mxu1 }
 0xd52   :  { %v5084_v7 = vpop.f32.mrb[67].mxu1 }
 0xd59   :  { %v7235_v37 = vpop.f32.mrb[68].mxu1 }
 0xd5a   :  { %v5087_v61 = vpop.f32.mrb[69].mxu1  ;;  %v7239_v30 = vpack.i.bf16 %v7235_v37, %v7233_v55 }
 0xd5c   :  { %5757 = vrot.lane.b32.xlu0 %v7239_v30, %s6079_s9 }
 0xd5e   :  { %v7243_v1 = vpop.f32.mrb[70].mxu1 }
 0xd5f   :  { %v5090_v36 = vpop.f32.mrb[71].mxu1 }
 0xd65   :  { %v7245_v34 = vpop.f32.mrb[72].mxu1 }
 0xd66   :  { %v5093_v25 = vpop.f32.mrb[73].mxu1  ;;  %v7249_v16 = vpack.i.bf16 %v7245_v34, %v7243_v1 }
 0xd68   :  { %5772 = vrot.lane.b32.xlu0 %v7249_v16, %s6080_s10  ;;  %5762 = vrot.lane.b32.xlu1 %v7249_v16, %s6079_s9 }
 0xd6c   :  { %5777 = vrot.lane.b32.xlu0 %v7239_v30, %s6081_s11 }
 0xd70   :  { %2740 = vrot.lane.b32.xlu0 %v7235_v37, %s6082_s12 }
 0xd74   :  { %2742 = vrot.lane.b32.xlu0 %v7243_v1, %s6082_s12 }
 0xd86   :  { %v7261_v8 = vpop.f32.mrb[74].mxu1 }
 0xd87   :  { %2746 = vrot.lane.b32.xlu0 %v7261_v8, %s6082_s12  ;;  %2441 = vrot.lane.b32.xlu1 %v7261_v8, %s6079_s9  ;;  %v5096_v18 = vpop.f32.mrb[75].mxu1 }
 0xd8b   :  { %5787 = vrot.lane.b32.xlu0 %v7239_v30, %s6083_s13  ;;  %5767 = vrot.lane.b32.xlu1 %v7239_v30, %s6080_s10 }
 0xd8f   :  { %3055 = vrot.lane.b32.xlu0 %v7235_v37, %s6084_s14  ;;  %2756 = vrot.lane.b32.xlu1 %v7261_v8, %s6080_s10 }
 0xd93   :  { %3057 = vrot.lane.b32.xlu0 %v7243_v1, %s6084_s14  ;;  %2738 = vrot.lane.b32.xlu1 %v7233_v55, %s6082_s12 }
 0xd97   :  { %3061 = vrot.lane.b32.xlu0 %v7261_v8, %s6084_s14  ;;  %5782 = vrot.lane.b32.xlu1 %v7249_v16, %s6081_s11 }
 0xd9b   :  { %3368 = vrot.lane.b32.xlu0 %v7233_v55, %s6085_s15  ;;  %2744 = vrot.lane.b32.xlu1 %v7245_v34, %s6082_s12 }
 0xd9f   :  { %3372 = vrot.lane.b32.xlu0 %v7243_v1, %s6085_s15  ;;  %3071 = vrot.lane.b32.xlu1 %v7261_v8, %s6081_s11 }
 0xda3   :  { %3376 = vrot.lane.b32.xlu0 %v7261_v8, %s6085_s15  ;;  %3053 = vrot.lane.b32.xlu1 %v7233_v55, %s6084_s14 }
 0xda7   :  { %5797 = vrot.lane.b32.xlu0 %v7239_v30, %s6086_s16  ;;  %5792 = vrot.lane.b32.xlu1 %v7249_v16, %s6083_s13 }
 0xdab   :  { %5812 = vrot.lane.b32.xlu0 %v7249_v16, %s6087_s17  ;;  %3059 = vrot.lane.b32.xlu1 %v7245_v34, %s6084_s14 }
 0xdaf   :  { %2626 = vrot.lane.b32.xlu0 %v7261_v8, %s6086_s16  ;;  %3386 = vrot.lane.b32.xlu1 %v7261_v8, %s6083_s13 }
 0xdb3   :  { %2941 = vrot.lane.b32.xlu0 %v7261_v8, %s6087_s17  ;;  %3370 = vrot.lane.b32.xlu1 %v7235_v37, %s6085_s15 }
 0xdb7   :  { %3374 = vrot.lane.b32.xlu1 %v7245_v34, %s6085_s15 }
 0xdbb   :  { %5802 = vrot.lane.b32.xlu1 %v7249_v16, %s6086_s16 }
 0xdbf   :  { %5807 = vrot.lane.b32.xlu1 %v7239_v30, %s6087_s17 }
 0xdce   :  { %v5758_v32 = vpop.permute.xlu0 %5757 }
 0xdcf   :  { %v5760_v35 = vunpack.i.h.bf16 %v5758_v32  ;;  %v5759_v39 = vunpack.i.l.bf16 %v5758_v32 }
 0xdd1   :  { %v5544_v14 = vpack.c.bf16 %v5760_v35, %v5759_v39 }
 0xdd3   :  { %5546 = vmatpush3.bf16.xpose.msk.msra.mxu1 %vm6460_vm4, %v5544_v14 }
 0xdd4   :  { %5547 = vmatprep.subr.bf16.mxu1 %v6076_v0 }
 0xdda   :  { %v5763_v49 = vpop.permute.xlu1 %5762  ;;  %v5773_v62 = vpop.permute.xlu0 %5772 }
 0xddb   :  { %v5765_v51 = vunpack.i.h.bf16 %v5763_v49  ;;  %v5764_v56 = vunpack.i.l.bf16 %v5763_v49  ;;  %v5775_v40 = vunpack.i.h.bf16 %v5773_v62  ;;  %v5774_v19 = vunpack.i.l.bf16 %v5773_v62 }
 0xddd   :  { %v5548_v47 = vpack.c.bf16 %v5765_v51, %v5764_v56  ;;  %v5562_v50 = vpack.c.bf16 %v5775_v40, %v5774_v19 }
 0xdde   :  { %v5778_v54 = vpop.permute.xlu0 %5777 }
 0xddf   :  { %5550 = vmatpush3.bf16.xpose.msk.msra.mxu1 %vm6460_vm4, %v5548_v47  ;;  %v5779_v7 = vunpack.i.l.bf16 %v5778_v54 }
 0xde0   :  { %5105 = vmatprep.subr.mxu1 %v6078_v41 }
 0xde2   :  { %v2741_v60 = vpop.permute.xlu0 %2740 }
 0xde6   :  { %v2743_v12 = vpop.permute.xlu0 %2742 }
 0xdf9   :  { %v7323_v27 = vpop.permute.xlu0 %2746  ;;  %v2442_v59 = vpop.permute.xlu1 %2441 }
 0xdfa   :  { %5106 = vmatpush3.xpose.msk.msra.mxu1 %vm439_vm3, %v2442_v59 }
 0xdfb   :  { %5557 = vmatprep.subr.bf16.mxu1 %v6076_v0 }
 0xdfd   :  { %v7327_v20 = vpop.permute.xlu0 %5787  ;;  %5108 = vmatmul.mubr.msk.f32.vlgmr.msra.gmra.mrb[76].mxu1 %vm439_vm3, %v7233_v55  ;;  %v5768_v43 = vpop.permute.xlu1 %5767  ;;  %v5780_v55 = vunpack.i.h.bf16 %v5778_v54 }
 0xdfe   :  { %v5770_v53 = vunpack.i.h.bf16 %v5768_v43  ;;  %v5769_v17 = vunpack.i.l.bf16 %v5768_v43  ;;  %5110 = vmatprep.mubr.msk.f32.mxu1 %vm6077_vm2, %v6078_v41  ;;  %v5790_v62 = vunpack.i.h.bf16 %v7327_v20  ;;  %v5789_v54 = vunpack.i.l.bf16 %v7327_v20 }
 0xe00   :  { %v5558_v10 = vpack.c.bf16 %v5770_v53, %v5769_v17 }
 0xe01   :  { %v7333_v22 = vpop.permute.xlu0 %3055  ;;  %5111 = vmatmul.mubr.msk.f32.gmra.mrb[78].mxu1 %vm439_vm3, %v7235_v37  ;;  %v2757_v4 = vpop.permute.xlu1 %2756 }
 0xe02   :  { %5560 = vmatpush3.bf16.xpose.msk.msra.mxu1 %vm6460_vm4, %v5558_v10  ;;  %5113 = vmatprep.mubr.msk.f32.mxu1 %vm6077_vm2, %v6078_v41 }
 0xe03   :  { %5561 = vmatprep.subr.bf16.mxu1 %v6076_v0 }
 0xe05   :  { %v7342_v33 = vpop.permute.xlu0 %3057  ;;  %5114 = vmatmul.mubr.msk.f32.gmra.mrb[80].mxu1 %vm439_vm3, %v7243_v1  ;;  %v2739_v5 = vpop.permute.xlu1 %2738  ;;  %v5572_v1 = vpack.c.bf16 %v5780_v55, %v5779_v7 }
 0xe06   :  { %5116 = vmatprep.mubr.msk.f32.mxu1 %vm6077_vm2, %v6078_v41 }
 0xe09   :  { %v7348_v15 = vpop.permute.xlu0 %3061  ;;  %5117 = vmatmul.mubr.msk.f32.gmra.mrb[82].mxu1 %vm439_vm3, %v7245_v34  ;;  %v5783_v23 = vpop.permute.xlu1 %5782 }
 0xe0a   :  { %5564 = vmatpush3.bf16.xpose.msk.msra.mxu1 %vm6460_vm4, %v5562_v50  ;;  %5119 = vmatprep.mubr.msk.f32.mxu1 %vm6077_vm2, %v6078_v41  ;;  %v5785_v25 = vunpack.i.h.bf16 %v5783_v23  ;;  %v5784_v18 = vunpack.i.l.bf16 %v5783_v23 }
 0xe0b   :  { %5155 = vmatprep.subr.mxu1 %v6078_v41 }
 0xe0c   :  { %v5576_v49 = vpack.c.bf16 %v5785_v25, %v5784_v18 }
 0xe0d   :  { %v7357_v13 = vpop.permute.xlu0 %3368  ;;  %5120 = vmatmul.mubr.msk.f32.gmra.mrb[84].mxu1 %vm439_vm3, %v7261_v8  ;;  %v2745_v2 = vpop.permute.xlu1 %2744 }
 0xe0e   :  { %5157 = vmatprep.mubr.msk.f32.mxu1 %vm6077_vm2, %v6078_v41 }
 0xe11   :  { %v7363_v37 = vpop.permute.xlu0 %3372  ;;  %v3072_v61 = vpop.permute.xlu1 %3071 }
 0xe12   :  { %5156 = vmatpush3.xpose.msk.msra.mxu1 %vm439_vm3, %v2757_v4 }
 0xe13   :  { %5571 = vmatprep.subr.bf16.mxu1 %v6076_v0 }
 0xe15   :  { %v7367_v36 = vpop.permute.xlu0 %3376  ;;  %v3054_v34 = vpop.permute.xlu1 %3053  ;;  %5158 = vmatmul.mubr.msk.f32.vlgmr.msra.gmra.mrb[86].mxu1 %vm439_vm3, %v2739_v5 }
 0xe16   :  { %5574 = vmatpush3.bf16.xpose.msk.msra.mxu1 %vm6460_vm4, %v5572_v1  ;;  %5160 = vmatprep.mubr.msk.f32.mxu1 %vm6077_vm2, %v6078_v41 }
 0xe17   :  { %5575 = vmatprep.subr.bf16.mxu1 %v6076_v0 }
 0xe19   :  { %v5798_v32 = vpop.permute.xlu0 %5797  ;;  %v5793_v35 = vpop.permute.xlu1 %5792  ;;  %5161 = vmatmul.mubr.msk.f32.gmra.mrb[88].mxu1 %vm439_vm3, %v2741_v60 }
 0xe1a   :  { %v5800_v39 = vunpack.i.h.bf16 %v5798_v32  ;;  %v5799_v14 = vunpack.i.l.bf16 %v5798_v32  ;;  %5163 = vmatprep.mubr.msk.f32.mxu1 %vm6077_vm2, %v6078_v41  ;;  %v5794_v20 = vunpack.i.l.bf16 %v5793_v35 }
 0xe1c   :  { %v5552_v51 = vpack.c.bf16 %v5800_v39, %v5799_v14 }
 0xe1d   :  { %v3060_v56 = vpop.permute.xlu1 %3059  ;;  %5164 = vmatmul.mubr.msk.f32.gmra.mrb[90].mxu1 %vm439_vm3, %v2743_v12  ;;  %v5586_v12 = vpack.c.bf16 %v5790_v62, %v5789_v54  ;;  %v7406_v10 = vpop.permute.xlu0 %5812 }
 0xe1e   :  { %5553 = vmatpush3.bf16.msra.mxu0 %v5552_v51  ;;  %5578 = vmatpush3.bf16.xpose.msk.msra.mxu1 %vm6460_vm4, %v5576_v49 }
 0xe1f   :  { %5166 = vmatprep.mubr.msk.f32.mxu1 %vm6077_vm2, %v6078_v41  ;;  %5205 = vmatprep.subr.mxu1 %v6078_v41 }
 0xe20   :  { %5554 = vmatprep.subr.bf16.mxu0 %v6076_v0 }
 0xe21   :  { %v3387_v47 = vpop.permute.xlu1 %3386  ;;  %5167 = vmatmul.mubr.msk.f32.gmra.mrb[92].mxu1 %vm439_vm3, %v2745_v2 }
 0xe22   :  { %5169 = vmatprep.mubr.msk.f32.mxu1 %vm6077_vm2, %v6078_v41 }
 0xe25   :  { %v3371_v60 = vpop.permute.xlu1 %3370  ;;  %5170 = vmatmul.mubr.msk.f32.gmra.mrb[94].mxu1 %vm439_vm3, %v7323_v27  ;;  %v5795_v27 = vunpack.i.h.bf16 %v5793_v35 }
 0xe26   :  { %5206 = vmatpush3.xpose.msk.msra.mxu1 %vm439_vm3, %v3072_v61  ;;  %5207 = vmatprep.mubr.msk.f32.mxu1 %vm6077_vm2, %v6078_v41 }
 0xe27   :  { %5585 = vmatprep.subr.bf16.mxu1 %v6076_v0  ;;  %v5590_v4 = vpack.c.bf16 %v5795_v27, %v5794_v20 }
 0xe29   :  { %v3375_v59 = vpop.permute.xlu1 %3374  ;;  %5208 = vmatmul.mubr.msk.f32.vlgmr.msra.gmra.mrb[96].mxu1 %vm439_vm3, %v3054_v34 }
 0xe2a   :  { %5588 = vmatpush3.bf16.xpose.msk.msra.mxu1 %vm6460_vm4, %v5586_v12  ;;  %5210 = vmatprep.mubr.msk.f32.mxu1 %vm6077_vm2, %v6078_v41 }
 0xe2b   :  { %5589 = vmatprep.subr.bf16.mxu1 %v6076_v0 }
 0xe2d   :  { %v5803_v43 = vpop.permute.xlu1 %5802  ;;  %5211 = vmatmul.mubr.msk.f32.gmra.mrb[98].mxu1 %vm439_vm3, %v7333_v22  ;;  %v2627_v22 = vpop.permute.xlu0 %2626 }
 0xe2e   :  { %v5805_v53 = vunpack.i.h.bf16 %v5803_v43  ;;  %v5804_v17 = vunpack.i.l.bf16 %v5803_v43  ;;  %5213 = vmatprep.mubr.msk.f32.mxu1 %vm6077_vm2, %v6078_v41 }
 0xe30   :  { %v5555_v40 = vpack.c.bf16 %v5805_v53, %v5804_v17 }
 0xe31   :  { %5214 = vmatmul.mubr.msk.f32.gmra.mrb[100].mxu1 %vm439_vm3, %v7342_v33 }
 0xe32   :  { %5556 = vmatpush3.bf16.msra.mxu0 %v5555_v40  ;;  %5592 = vmatpush3.bf16.xpose.msk.msra.mxu1 %vm6460_vm4, %v5590_v4 }
 0xe33   :  { %5216 = vmatprep.mubr.msk.f32.mxu1 %vm6077_vm2, %v6078_v41  ;;  %5130 = vmatprep.subr.mxu0 %v6078_v41 }
 0xe34   :  { %5255 = vmatprep.subr.mxu1 %v6078_v41 }
 0xe35   :  { %5217 = vmatmul.mubr.msk.f32.gmra.mrb[102].mxu1 %vm439_vm3, %v3060_v56 }
 0xe36   :  { %5131 = vmatpush3.msra.mxu0 %v2627_v22  ;;  %5219 = vmatprep.mubr.msk.f32.mxu1 %vm6077_vm2, %v6078_v41 }
 0xe37   :  { %5565 = vmatprep.subr.bf16.mxu0 %v6076_v0 }
 0xe39   :  { %5220 = vmatmul.mubr.msk.f32.gmra.mrb[104].mxu1 %vm439_vm3, %v7348_v15 }
 0xe3a   :  { %5256 = vmatpush3.xpose.msk.msra.mxu1 %vm439_vm3, %v3387_v47  ;;  %5257 = vmatprep.mubr.msk.f32.mxu1 %vm6077_vm2, %v6078_v41 }
 0xe3b   :  { %5599 = vmatprep.subr.bf16.mxu1 %v6076_v0 }
 0xe3d   :  { %5258 = vmatmul.mubr.msk.f32.vlgmr.msra.gmra.mrb[106].mxu1 %vm439_vm3, %v7357_v13 }
 0xe3e   :  { %5260 = vmatprep.mubr.msk.f32.mxu1 %vm6077_vm2, %v6078_v41 }
 0xe41   :  { %5261 = vmatmul.mubr.msk.f32.gmra.mrb[108].mxu1 %vm439_vm3, %v3371_v60 }
 0xe42   :  { %5263 = vmatprep.mubr.msk.f32.mxu1 %vm6077_vm2, %v6078_v41 }
 0xe45   :  { %5264 = vmatmul.mubr.msk.f32.gmra.mrb[110].mxu1 %vm439_vm3, %v7363_v37 }
 0xe46   :  { %5266 = vmatprep.mubr.msk.f32.mxu1 %vm6077_vm2, %v6078_v41 }
 0xe49   :  { %5267 = vmatmul.mubr.msk.f32.gmra.mrb[112].mxu1 %vm439_vm3, %v3375_v59 }
 0xe4a   :  { %5269 = vmatprep.mubr.msk.f32.mxu1 %vm6077_vm2, %v6078_v41 }
 0xe4d   :  { %5270 = vmatmul.mubr.msk.f32.gmra.mrb[114].mxu1 %vm439_vm3, %v7367_v36 }
 0xe4e   :  { %5305 = vmatprep.mubr.msk.f32.mxu1 %vm6077_vm2, %v6078_v41 }
 0xed0   :  { %v2529_v46 = vpop.f32.mrb[76].mxu1 }
 0xed1   :  { %v2553_v19 = vmul.f32 0.35355338, %v2529_v46  ;;  %v5109_v33 = vpop.f32.mrb[77].mxu1 }
 0xed3   :  { %v7445_v5 = vadd.f32 %v2553_v19, %v6573_v11 }
 0xed4   :  { %v2534_v50 = vpop.f32.mrb[78].mxu1 }
 0xed5   :  { %v2554_v15 = vmul.f32 0.35355338, %v2534_v50  ;;  %v5112_v23 = vpop.f32.mrb[79].mxu1  ;;  %v2563_v13 = vsel %vm560_vm6, %v7445_v5, -inf }
 0xed6   :  { %2564 = vmax.xlane.f32.xlu1 %v2563_v13 }
 0xed7   :  { %v7450_v2 = vadd.f32 %v2554_v15, %v6587_v52 }
 0xed8   :  { %v2539_v55 = vpop.f32.mrb[80].mxu1 }
 0xed9   :  { %v2555_v7 = vmul.f32 0.35355338, %v2539_v55  ;;  %v5115_v37 = vpop.f32.mrb[81].mxu1  ;;  %v2566_v61 = vsel %vm560_vm6, %v7450_v2, -inf }
 0xeda   :  { %2567 = vmax.xlane.f32.xlu0 %v2566_v61 }
 0xedb   :  { %v7455_v1 = vadd.f32 %v2555_v7, %v6598_v9 }
 0xedc   :  { %v2544_v36 = vpop.f32.mrb[82].mxu1 }
 0xedd   :  { %v2556_v34 = vmul.f32 0.35355338, %v2544_v36  ;;  %v5118_v25 = vpop.f32.mrb[83].mxu1  ;;  %v2569_v18 = vsel %vm560_vm6, %v7455_v1, -inf }
 0xede   :  { %2570 = vmax.xlane.f32.xlu0 %v2569_v18 }
 0xedf   :  { %v7460_v32 = vadd.f32 %v2556_v34, %v6608_v24 }
 0xee0   :  { %v2549_v35 = vpop.f32.mrb[84].mxu1 }
 0xee1   :  { %v2557_v39 = vmul.f32 0.35355338, %v2549_v35  ;;  %v5121_v14 = vpop.f32.mrb[85].mxu1  ;;  %v2572_v49 = vsel %vm560_vm6, %v7460_v32, -inf }
 0xee2   :  { %2573 = vmax.xlane.f32.xlu0 %v2572_v49 }
 0xee3   :  { %v7465_v51 = vadd.f32 %v2557_v39, %v6616_v28 }
 0xee5   :  { %v2575_v56 = vsel %vm560_vm6, %v7465_v51, -inf }
 0xee6   :  { %2576 = vmax.xlane.f32.xlu1 %v2575_v56 }
 0xee8   :  { %v2844_v47 = vpop.f32.mrb[86].mxu1 }
 0xee9   :  { %v2868_v62 = vmul.f32 0.35355338, %v2844_v47  ;;  %v5159_v54 = vpop.f32.mrb[87].mxu1 }
 0xeeb   :  { %v7470_v60 = vadd.f32 %v2868_v62, %v6573_v11 }
 0xeec   :  { %v2849_v12 = vpop.f32.mrb[88].mxu1 }
 0xeed   :  { %v2869_v59 = vmul.f32 0.35355338, %v2849_v12  ;;  %v5162_v27 = vpop.f32.mrb[89].mxu1  ;;  %v2878_v20 = vsel %vm560_vm6, %v7470_v60, -inf }
 0xeee   :  { %2879 = vmax.xlane.f32.xlu0 %v2878_v20 }
 0xeef   :  { %v7475_v43 = vadd.f32 %v2869_v59, %v6587_v52 }
 0xef0   :  { %v2854_v53 = vpop.f32.mrb[90].mxu1 }
 0xef1   :  { %v2870_v17 = vmul.f32 0.35355338, %v2854_v53  ;;  %v5165_v4 = vpop.f32.mrb[91].mxu1  ;;  %v2881_v40 = vsel %vm560_vm6, %v7475_v43, -inf }
 0xef2   :  { %2882 = vmax.xlane.f32.xlu1 %v2881_v40 }
 0xef3   :  { %v7480_v22 = vadd.f32 %v2870_v17, %v6598_v9 }
 0xef4   :  { %v2859_v46 = vpop.f32.mrb[92].mxu1 }
 0xef5   :  { %v2871_v19 = vmul.f32 0.35355338, %v2859_v46  ;;  %v5168_v33 = vpop.f32.mrb[93].mxu1  ;;  %v2884_v50 = vsel %vm560_vm6, %v7480_v22, -inf }
 0xef6   :  { %2885 = vmax.xlane.f32.xlu0 %v2884_v50 }
 0xef7   :  { %v7485_v15 = vadd.f32 %v2871_v19, %v6608_v24 }
 0xef8   :  { %v2864_v23 = vpop.f32.mrb[94].mxu1 }
 0xef9   :  { %v2872_v13 = vmul.f32 0.35355338, %v2864_v23  ;;  %v5171_v55 = vpop.f32.mrb[95].mxu1  ;;  %v2887_v7 = vsel %vm560_vm6, %v7485_v15, -inf }
 0xefa   :  { %2888 = vmax.xlane.f32.xlu1 %v2887_v7 }
 0xefb   :  { %v7490_v37 = vadd.f32 %v2872_v13, %v6616_v28 }
 0xefc   :  { %v3159_v61 = vpop.f32.mrb[96].mxu1 }
 0xefd   :  { %v3183_v36 = vmul.f32 0.35355338, %v3159_v61  ;;  %v5209_v34 = vpop.f32.mrb[97].mxu1  ;;  %v2890_v25 = vsel %vm560_vm6, %v7490_v37, -inf }
 0xefe   :  { %2891 = vmax.xlane.f32.xlu0 %v2890_v25 }
 0xeff   :  { %v7495_v18 = vadd.f32 %v3183_v36, %v6573_v11 }
 0xf00   :  { %v3164_v35 = vpop.f32.mrb[98].mxu1 }
 0xf01   :  { %v3184_v39 = vmul.f32 0.35355338, %v3164_v35  ;;  %v5212_v14 = vpop.f32.mrb[99].mxu1  ;;  %v3193_v49 = vsel %vm560_vm6, %v7495_v18, -inf }
 0xf02   :  { %3194 = vmax.xlane.f32.xlu1 %v3193_v49 }
 0xf03   :  { %v7500_v56 = vadd.f32 %v3184_v39, %v6587_v52 }
 0xf04   :  { %v3169_v47 = vpop.f32.mrb[100].mxu1 }
 0xf05   :  { %v3185_v62 = vmul.f32 0.35355338, %v3169_v47  ;;  %v5215_v54 = vpop.f32.mrb[101].mxu1  ;;  %v3196_v12 = vsel %vm560_vm6, %v7500_v56, -inf }
 0xf06   :  { %3197 = vmax.xlane.f32.xlu0 %v3196_v12 }
 0xf07   :  { %v7505_v59 = vadd.f32 %v3185_v62, %v6598_v9 }
 0xf08   :  { %v3174_v27 = vpop.f32.mrb[102].mxu1 }
 0xf09   :  { %v3186_v20 = vmul.f32 0.35355338, %v3174_v27  ;;  %v5218_v53 = vpop.f32.mrb[103].mxu1  ;;  %v3199_v17 = vsel %vm560_vm6, %v7505_v59, -inf }
 0xf0a   :  { %3200 = vmax.xlane.f32.xlu1 %v3199_v17 }
 0xf0b   :  { %v7510_v4 = vadd.f32 %v3186_v20, %v6608_v24 }
 0xf0c   :  { %v3179_v40 = vpop.f32.mrb[104].mxu1 }
 0xf0d   :  { %v3187_v46 = vmul.f32 0.35355338, %v3179_v40  ;;  %v5221_v19 = vpop.f32.mrb[105].mxu1  ;;  %v3202_v33 = vsel %vm560_vm6, %v7510_v4, -inf }
 0xf0e   :  { %3203 = vmax.xlane.f32.xlu0 %v3202_v33  ;;  %v7550_v19 = vpop.permute.xlu1 %5807  ;;  %v7552_v33 = vpop.permute.xlu0 %2941 }
 0xf0f   :  { %v7515_v50 = vadd.f32 %v3187_v46, %v6616_v28 }
 0xf10   :  { %v3474_v23 = vpop.f32.mrb[106].mxu1 }
 0xf11   :  { %v3498_v13 = vmul.f32 0.35355338, %v3474_v23  ;;  %v5259_v55 = vpop.f32.mrb[107].mxu1  ;;  %v3205_v7 = vsel %vm560_vm6, %v7515_v50, -inf }
 0xf12   :  { %3206 = vmax.xlane.f32.xlu1 %v3205_v7 }
 0xf13   :  { %v7520_v61 = vadd.f32 %v3498_v13, %v6573_v11 }
 0xf14   :  { %v3479_v36 = vpop.f32.mrb[108].mxu1 }
 0xf15   :  { %v3499_v34 = vmul.f32 0.35355338, %v3479_v36  ;;  %v5262_v25 = vpop.f32.mrb[109].mxu1  ;;  %v3508_v35 = vsel %vm560_vm6, %v7520_v61, -inf }
 0xf16   :  { %3509 = vmax.xlane.f32.xlu0 %v3508_v35 }
 0xf17   :  { %v7525_v39 = vadd.f32 %v3499_v34, %v6587_v52 }
 0xf18   :  { %v3484_v14 = vpop.f32.mrb[110].mxu1 }
 0xf19   :  { %v3500_v49 = vmul.f32 0.35355338, %v3484_v14  ;;  %v5265_v47 = vpop.f32.mrb[111].mxu1  ;;  %v3511_v62 = vsel %vm560_vm6, %v7525_v39, -inf }
 0xf1a   :  { %3512 = vmax.xlane.f32.xlu1 %v3511_v62 }
 0xf1b   :  { %v7530_v11 = vadd.f32 %v3500_v49, %v6598_v9 }
 0xf1c   :  { %v3489_v54 = vpop.f32.mrb[112].mxu1 }
 0xf1d   :  { %v3501_v12 = vmul.f32 0.35355338, %v3489_v54  ;;  %v5268_v27 = vpop.f32.mrb[113].mxu1  ;;  %v3514_v20 = vsel %vm560_vm6, %v7530_v11, -inf }
 0xf1e   :  { %3515 = vmax.xlane.f32.xlu0 %v3514_v20 }
 0xf1f   :  { %v7535_v52 = vadd.f32 %v3501_v12, %v6608_v24 }
 0xf20   :  { %v3494_v53 = vpop.f32.mrb[114].mxu1 }
 0xf21   :  { %v5271_v17 = vpop.f32.mrb[115].mxu1  ;;  %v3517_v40 = vsel %vm560_vm6, %v7535_v52, -inf  ;;  %v3502_v9 = vmul.f32 0.35355338, %v3494_v53 }
 0xf22   :  { %3518 = vmax.xlane.f32.xlu1 %v3517_v40 }
 0xf23   :  { %v7546_v46 = vadd.f32 %v3502_v9, %v6616_v28 }
 0xf25   :  { %v3520_v24 = vsel %vm560_vm6, %v7546_v46, -inf }
 0xf33   :  { %5817 = vrot.lane.b32.xlu1 %v7239_v30, %s6089_s18 }
 0xf34   :  { %5822 = vrot.lane.b32.xlu0 %v7249_v16, %s6089_s18 }
 0xf38   :  { %3256 = vrot.lane.b32.xlu0 %v7261_v8, %s6089_s18 }
 0xf57   :  { %3521 = vmax.xlane.f32.xlu0 %v3520_v24 }
 0xf63   :  { %v2565_v23 = vpop.xlane.xlu1 %2564 }
 0xf64   :  { %v2578_v13 = vsub.f32 %v7445_v5, %v2565_v23 }
 0xf66   :  { %v2583_v55 = vmul.f32 1.442695, %v2578_v13 }
 0xf67   :  { %v2568_v7 = vpop.xlane.xlu0 %2567 }
 0xf68   :  { %5966 = vpow2.f32 %v2583_v55  ;;  %v2579_v36 = vsub.f32 %v7450_v2, %v2568_v7 }
 0xf6a   :  { %v2585_v34 = vmul.f32 1.442695, %v2579_v36 }
 0xf6b   :  { %v2571_v25 = vpop.xlane.xlu0 %2570 }
 0xf6c   :  { %5968 = vpow2.f32 %v2585_v34  ;;  %v2580_v28 = vsub.f32 %v7455_v1, %v2571_v25 }
 0xf6e   :  { %v2587_v35 = vmul.f32 1.442695, %v2580_v28 }
 0xf6f   :  { %v2574_v14 = vpop.xlane.xlu0 %2573 }
 0xf70   :  { %5970 = vpow2.f32 %v2587_v35  ;;  %v2581_v49 = vsub.f32 %v7460_v32, %v2574_v14 }
 0xf72   :  { %v7558_v47 = vpop.eup %5966  ;;  %v2589_v62 = vmul.f32 1.442695, %v2581_v49 }
 0xf73   :  { %v2577_v54 = vpop.xlane.xlu1 %2576  ;;  %v2593_v5 = vsel %vm560_vm6, %v7558_v47, 0.0 }
 0xf74   :  { %5972 = vpow2.f32 %v2589_v62  ;;  %v2582_v2 = vsub.f32 %v7465_v51, %v2577_v54  ;;  %2594 = vadd.xlane.f32.xlu1 %v2593_v5 }
 0xf76   :  { %v7563_v12 = vpop.eup %5968  ;;  %v2591_v27 = vmul.f32 1.442695, %v2582_v2 }
 0xf77   :  { %v2596_v1 = vsel %vm560_vm6, %v7563_v12, 0.0 }
 0xf78   :  { %5974 = vpow2.f32 %v2591_v27  ;;  %2597 = vadd.xlane.f32.xlu0 %v2596_v1 }
 0xf7a   :  { %v7567_v32 = vpop.eup %5970 }
 0xf7b   :  { %v2880_v20 = vpop.xlane.xlu0 %2879  ;;  %v2599_v53 = vsel %vm560_vm6, %v7567_v32, 0.0 }
 0xf7c   :  { %v2893_v17 = vsub.f32 %v7470_v60, %v2880_v20  ;;  %2600 = vadd.xlane.f32.xlu1 %v2599_v53 }
 0xf7e   :  { %v7572_v40 = vpop.eup %5972  ;;  %v2898_v51 = vmul.f32 1.442695, %v2893_v17 }
 0xf7f   :  { %v2883_v9 = vpop.xlane.xlu1 %2882  ;;  %v2602_v24 = vsel %vm560_vm6, %v7572_v40, 0.0 }
 0xf80   :  { %5976 = vpow2.f32 %v2898_v51  ;;  %v2894_v23 = vsub.f32 %v7475_v43, %v2883_v9  ;;  %2603 = vadd.xlane.f32.xlu0 %v2602_v24 }
 0xf82   :  { %v7577_v13 = vpop.eup %5974  ;;  %v2900_v55 = vmul.f32 1.442695, %v2894_v23 }
 0xf83   :  { %v2886_v7 = vpop.xlane.xlu0 %2885  ;;  %v2605_v36 = vsel %vm560_vm6, %v7577_v13, 0.0 }
 0xf84   :  { %5978 = vpow2.f32 %v2900_v55  ;;  %v2895_v60 = vsub.f32 %v7480_v22, %v2886_v7  ;;  %2606 = vadd.xlane.f32.xlu1 %v2605_v36 }
 0xf86   :  { %v2902_v34 = vmul.f32 1.442695, %v2895_v60 }
 0xf87   :  { %v2889_v25 = vpop.xlane.xlu1 %2888 }
 0xf88   :  { %5980 = vpow2.f32 %v2902_v34  ;;  %v2896_v28 = vsub.f32 %v7485_v15, %v2889_v25 }
 0xf8a   :  { %v7583_v35 = vpop.eup %5976  ;;  %v2904_v43 = vmul.f32 1.442695, %v2896_v28 }
 0xf8b   :  { %v2892_v14 = vpop.xlane.xlu0 %2891  ;;  %v2908_v49 = vsel %vm560_vm6, %v7583_v35, 0.0 }
 0xf8c   :  { %5982 = vpow2.f32 %v2904_v43  ;;  %v2897_v62 = vsub.f32 %v7490_v37, %v2892_v14  ;;  %2909 = vadd.xlane.f32.xlu1 %v2908_v49 }
 0xf8e   :  { %v7588_v54 = vpop.eup %5978  ;;  %v2906_v22 = vmul.f32 1.442695, %v2897_v62 }
 0xf8f   :  { %v3195_v5 = vpop.xlane.xlu1 %3194  ;;  %v2911_v2 = vsel %vm560_vm6, %v7588_v54, 0.0 }
 0xf90   :  { %5984 = vpow2.f32 %v2906_v22  ;;  %v3208_v15 = vsub.f32 %v7495_v18, %v3195_v5  ;;  %2912 = vadd.xlane.f32.xlu0 %v2911_v2 }
 0xf92   :  { %v7593_v27 = vpop.eup %5980  ;;  %v3213_v1 = vmul.f32 1.442695, %v3208_v15 }
 0xf93   :  { %v3198_v20 = vpop.xlane.xlu0 %3197  ;;  %v2914_v53 = vsel %vm560_vm6, %v7593_v27, 0.0 }
 0xf94   :  { %5986 = vpow2.f32 %v3213_v1  ;;  %v3209_v37 = vsub.f32 %v7500_v56, %v3198_v20  ;;  %2915 = vadd.xlane.f32.xlu1 %v2914_v53 }
 0xf96   :  { %v7598_v17 = vpop.eup %5982  ;;  %v3215_v51 = vmul.f32 1.442695, %v3209_v37 }
 0xf97   :  { %v3201_v9 = vpop.xlane.xlu1 %3200  ;;  %v2917_v24 = vsel %vm560_vm6, %v7598_v17, 0.0 }
 0xf98   :  { %5988 = vpow2.f32 %v3215_v51  ;;  %v3210_v18 = vsub.f32 %v7505_v59, %v3201_v9  ;;  %2918 = vadd.xlane.f32.xlu1 %v2917_v24 }
 0xf9a   :  { %v7603_v23 = vpop.eup %5984  ;;  %v3217_v55 = vmul.f32 1.442695, %v3210_v18 }
 0xf9b   :  { %v3204_v7 = vpop.xlane.xlu0 %3203  ;;  %v2920_v36 = vsel %vm560_vm6, %v7603_v23, 0.0 }
 0xf9c   :  { %5990 = vpow2.f32 %v3217_v55  ;;  %v3211_v56 = vsub.f32 %v7510_v4, %v3204_v7  ;;  %2921 = vadd.xlane.f32.xlu1 %v2920_v36 }
 0xf9e   :  { %v7608_v60 = vpop.eup %5986  ;;  %v3219_v34 = vmul.f32 1.442695, %v3211_v56 }
 0xf9f   :  { %v3207_v25 = vpop.xlane.xlu1 %3206  ;;  %v3223_v28 = vsel %vm560_vm6, %v7608_v60, 0.0 }
 0xfa0   :  { %5992 = vpow2.f32 %v3219_v34  ;;  %v3212_v59 = vsub.f32 %v7515_v50, %v3207_v25  ;;  %3224 = vadd.xlane.f32.xlu0 %v3223_v28 }
 0xfa2   :  { %v7613_v43 = vpop.eup %5988  ;;  %v3221_v14 = vmul.f32 1.442695, %v3212_v59 }
 0xfa3   :  { %v3226_v49 = vsel %vm560_vm6, %v7613_v43, 0.0  ;;  %v3510_v62 = vpop.xlane.xlu0 %3509 }
 0xfa4   :  { %5994 = vpow2.f32 %v3221_v14  ;;  %3227 = vadd.xlane.f32.xlu1 %v3226_v49 }
 0xfa6   :  { %v7617_v4 = vpop.eup %5990 }
 0xfa7   :  { %v3513_v22 = vpop.xlane.xlu1 %3512  ;;  %v3229_v5 = vsel %vm560_vm6, %v7617_v4, 0.0 }
 0xfa8   :  { %v3524_v2 = vsub.f32 %v7525_v39, %v3513_v22  ;;  %3230 = vadd.xlane.f32.xlu1 %v3229_v5 }
 0xfaa   :  { %v7622_v50 = vpop.eup %5992  ;;  %v3530_v15 = vmul.f32 1.442695, %v3524_v2 }
 0xfab   :  { %v3516_v1 = vpop.xlane.xlu0 %3515  ;;  %v3232_v20 = vsel %vm560_vm6, %v7622_v50, 0.0 }
 0xfac   :  { %5996 = vpow2.f32 %v3530_v15  ;;  %v3525_v53 = vsub.f32 %v7530_v11, %v3516_v1  ;;  %3233 = vadd.xlane.f32.xlu1 %v3232_v20  ;;  %v5810_v20 = vunpack.i.h.bf16 %v7550_v19 }
 0xfae   :  { %v7627_v37 = vpop.eup %5994  ;;  %v3532_v51 = vmul.f32 1.442695, %v3525_v53  ;;  %v5809_v53 = vunpack.i.l.bf16 %v7550_v19 }
 0xfaf   :  { %v3519_v9 = vpop.xlane.xlu1 %3518  ;;  %v3235_v24 = vsel %vm560_vm6, %v7627_v37, 0.0  ;;  %v7651_v59 = vpop.permute.xlu0 %5822 }
 0xfb0   :  { %5998 = vpow2.f32 %v3532_v51  ;;  %v3526_v39 = vsub.f32 %v7535_v52, %v3519_v9  ;;  %3236 = vadd.xlane.f32.xlu1 %v3235_v24  ;;  %v3523_v52 = vsub.f32 %v7520_v61, %v3510_v62  ;;  %v5815_v24 = vunpack.i.h.bf16 %v7406_v10 }
 0xfb2   :  { %v3534_v18 = vmul.f32 1.442695, %v3526_v39  ;;  %v3528_v25 = vmul.f32 1.442695, %v3523_v52  ;;  %v5814_v39 = vunpack.i.l.bf16 %v7406_v10 }
 0xfb3   :  { %v7653_v14 = vpop.permute.xlu0 %3256  ;;  %v5818_v2 = vpop.permute.xlu1 %5817 }
 0xfb4   :  { %6000 = vpow2.f32 %v3534_v18  ;;  %v5566_v18 = vpack.c.bf16 %v5810_v20, %v5809_v53 }
 0xfb5   :  { %6002 = vpow2.f32 %v3528_v25 }
 0xfb6   :  { %v7632_v55 = vpop.eup %5996  ;;  %5827 = vrot.lane.b32.xlu0 %v7239_v30, %s6090_s19 }
 0xfb7   :  { %v3541_v11 = vsel %vm560_vm6, %v7632_v55, 0.0 }
 0xfb8   :  { %3542 = vadd.xlane.f32.xlu1 %v3541_v11 }
 0xfba   :  { %v7638_v7 = vpop.eup %5998 }
 0xfbb   :  { %v3544_v36 = vsel %vm560_vm6, %v7638_v7, 0.0 }
 0xfbc   :  { %3545 = vadd.xlane.f32.xlu1 %v3544_v36 }
 0xfbe   :  { %v7642_v56 = vpop.eup %6000 }
 0xfbf   :  { %v3547_v34 = vsel %vm560_vm6, %v7642_v56, 0.0  ;;  %v7647_v30 = vpop.eup %6002 }
 0xfc0   :  { %3548 = vadd.xlane.f32.xlu1 %v3547_v34  ;;  %v3538_v28 = vsel %vm560_vm6, %v7647_v30, 0.0 }
 0xfd5   :  { %3539 = vadd.xlane.f32.xlu0 %v3538_v28 }
 0xfe4   :  { %v3522_v49 = vpop.xlane.xlu0 %3521 }
 0xfe5   :  { %v3527_v22 = vsub.f32 %v7546_v46, %v3522_v49  ;;  %v5819_v49 = vunpack.i.l.bf16 %v5818_v2 }
 0xfe7   :  { %v3536_v61 = vmul.f32 1.442695, %v3527_v22 }
 0xfe9   :  { %6004 = vpow2.f32 %v3536_v61 }
 0xfeb   :  { %5832 = vrot.lane.b32.xlu0 %v7249_v16, %s6090_s19 }
 0xff3   :  { %v7658_v62 = vpop.eup %6004 }
 0xff4   :  { %v3550_v5 = vsel %vm560_vm6, %v7658_v62, 0.0 }
 0xff5   :  { %3551 = vadd.xlane.f32.xlu1 %v3550_v5 }
0x1001   :  { %v2595_v15 = vpop.xlane.xlu1 %2594 }
0x1002   :  { %6006 = vrcp.f32 %v2595_v15  ;;  %v5825_v15 = vunpack.i.h.bf16 %v7651_v59 }
0x1005   :  { %v2598_v1 = vpop.xlane.xlu0 %2597 }
0x1006   :  { %6008 = vrcp.f32 %v2598_v1  ;;  %3571 = vrot.lane.b32.xlu1 %v7261_v8, %s6090_s19  ;;  %v5824_v1 = vunpack.i.l.bf16 %v7651_v59 }
0x1009   :  { %v2601_v46 = vpop.xlane.xlu1 %2600 }
0x100a   :  { %6010 = vrcp.f32 %v2601_v46 }
0x100c   :  { %v6007_v16 = vpop.eup %6006 }
0x100d   :  { %v2609_v51 = vmul.f32 %v6007_v16, %v7558_v47  ;;  %v2604_v9 = vpop.xlane.xlu0 %2603  ;;  %v5569_v47 = vpack.c.bf16 %v5815_v24, %v5814_v39 }
0x100e   :  { %6012 = vrcp.f32 %v2604_v9 }
0x100f   :  { %5133 = vmatmul.mubr.msk.f32.vlgmr.msra.gmra.mrb[64].mxu0 %vm560_vm6, %v2609_v51 }
0x1010   :  { %v6009_v11 = vpop.eup %6008  ;;  %5567 = vmatpush3.bf16.msra.mxu0 %v5566_v18  ;;  %5135 = vmatprep.mubr.msk.f32.mxu0 %vm6077_vm2, %v6078_v41 }
0x1011   :  { %v2607_v8 = vpop.xlane.xlu1 %2606  ;;  %5568 = vmatprep.subr.bf16.mxu0 %v6076_v0  ;;  %v2611_v19 = vmul.f32 %v6009_v11, %v7563_v12 }
0x1012   :  { %6014 = vrcp.f32 %v2607_v8 }
0x1013   :  { %5136 = vmatmul.mubr.msk.f32.gmra.mrb[66].mxu0 %vm560_vm6, %v2611_v19 }
0x1014   :  { %v6011_v36 = vpop.eup %6010  ;;  %5570 = vmatpush3.bf16.msra.mxu0 %v5569_v47  ;;  %5138 = vmatprep.mubr.msk.f32.mxu0 %vm6077_vm2, %v6078_v41 }
0x1015   :  { %5180 = vmatprep.subr.mxu0 %v6078_v41  ;;  %v2613_v10 = vmul.f32 %v6011_v36, %v7567_v32 }
0x1017   :  { %5139 = vmatmul.mubr.msk.f32.gmra.mrb[68].mxu0 %vm560_vm6, %v2613_v10 }
0x1018   :  { %v6013_v52 = vpop.eup %6012  ;;  %5181 = vmatpush3.msra.mxu0 %v7552_v33  ;;  %5141 = vmatprep.mubr.msk.f32.mxu0 %vm6077_vm2, %v6078_v41 }
0x1019   :  { %v2910_v12 = vpop.xlane.xlu1 %2909  ;;  %v2615_v34 = vmul.f32 %v6013_v52, %v7572_v40  ;;  %5579 = vmatprep.subr.bf16.mxu0 %v6076_v0  ;;  %v5820_v40 = vunpack.i.h.bf16 %v5818_v2 }
0x101a   :  { %6016 = vrcp.f32 %v2910_v12 }
0x101b   :  { %5142 = vmatmul.mubr.msk.f32.gmra.mrb[70].mxu0 %vm560_vm6, %v2615_v34  ;;  %v5580_v46 = vpack.c.bf16 %v5820_v40, %v5819_v49  ;;  %v6071_v49 = vld [vmem:[%s8035_s3 + $0x40] sm:$0xff] }
0x101c   :  { %v6015_v25 = vpop.eup %6014  ;;  %5144 = vmatprep.mubr.msk.f32.mxu0 %vm6077_vm2, %v6078_v41 }
0x101d   :  { %v2913_v32 = vpop.xlane.xlu0 %2912  ;;  %v2617_v28 = vmul.f32 %v6015_v25, %v7577_v13 }
0x101e   :  { %6018 = vrcp.f32 %v2913_v32 }
0x101f   :  { %5145 = vmatmul.mubr.msk.f32.gmra.mrb[72].mxu0 %vm560_vm6, %v2617_v28 }
0x1020   :  { %5182 = vmatprep.mubr.msk.f32.mxu0 %vm6077_vm2, %v6078_v41 }
0x1021   :  { %v2916_v33 = vpop.xlane.xlu1 %2915 }
0x1022   :  { %6020 = vrcp.f32 %v2916_v33 }
0x1024   :  { %v6017_v22 = vpop.eup %6016 }
0x1025   :  { %v2924_v61 = vmul.f32 %v6017_v22, %v7583_v35  ;;  %v2919_v5 = vpop.xlane.xlu1 %2918  ;;  %v5583_v35 = vpack.c.bf16 %v5825_v15, %v5824_v1 }
0x1026   :  { %6022 = vrcp.f32 %v2919_v5  ;;  %v6074_v5 = vld [vmem:[%s8035_s3 + $0x70] sm:$0xff] }
0x1027   :  { %5183 = vmatmul.mubr.msk.f32.vlgmr.msra.gmra.mrb[74].mxu0 %vm560_vm6, %v2924_v61  ;;  %v6073_v61 = vld [vmem:[%s8035_s3 + $0x60] sm:$0xff] }
0x1028   :  { %v6019_v13 = vpop.eup %6018  ;;  %5581 = vmatpush3.bf16.msra.mxu0 %v5580_v46  ;;  %5185 = vmatprep.mubr.msk.f32.mxu0 %vm6077_vm2, %v6078_v41  ;;  %v5841_v15 = vpack.i.bf16 %v6074_v5, %v6073_v61 }
0x1029   :  { %v2922_v20 = vpop.xlane.xlu1 %2921  ;;  %5582 = vmatprep.subr.bf16.mxu0 %v6076_v0  ;;  %v2926_v2 = vmul.f32 %v6019_v13, %v7588_v54 }
0x102a   :  { %6024 = vrcp.f32 %v2922_v20 }
0x102b   :  { %5186 = vmatmul.mubr.msk.f32.gmra.mrb[76].mxu0 %vm560_vm6, %v2926_v2 }
0x102c   :  { %v6021_v53 = vpop.eup %6020  ;;  %5584 = vmatpush3.bf16.msra.mxu0 %v5583_v35  ;;  %5188 = vmatprep.mubr.msk.f32.mxu0 %vm6077_vm2, %v6078_v41 }
0x102d   :  { %v3225_v59 = vpop.xlane.xlu0 %3224  ;;  %5230 = vmatprep.subr.mxu0 %v6078_v41  ;;  %v2928_v16 = vmul.f32 %v6021_v53, %v7593_v27 }
0x102e   :  { %6026 = vrcp.f32 %v3225_v59 }
0x102f   :  { %5189 = vmatmul.mubr.msk.f32.gmra.mrb[78].mxu0 %vm560_vm6, %v2928_v16 }
0x1030   :  { %v6023_v51 = vpop.eup %6022  ;;  %5231 = vmatpush3.msra.mxu0 %v7653_v14  ;;  %5191 = vmatprep.mubr.msk.f32.mxu0 %vm6077_vm2, %v6078_v41 }
0x1031   :  { %v3228_v54 = vpop.xlane.xlu1 %3227  ;;  %v2930_v9 = vmul.f32 %v6023_v51, %v7598_v17  ;;  %5593 = vmatprep.subr.bf16.mxu0 %v6076_v0  ;;  %v5828_v24 = vpop.permute.xlu0 %5827 }
0x1032   :  { %6028 = vrcp.f32 %v3228_v54  ;;  %v5830_v14 = vunpack.i.h.bf16 %v5828_v24  ;;  %v5829_v11 = vunpack.i.l.bf16 %v5828_v24 }
0x1033   :  { %5192 = vmatmul.mubr.msk.f32.gmra.mrb[80].mxu0 %vm560_vm6, %v2930_v9 }
0x1034   :  { %v6025_v39 = vpop.eup %6024  ;;  %5194 = vmatprep.mubr.msk.f32.mxu0 %vm6077_vm2, %v6078_v41  ;;  %v5594_v47 = vpack.c.bf16 %v5830_v14, %v5829_v11 }
0x1035   :  { %v3231_v27 = vpop.xlane.xlu1 %3230  ;;  %v2932_v18 = vmul.f32 %v6025_v39, %v7603_v23 }
0x1036   :  { %6030 = vrcp.f32 %v3231_v27 }
0x1037   :  { %5195 = vmatmul.mubr.msk.f32.gmra.mrb[82].mxu0 %vm560_vm6, %v2932_v18 }
0x1038   :  { %v6027_v8 = vpop.eup %6026  ;;  %5232 = vmatprep.mubr.msk.f32.mxu0 %vm6077_vm2, %v6078_v41 }
0x1039   :  { %v3239_v17 = vmul.f32 %v6027_v8, %v7608_v60  ;;  %v3234_v19 = vpop.xlane.xlu1 %3233 }
0x103a   :  { %6032 = vrcp.f32 %v3234_v19 }
0x103b   :  { %5233 = vmatmul.mubr.msk.f32.vlgmr.msra.gmra.mrb[84].mxu0 %vm560_vm6, %v3239_v17 }
0x103c   :  { %v6029_v36 = vpop.eup %6028  ;;  %5595 = vmatpush3.bf16.msra.mxu0 %v5594_v47  ;;  %5235 = vmatprep.mubr.msk.f32.mxu0 %vm6077_vm2, %v6078_v41 }
0x103d   :  { %v3237_v23 = vpop.xlane.xlu1 %3236  ;;  %v3241_v10 = vmul.f32 %v6029_v36, %v7613_v43  ;;  %5596 = vmatprep.subr.bf16.mxu0 %v6076_v0 }
0x103e   :  { %6034 = vrcp.f32 %v3237_v23 }
0x103f   :  { %5236 = vmatmul.mubr.msk.f32.gmra.mrb[86].mxu0 %vm560_vm6, %v3241_v10 }
0x1040   :  { %v6031_v52 = vpop.eup %6030  ;;  %5238 = vmatprep.mubr.msk.f32.mxu0 %vm6077_vm2, %v6078_v41 }
0x1041   :  { %v3243_v60 = vmul.f32 %v6031_v52, %v7617_v4 }
0x1043   :  { %5239 = vmatmul.mubr.msk.f32.gmra.mrb[88].mxu0 %vm560_vm6, %v3243_v60 }
0x1044   :  { %v6033_v12 = vpop.eup %6032  ;;  %5241 = vmatprep.mubr.msk.f32.mxu0 %vm6077_vm2, %v6078_v41 }
0x1045   :  { %v3245_v34 = vmul.f32 %v6033_v12, %v7622_v50  ;;  %v3543_v50 = vpop.xlane.xlu1 %3542 }
0x1047   :  { %5242 = vmatmul.mubr.msk.f32.gmra.mrb[90].mxu0 %vm560_vm6, %v3245_v34 }
0x1048   :  { %v6035_v43 = vpop.eup %6034  ;;  %5244 = vmatprep.mubr.msk.f32.mxu0 %vm6077_vm2, %v6078_v41 }
0x1049   :  { %v3247_v25 = vmul.f32 %v6035_v43, %v7627_v37  ;;  %v6072_v37 = vld [vmem:[%s8035_s3 + $0x50] sm:$0xff]  ;;  %v3546_v1 = vpop.xlane.xlu1 %3545 }
0x104a   :  { %v5836_v22 = vpack.i.bf16 %v6072_v37, %v6071_v49 }
0x104b   :  { %5245 = vmatmul.mubr.msk.f32.gmra.mrb[92].mxu0 %vm560_vm6, %v3247_v25 }
0x104c   :  { %5282 = vmatprep.mubr.msk.f32.mxu0 %vm6077_vm2, %v6078_v41  ;;  %5837 = vrot.lane.b32.xlu0 %v5836_v22, %s6091_s0 }
0x104d   :  { %v3549_v46 = vpop.xlane.xlu1 %3548 }
0x1050   :  { %5842 = vrot.lane.b32.xlu0 %v5841_v15, %s6091_s0 }
0x1062   :  { %v3540_v4 = vpop.xlane.xlu0 %3539 }
0x1063   :  { %6036 = vrcp.f32 %v3540_v4 }
0x1064   :  { %6038 = vrcp.f32 %v3543_v50 }
0x1065   :  { %6040 = vrcp.f32 %v3546_v1 }
0x1066   :  { %v5833_v32 = vpop.permute.xlu0 %5832  ;;  %6042 = vrcp.f32 %v3549_v46 }
0x1067   :  { %v5835_v28 = vunpack.i.h.bf16 %v5833_v32  ;;  %v5834_v33 = vunpack.i.l.bf16 %v5833_v32 }
0x1069   :  { %v5597_v40 = vpack.c.bf16 %v5835_v28, %v5834_v33 }
0x106b   :  { %5598 = vmatpush3.bf16.msra.mxu0 %v5597_v40 }
0x106c   :  { %5280 = vmatprep.subr.mxu0 %v6078_v41 }
0x106d   :  { %v6037_v20 = vpop.eup %6036 }
0x106e   :  { %v3554_v2 = vmul.f32 %v6037_v20, %v7647_v30  ;;  %v6039_v53 = vpop.eup %6038 }
0x106f   :  { %v3556_v59 = vmul.f32 %v6039_v53, %v7632_v55  ;;  %v6041_v16 = vpop.eup %6040 }
0x1070   :  { %v3558_v30 = vmul.f32 %v6041_v16, %v7638_v7  ;;  %v6043_v51 = vpop.eup %6042 }
0x1071   :  { %v3560_v54 = vmul.f32 %v6043_v51, %v7642_v56 }
0x1082   :  { %v3552_v13 = vpop.xlane.xlu1 %3551 }
0x1083   :  { %6044 = vrcp.f32 %v3552_v13 }
0x1086   :  { %v3572_v35 = vpop.permute.xlu1 %3571 }
0x1087   :  { %5281 = vmatpush3.msra.mxu0 %v3572_v35 }
0x1088   :  { %5283 = vmatmul.mubr.msk.f32.vlgmr.msra.gmra.mrb[94].mxu0 %vm560_vm6, %v3554_v2  ;;  %5605 = vmatprep.subr.bf16.mxu0 %v6076_v0 }
0x1089   :  { %5285 = vmatprep.mubr.msk.f32.mxu0 %vm6077_vm2, %v6078_v41 }
0x108c   :  { %5286 = vmatmul.mubr.msk.f32.gmra.mrb[96].mxu0 %vm560_vm6, %v3556_v59 }
0x108d   :  { %5288 = vmatprep.mubr.msk.f32.mxu0 %vm6077_vm2, %v6078_v41  ;;  %v6045_v9 = vpop.eup %6044 }
0x108e   :  { %v3562_v55 = vmul.f32 %v6045_v9, %v7658_v62 }
0x1090   :  { %5289 = vmatmul.mubr.msk.f32.gmra.mrb[98].mxu0 %vm560_vm6, %v3558_v30 }
0x1091   :  { %5291 = vmatprep.mubr.msk.f32.mxu0 %vm6077_vm2, %v6078_v41 }
0x1094   :  { %5292 = vmatmul.mubr.msk.f32.gmra.mrb[100].mxu0 %vm560_vm6, %v3560_v54 }
0x1095   :  { %5294 = vmatprep.mubr.msk.f32.mxu0 %vm6077_vm2, %v6078_v41 }
0x1098   :  { %5295 = vmatmul.mubr.msk.f32.gmra.mrb[102].mxu0 %vm560_vm6, %v3562_v55 }
0x1099   :  { %5328 = vmatprep.mubr.msk.f32.mxu0 %vm6077_vm2, %v6078_v41 }
0x10be   :  { %v5838_v27 = vpop.permute.xlu0 %5837 }
0x10bf   :  { %v5840_v18 = vunpack.i.h.bf16 %v5838_v27  ;;  %v5839_v14 = vunpack.i.l.bf16 %v5838_v27 }
0x10c1   :  { %v5600_v11 = vpack.c.bf16 %v5840_v18, %v5839_v14 }
0x10c2   :  { %v5843_v17 = vpop.permute.xlu0 %5842 }
0x10c3   :  { %v5845_v62 = vunpack.i.h.bf16 %v5843_v17  ;;  %v5844_v47 = vunpack.i.l.bf16 %v5843_v17  ;;  %5601 = vmatpush3.bf16.msra.mxu1 %v5600_v11 }
0x10c4   :  { %5602 = vmatprep.subr.bf16.mxu1 %v6076_v0 }
0x10c5   :  { %v5603_v36 = vpack.c.bf16 %v5845_v62, %v5844_v47 }
0x10c7   :  { %5604 = vmatpush3.bf16.msra.mxu1 %v5603_v36 }
0x10c8   :  { %5611 = vmatprep.subr.bf16.mxu1 %v6076_v0 }
0x10e2   :  { %v7775_v7 = vpop.f32.mrb[64].mxu0 }
0x10e3   :  { %v5134_v24 = vpop.f32.mrb[65].mxu0 }
0x10e6   :  { %v7777_v39 = vpop.f32.mrb[66].mxu0 }
0x10e7   :  { %v5137_v56 = vpop.f32.mrb[67].mxu0 }
0x10ea   :  { %v7779_v8 = vpop.f32.mrb[68].mxu0 }
0x10eb   :  { %v5140_v19 = vpop.f32.mrb[69].mxu0 }
0x10ee   :  { %v7782_v23 = vpop.f32.mrb[70].mxu0 }
0x10ef   :  { %v5143_v10 = vpop.f32.mrb[71].mxu0 }
0x10f2   :  { %v7785_v52 = vpop.f32.mrb[72].mxu0 }
0x10f3   :  { %v5146_v60 = vpop.f32.mrb[73].mxu0 }
0x10fa   :  { %v3029_v12 = vpop.f32.mrb[74].mxu0 }
0x10fb   :  { %3688 = vrot.lane.b32.xlu0 %v3029_v12, %s6092_s24  ;;  %v5184_v34 = vpop.f32.mrb[75].mxu0 }
0x10fe   :  { %v3034_v43 = vpop.f32.mrb[76].mxu0 }
0x10ff   :  { %3690 = vrot.lane.b32.xlu0 %v3034_v43, %s6092_s24  ;;  %v5187_v25 = vpop.f32.mrb[77].mxu0 }
0x1102   :  { %v3039_v4 = vpop.f32.mrb[78].mxu0 }
0x1103   :  { %v5190_v32 = vpop.f32.mrb[79].mxu0 }
0x1106   :  { %v3044_v28 = vpop.f32.mrb[80].mxu0 }
0x1107   :  { %v5193_v33 = vpop.f32.mrb[81].mxu0 }
0x110a   :  { %v3049_v40 = vpop.f32.mrb[82].mxu0 }
0x110b   :  { %v5196_v50 = vpop.f32.mrb[83].mxu0 }
0x110e   :  { %v3344_v49 = vpop.f32.mrb[84].mxu0 }
0x110f   :  { %3708 = vrot.lane.b32.xlu0 %v3344_v49, %s6093_s1  ;;  %v5234_v37 = vpop.f32.mrb[85].mxu0 }
0x1112   :  { %v3349_v22 = vpop.f32.mrb[86].mxu0 }
0x1113   :  { %3710 = vrot.lane.b32.xlu1 %v3349_v22, %s6093_s1  ;;  %v5237_v61 = vpop.f32.mrb[87].mxu0 }
0x1114   :  { %v7840_v61 = vld [vmem:[%s8036_s5 + $0x8] sm:$0xff] }
0x1116   :  { %v3354_v5 = vpop.f32.mrb[88].mxu0 }
0x1117   :  { %3712 = vrot.lane.b32.xlu0 %v3354_v5, %s6093_s1  ;;  %v5240_v15 = vpop.f32.mrb[89].mxu0 }
0x111a   :  { %v3359_v1 = vpop.f32.mrb[90].mxu0 }
0x111b   :  { %v5243_v46 = vpop.f32.mrb[91].mxu0 }
0x111e   :  { %v3364_v13 = vpop.f32.mrb[92].mxu0 }
0x111f   :  { %v5246_v20 = vpop.f32.mrb[93].mxu0 }
0x115b   :  { %v3659_v2 = vpop.f32.mrb[94].mxu0 }
0x115c   :  { %3728 = vrot.lane.b32.xlu1 %v3659_v2, %s6094_s25  ;;  %v5284_v35 = vpop.f32.mrb[95].mxu0 }
0x115f   :  { %v3664_v53 = vpop.f32.mrb[96].mxu0 }
0x1160   :  { %3692 = vrot.lane.b32.xlu1 %v3039_v4, %s6092_s24  ;;  %3730 = vrot.lane.b32.xlu0 %v3664_v53, %s6094_s25  ;;  %v5287_v59 = vpop.f32.mrb[97].mxu0 }
0x1163   :  { %v3669_v16 = vpop.f32.mrb[98].mxu0 }
0x1164   :  { %3694 = vrot.lane.b32.xlu0 %v3044_v28, %s6092_s24  ;;  %3732 = vrot.lane.b32.xlu1 %v3669_v16, %s6094_s25  ;;  %v5290_v30 = vpop.f32.mrb[99].mxu0 }
0x1167   :  { %v3674_v51 = vpop.f32.mrb[100].mxu0 }
0x1168   :  { %3714 = vrot.lane.b32.xlu1 %v3359_v1, %s6093_s1  ;;  %3734 = vrot.lane.b32.xlu0 %v3674_v51, %s6094_s25  ;;  %v5293_v54 = vpop.f32.mrb[101].mxu0 }
0x116b   :  { %v3679_v9 = vpop.f32.mrb[102].mxu0 }
0x116c   :  { %3696 = vrot.lane.b32.xlu1 %v3049_v40, %s6092_s24  ;;  %3716 = vrot.lane.b32.xlu0 %v3364_v13, %s6093_s1  ;;  %v5296_v55 = vpop.f32.mrb[103].mxu0 }
0x116d   :  { %v3689_v24 = vpop.permute.xlu0 %3688 }
0x116e   :  { %v3743_v14 = vsel %vm439_vm3, %v7775_v7, %v3689_v24 }
0x1170   :  { %3736 = vrot.lane.b32.xlu1 %v3679_v9, %s6094_s25 }
0x1171   :  { %v3691_v27 = vpop.permute.xlu0 %3690 }
0x1172   :  { %v3744_v47 = vsel %vm439_vm3, %v7777_v39, %v3691_v27 }
0x1181   :  { %v3709_v56 = vpop.permute.xlu0 %3708 }
0x1182   :  { %v3748_v11 = vsel %vm1746_vm11, %v3743_v14, %v3709_v56 }
0x1185   :  { %v3711_v18 = vpop.permute.xlu1 %3710 }
0x1186   :  { %v3749_v36 = vsel %vm1746_vm11, %v3744_v47, %v3711_v18 }
0x1189   :  { %v3713_v17 = vpop.permute.xlu0 %3712 }
0x11ce   :  { %v3729_v19 = vpop.permute.xlu1 %3728 }
0x11cf   :  { %v3753_v62 = vsel %vm1752_vm12, %v3748_v11, %v3729_v19 }
0x11d0   :  { %5306 = vmatmul.mubr.msk.f32.vlgmr.msra.gmra.mrb[116].mxu1 %vm234_vm1, %v3753_v62 }
0x11d1   :  { %5308 = vmatprep.mubr.msk.f32.mxu1 %vm6077_vm2, %v6078_v41 }
0x11d2   :  { %v3693_v10 = vpop.permute.xlu1 %3692  ;;  %v3731_v60 = vpop.permute.xlu0 %3730 }
0x11d3   :  { %v3745_v7 = vsel %vm439_vm3, %v7779_v8, %v3693_v10  ;;  %v3754_v12 = vsel %vm1752_vm12, %v3749_v36, %v3731_v60 }
0x11d4   :  { %5309 = vmatmul.mubr.msk.f32.gmra.mrb[118].mxu1 %vm234_vm1, %v3754_v12  ;;  %v3750_v39 = vsel %vm1746_vm11, %v3745_v7, %v3713_v17 }
0x11d5   :  { %5311 = vmatprep.mubr.msk.f32.mxu1 %vm6077_vm2, %v6078_v41 }
0x11d6   :  { %v3695_v34 = vpop.permute.xlu0 %3694  ;;  %v3733_v43 = vpop.permute.xlu1 %3732 }
0x11d7   :  { %v3755_v25 = vsel %vm1752_vm12, %v3750_v39, %v3733_v43  ;;  %v3746_v8 = vsel %vm439_vm3, %v7782_v23, %v3695_v34 }
0x11d8   :  { %5312 = vmatmul.mubr.msk.f32.gmra.mrb[120].mxu1 %vm234_vm1, %v3755_v25 }
0x11d9   :  { %5314 = vmatprep.mubr.msk.f32.mxu1 %vm6077_vm2, %v6078_v41 }
0x11da   :  { %v3715_v4 = vpop.permute.xlu1 %3714  ;;  %v3735_v32 = vpop.permute.xlu0 %3734 }
0x11db   :  { %v3751_v28 = vsel %vm1746_vm11, %v3746_v8, %v3715_v4 }
0x11dc   :  { %v3756_v33 = vsel %vm1752_vm12, %v3751_v28, %v3735_v32 }
0x11dd   :  { %5315 = vmatmul.mubr.msk.f32.gmra.mrb[122].mxu1 %vm234_vm1, %v3756_v33 }
0x11de   :  { %v3697_v40 = vpop.permute.xlu1 %3696  ;;  %5317 = vmatprep.mubr.msk.f32.mxu1 %vm6077_vm2, %v6078_v41  ;;  %v3717_v49 = vpop.permute.xlu0 %3716 }
0x11df   :  { %v3747_v50 = vsel %vm439_vm3, %v7785_v52, %v3697_v40  ;;  %v3887_v52 = vrot.slane %v7840_v61, %v312_v58 }
0x11e0   :  { %v3752_v37 = vsel %vm1746_vm11, %v3747_v50, %v3717_v49 }
0x11e2   :  { %v3737_v22 = vpop.permute.xlu1 %3736 }
0x11e3   :  { %v3757_v23 = vsel %vm1752_vm12, %v3752_v37, %v3737_v22  ;;  %v4397_v22 = vld [vmem:[%s8035_s3 + $0x48] sm:$0xff] }
0x11e4   :  { %5318 = vmatmul.mubr.msk.f32.gmra.mrb[124].mxu1 %vm234_vm1, %v3757_v23  ;;  %v4399_v23 = vld [vmem:[%s8035_s3 + $0x58] sm:$0xff] }
0x11e5   :  { %5375 = vmatprep.mubr.msk.f32.mxu1 %vm6077_vm2, %v6078_v41 }
0x12a3   :  { %v3855_v5 = vpop.f32.mrb[116].mxu1 }
0x12a4   :  { %v3879_v15 = vadd.f32 %v3855_v5, %v7161_v44  ;;  %v5307_v1 = vpop.f32.mrb[117].mxu1  ;;  %v4401_v5 = vld [vmem:[%s8035_s3 + $0x68] sm:$0xff] }
0x12a6   :  { %v7846_v46 = vadd.f32 %v3887_v52, %v3879_v15  ;;  %v4403_v15 = vld [vmem:[%s8035_s3 + $0x78] sm:$0xff] }
0x12a7   :  { %v3860_v13 = vpop.f32.mrb[118].mxu1  ;;  %v5609_v1 = vpack.c.bf16 %v4403_v15, %v4401_v5  ;;  %v4411_v15 = vld [vmem:[%s8037_s4 + $0xb8] sm:$0xff] }
0x12a8   :  { %v3880_v20 = vadd.f32 %v3860_v13, %v7166_v63  ;;  %v5310_v2 = vpop.f32.mrb[119].mxu1  ;;  %v3893_v35 = vsel %vm234_vm1, %v7846_v46, 0.0  ;;  %v4404_v13 = vld [vmem:[%s8037_s4 + $0x80] sm:$0xff] }
0x12a9   :  { %3894 = vadd.xlane.f32.xlu0 %v3893_v35  ;;  %v4406_v2 = vld [vmem:[%s8037_s4 + $0x90] sm:$0xff] }
0x12aa   :  { %v7851_v53 = vadd.f32 %v3887_v52, %v3880_v20  ;;  %v4405_v20 = vld [vmem:[%s8037_s4 + $0x88] sm:$0xff] }
0x12ab   :  { %v3865_v59 = vpop.f32.mrb[120].mxu1  ;;  %v5612_v35 = vpack.c.bf16 %v4405_v20, %v4404_v13  ;;  %v4413_v13 = vld [vmem:[%s8037_s4 + $0xc8] sm:$0xff] }
0x12ac   :  { %v3881_v16 = vadd.f32 %v3865_v59, %v7171_v57  ;;  %v5313_v58 = vpop.f32.mrb[121].mxu1  ;;  %v3896_v44 = vsel %vm234_vm1, %v7851_v53, 0.0  ;;  %v4407_v59 = vld [vmem:[%s8037_s4 + $0x98] sm:$0xff] }
0x12ad   :  { %3897 = vadd.xlane.f32.xlu1 %v3896_v44  ;;  %5613 = vmatpush3.bf16.msra.mxu1 %v5612_v35  ;;  %v4408_v58 = vld [vmem:[%s8037_s4 + $0xa0] sm:$0xff]  ;;  %v4409_v44 = vld [vmem:[%s8037_s4 + $0xa8] sm:$0xff]  ;;  %v4415_v35 = vld [vmem:[%s8037_s4 + $0xd8] sm:$0xff] }
0x12ae   :  { %v7856_v30 = vadd.f32 %v3887_v52, %v3881_v16  ;;  %v5615_v16 = vpack.c.bf16 %v4407_v59, %v4406_v2  ;;  %5614 = vmatprep.subr.bf16.mxu1 %v6076_v0  ;;  %v4414_v2 = vld [vmem:[%s8037_s4 + $0xd0] sm:$0xff] }
0x12af   :  { %v5627_v59 = vpack.c.bf16 %v4415_v35, %v4414_v2 }
0x12b0   :  { %v3870_v51 = vpop.f32.mrb[122].mxu1  ;;  %v3899_v63 = vsel %vm234_vm1, %v7856_v30, 0.0 }
0x12b1   :  { %v3882_v54 = vadd.f32 %v3870_v51, %v7176_v45  ;;  %3900 = vadd.xlane.f32.xlu0 %v3899_v63  ;;  %v5316_v9 = vpop.f32.mrb[123].mxu1  ;;  %5616 = vmatpush3.bf16.msra.mxu1 %v5615_v16  ;;  %v5618_v51 = vpack.c.bf16 %v4409_v44, %v4408_v58  ;;  %v4416_v16 = vld [vmem:[%s8037_s4 + $0xe0] sm:$0xff]  ;;  %v4417_v58 = vld [vmem:[%s8037_s4 + $0xe8] sm:$0xff] }
0x12b2   :  { %5617 = vmatprep.subr.bf16.mxu1 %v6076_v0  ;;  %v5630_v44 = vpack.c.bf16 %v4417_v58, %v4416_v16 }
0x12b3   :  { %v7861_v55 = vadd.f32 %v3887_v52, %v3882_v54 }
0x12b5   :  { %v3902_v57 = vsel %vm234_vm1, %v7861_v55, 0.0  ;;  %5619 = vmatpush3.bf16.msra.mxu1 %v5618_v51  ;;  %v4418_v51 = vld [vmem:[%s8037_s4 + $0xf0] sm:$0xff] }
0x12b6   :  { %3903 = vadd.xlane.f32.xlu0 %v3902_v57  ;;  %5620 = vmatprep.subr.bf16.mxu1 %v6076_v0 }
0x12b7   :  { %v3875_v24 = vpop.f32.mrb[124].mxu1 }
0x12b8   :  { %v3883_v27 = vadd.f32 %v3875_v24, %v7181_v42  ;;  %v5319_v56 = vpop.f32.mrb[125].mxu1 }
0x12ba   :  { %v7866_v18 = vadd.f32 %v3887_v52, %v3883_v27  ;;  %v5606_v52 = vpack.c.bf16 %v4399_v23, %v4397_v22 }
0x12bc   :  { %v3905_v14 = vsel %vm234_vm1, %v7866_v18, 0.0  ;;  %5607 = vmatpush3.bf16.msra.mxu0 %v5606_v52 }
0x12bd   :  { %3906 = vadd.xlane.f32.xlu0 %v3905_v14  ;;  %5608 = vmatprep.subr.bf16.mxu0 %v6076_v0 }
0x12c0   :  { %5610 = vmatpush3.bf16.msra.mxu0 %v5609_v1 }
0x12c1   :  { %5635 = vmatprep.subr.bf16.mxu0 %v6076_v0 }
0x1336   :  { %v3895_v11 = vpop.xlane.xlu0 %3894 }
0x1337   :  { %v3908_v45 = vmul.f32 0.03125, %v3895_v11 }
0x1339   :  { %v7871_v17 = vsub.f32 %v7846_v46, %v3908_v45 }
0x133a   :  { %v3898_v19 = vpop.xlane.xlu1 %3897 }
0x133b   :  { %v3909_v62 = vmul.f32 0.03125, %v3898_v19  ;;  %v3918_v47 = vmul.f32 %v7871_v17, %v7871_v17  ;;  %v3961_v19 = vrot.slane %v7840_v61, %v1886_v29 }
0x133d   :  { %v7876_v36 = vsub.f32 %v7851_v53, %v3909_v62  ;;  %v3923_v42 = vsel %vm234_vm1, %v3918_v47, 0.0 }
0x133e   :  { %3924 = vadd.xlane.f32.xlu1 %v3923_v42  ;;  %v3901_v10 = vpop.xlane.xlu0 %3900  ;;  %v3970_v42 = vrot.slane %v7840_v61, %v1960_v26 }
0x133f   :  { %v3910_v60 = vmul.f32 0.03125, %v3901_v10  ;;  %v3919_v7 = vmul.f32 %v7876_v36, %v7876_v36 }
0x1341   :  { %v7882_v12 = vsub.f32 %v7856_v30, %v3910_v60  ;;  %v3926_v34 = vsel %vm234_vm1, %v3919_v7, 0.0 }
0x1342   :  { %3927 = vadd.xlane.f32.xlu0 %v3926_v34 }
0x1343   :  { %v3904_v39 = vpop.xlane.xlu0 %3903  ;;  %v3920_v43 = vmul.f32 %v7882_v12, %v7882_v12 }
0x1344   :  { %v3911_v25 = vmul.f32 0.03125, %v3904_v39 }
0x1345   :  { %v3929_v8 = vsel %vm234_vm1, %v3920_v43, 0.0 }
0x1346   :  { %v7889_v4 = vsub.f32 %v7861_v55, %v3911_v25  ;;  %3930 = vadd.xlane.f32.xlu1 %v3929_v8 }
0x1348   :  { %v3921_v32 = vmul.f32 %v7889_v4, %v7889_v4 }
0x134a   :  { %v3907_v28 = vpop.xlane.xlu0 %3906  ;;  %v3932_v33 = vsel %vm234_vm1, %v3921_v32, 0.0 }
0x134b   :  { %v3912_v40 = vmul.f32 0.03125, %v3907_v28  ;;  %3933 = vadd.xlane.f32.xlu0 %v3932_v33 }
0x134d   :  { %v7895_v50 = vsub.f32 %v7866_v18, %v3912_v40 }
0x134f   :  { %v3922_v49 = vmul.f32 %v7895_v50, %v7895_v50 }
0x1351   :  { %v3935_v37 = vsel %vm234_vm1, %v3922_v49, 0.0 }
0x1352   :  { %3936 = vadd.xlane.f32.xlu1 %v3935_v37 }
0x13cb   :  { %v3925_v63 = vpop.xlane.xlu1 %3924 }
0x13cc   :  { %v3938_v54 = vmul.f32 0.03125, %v3925_v63  ;;  %v4419_v63 = vld [vmem:[%s8037_s4 + $0xf8] sm:$0xff] }
0x13ce   :  { %v3943_v9 = vadd.f32 1e-05, %v3938_v54  ;;  %v5633_v54 = vpack.c.bf16 %v4419_v63, %v4418_v51 }
0x13cf   :  { %v3928_v57 = vpop.xlane.xlu0 %3927 }
0x13d0   :  { %6046 = vrsqrt.f32 %v3943_v9  ;;  %v3939_v24 = vmul.f32 0.03125, %v3928_v57  ;;  %v3979_v9 = vrot.slane %v7840_v61, %v1969_v38 }
0x13d2   :  { %v3944_v27 = vadd.f32 1e-05, %v3939_v24 }
0x13d3   :  { %v3931_v56 = vpop.xlane.xlu1 %3930 }
0x13d4   :  { %6048 = vrsqrt.f32 %v3944_v27  ;;  %v3940_v14 = vmul.f32 0.03125, %v3931_v56 }
0x13d6   :  { %v3945_v11 = vadd.f32 1e-05, %v3940_v14 }
0x13d8   :  { %6050 = vrsqrt.f32 %v3945_v11  ;;  %v3934_v45 = vpop.xlane.xlu0 %3933 }
0x13d9   :  { %v3941_v62 = vmul.f32 0.03125, %v3934_v45 }
0x13da   :  { %v6047_v47 = vpop.eup %6046 }
0x13db   :  { %v3953_v10 = vmul.f32 %v6047_v47, %v7871_v17  ;;  %v3946_v60 = vadd.f32 1e-05, %v3941_v62 }
0x13dd   :  { %v3962_v7 = vmul.f32 %v3961_v19, %v3953_v10  ;;  %6052 = vrsqrt.f32 %v3946_v60 }
0x13de   :  { %v6049_v34 = vpop.eup %6048 }
0x13df   :  { %v3971_v39 = vadd.f32 %v3970_v42, %v3962_v7  ;;  %v3937_v43 = vpop.xlane.xlu1 %3936  ;;  %v3954_v25 = vmul.f32 %v6049_v34, %v7876_v36 }
0x13e0   :  { %v3942_v8 = vmul.f32 0.03125, %v3937_v43 }
0x13e1   :  { %5329 = vmatmul.mubr.msk.f32.vlgmr.msra.gmra.mrb[104].mxu0 %vm234_vm1, %v3971_v39  ;;  %v3963_v29 = vmul.f32 %v3961_v19, %v3954_v25 }
0x13e2   :  { %v6051_v32 = vpop.eup %6050  ;;  %v3947_v28 = vadd.f32 1e-05, %v3942_v8  ;;  %5331 = vmatprep.mubr.msk.f32.mxu0 %vm6077_vm2, %v6078_v41 }
0x13e3   :  { %v3972_v26 = vadd.f32 %v3970_v42, %v3963_v29  ;;  %v3955_v17 = vmul.f32 %v6051_v32, %v7882_v12 }
0x13e4   :  { %6054 = vrsqrt.f32 %v3947_v28 }
0x13e5   :  { %5332 = vmatmul.mubr.msk.f32.gmra.mrb[106].mxu0 %vm234_vm1, %v3972_v26  ;;  %v3964_v33 = vmul.f32 %v3961_v19, %v3955_v17 }
0x13e6   :  { %5334 = vmatprep.mubr.msk.f32.mxu0 %vm6077_vm2, %v6078_v41 }
0x13e7   :  { %v6053_v36 = vpop.eup %6052  ;;  %v3973_v40 = vadd.f32 %v3970_v42, %v3964_v33 }
0x13e8   :  { %v3956_v49 = vmul.f32 %v6053_v36, %v7889_v4  ;;  %v4410_v4 = vld [vmem:[%s8037_s4 + $0xb0] sm:$0xff] }
0x13e9   :  { %5335 = vmatmul.mubr.msk.f32.gmra.mrb[108].mxu0 %vm234_vm1, %v3973_v40  ;;  %v5621_v1 = vpack.c.bf16 %v4411_v15, %v4410_v4 }
0x13ea   :  { %5337 = vmatprep.mubr.msk.f32.mxu0 %vm6077_vm2, %v6078_v41  ;;  %v3965_v37 = vmul.f32 %v3961_v19, %v3956_v49 }
0x13eb   :  { %5622 = vmatpush3.bf16.msra.mxu1 %v5621_v1 }
0x13ec   :  { %v3974_v22 = vadd.f32 %v3970_v42, %v3965_v37  ;;  %5623 = vmatprep.subr.bf16.mxu1 %v6076_v0 }
0x13ee   :  { %v6055_v23 = vpop.eup %6054  ;;  %5338 = vmatmul.mubr.msk.f32.gmra.mrb[110].mxu0 %vm234_vm1, %v3974_v22 }
0x13ef   :  { %5340 = vmatprep.mubr.msk.f32.mxu0 %vm6077_vm2, %v6078_v41  ;;  %v3957_v12 = vmul.f32 %v6055_v23, %v7895_v50  ;;  %v4412_v50 = vld [vmem:[%s8037_s4 + $0xc0] sm:$0xff] }
0x13f0   :  { %v5624_v20 = vpack.c.bf16 %v4413_v13, %v4412_v50 }
0x13f1   :  { %v3966_v52 = vmul.f32 %v3961_v19, %v3957_v12 }
0x13f2   :  { %5625 = vmatpush3.bf16.msra.mxu1 %v5624_v20 }
0x13f3   :  { %v3975_v5 = vadd.f32 %v3970_v42, %v3966_v52  ;;  %5626 = vmatprep.subr.bf16.mxu1 %v6076_v0 }
0x13f5   :  { %5341 = vmatmul.mubr.msk.f32.gmra.mrb[112].mxu0 %vm234_vm1, %v3975_v5 }
0x13f6   :  { %5400 = vmatprep.mubr.msk.f32.mxu0 %vm6077_vm2, %v6078_v41  ;;  %5628 = vmatpush3.bf16.msra.mxu1 %v5627_v59  ;;  %v4208_v59 = vrot.slane %v7840_v61, %v1978_v21 }
0x13f7   :  { %5629 = vmatprep.subr.bf16.mxu1 %v6076_v0 }
0x13fa   :  { %5631 = vmatpush3.bf16.msra.mxu1 %v5630_v44 }
0x13fb   :  { %5632 = vmatprep.subr.bf16.mxu1 %v6076_v0 }
0x13fe   :  { %5634 = vmatpush3.bf16.msra.mxu1 %v5633_v54 }
0x14b4   :  { %v4061_v57 = vpop.f32.mrb[104].mxu0 }
0x14b5   :  { %v4062_v24 = vadd.f32 %v4061_v57, %v3979_v9  ;;  %v5330_v27 = vpop.f32.mrb[105].mxu0 }
0x14b7   :  { %v4090_v56 = vmul.f32 0.70710677, %v4062_v24  ;;  %v4085_v38 = vmul.f32 0.5, %v4062_v24 }
0x14b8   :  { %v4066_v14 = vpop.f32.mrb[106].mxu0 }
0x14b9   :  { %6056 = verf.f32 %v4090_v56  ;;  %v4067_v11 = vadd.f32 %v4066_v14, %v3979_v9  ;;  %v5333_v45 = vpop.f32.mrb[107].mxu0 }
0x14bb   :  { %v4091_v19 = vmul.f32 0.70710677, %v4067_v11  ;;  %v4086_v32 = vmul.f32 0.5, %v4067_v11  ;;  %v59_v11 = vmul.u32 5, %v6343_v48 }
0x14bc   :  { %v4071_v62 = vpop.f32.mrb[108].mxu0 }
0x14bd   :  { %6058 = verf.f32 %v4091_v19  ;;  %v4072_v47 = vadd.f32 %v4071_v62, %v3979_v9  ;;  %v5336_v42 = vpop.f32.mrb[109].mxu0  ;;  %vm60_vm13 = vcmp.eq.s32.totalorder %v6567_v3, %v59_v11 }
0x14bf   :  { %v4092_v10 = vmul.f32 0.70710677, %v4072_v47  ;;  %v4087_v37 = vmul.f32 0.5, %v4072_v47 }
0x14c1   :  { %6060 = verf.f32 %v4092_v10  ;;  %v4076_v60 = vpop.f32.mrb[110].mxu0 }
0x14c2   :  { %v4077_v7 = vadd.f32 %v4076_v60, %v3979_v9  ;;  %v5339_v34 = vpop.f32.mrb[111].mxu0 }
0x14c3   :  { %v6057_v39 = vpop.eup %6056 }
0x14c4   :  { %v4100_v43 = vadd.f32 1.0, %v6057_v39  ;;  %v4093_v25 = vmul.f32 0.70710677, %v4077_v7  ;;  %v4088_v52 = vmul.f32 0.5, %v4077_v7 }
0x14c6   :  { %v4105_v8 = vmul.f32 %v4100_v43, %v4085_v38  ;;  %6062 = verf.f32 %v4093_v25  ;;  %v4308_v25 = vrot.slane %v7840_v61, %v2307_v31 }
0x14c7   :  { %v6059_v29 = vpop.eup %6058 }
0x14c8   :  { %v4101_v28 = vadd.f32 1.0, %v6059_v29  ;;  %v4081_v26 = vpop.f32.mrb[112].mxu0  ;;  %5376 = vmatmul.mubr.f32.vlgmr.msra.gmra.mrb[126].mxu1 %v4105_v8 }
0x14c9   :  { %v4082_v17 = vadd.f32 %v4081_v26, %v3979_v9  ;;  %v5342_v33 = vpop.f32.mrb[113].mxu0  ;;  %5378 = vmatprep.mubr.msk.f32.mxu1 %vm6077_vm2, %v6078_v41 }
0x14ca   :  { %v4106_v36 = vmul.f32 %v4101_v28, %v4086_v32 }
0x14cb   :  { %v6061_v40 = vpop.eup %6060  ;;  %v4094_v49 = vmul.f32 0.70710677, %v4082_v17  ;;  %v4089_v1 = vmul.f32 0.5, %v4082_v17 }
0x14cc   :  { %v4102_v22 = vadd.f32 1.0, %v6061_v40  ;;  %5379 = vmatmul.mubr.f32.gmra.mrb[128].mxu1 %v4106_v36 }
0x14cd   :  { %6064 = verf.f32 %v4094_v49  ;;  %5381 = vmatprep.mubr.msk.f32.mxu1 %vm6077_vm2, %v6078_v41 }
0x14ce   :  { %v4107_v23 = vmul.f32 %v4102_v22, %v4087_v37 }
0x14d0   :  { %v6063_v12 = vpop.eup %6062  ;;  %5382 = vmatmul.mubr.f32.gmra.mrb[130].mxu1 %v4107_v23 }
0x14d1   :  { %v4103_v5 = vadd.f32 1.0, %v6063_v12  ;;  %5384 = vmatprep.mubr.msk.f32.mxu1 %vm6077_vm2, %v6078_v41 }
0x14d3   :  { %v4108_v4 = vmul.f32 %v4103_v5, %v4088_v52 }
0x14d5   :  { %5385 = vmatmul.mubr.f32.gmra.mrb[132].mxu1 %v4108_v4 }
0x14d6   :  { %5387 = vmatprep.mubr.msk.f32.mxu1 %vm6077_vm2, %v6078_v41 }
0x14d7   :  { %v6065_v15 = vpop.eup %6064 }
0x14d8   :  { %v4104_v50 = vadd.f32 1.0, %v6065_v15 }
0x14da   :  { %v4109_v13 = vmul.f32 %v4104_v50, %v4089_v1 }
0x14dc   :  { %5388 = vmatmul.mubr.f32.gmra.mrb[134].mxu1 %v4109_v13 }
0x159b   :  { %v4176_v20 = vpop.f32.mrb[126].mxu1 }
0x159c   :  { %v5377_v2 = vpop.f32.mrb[127].mxu1  ;;  %v4200_v35 = vadd.f32 %v4176_v20, %v7846_v46 }
0x159e   :  { %v4209_v51 = vadd.f32 %v4208_v59, %v4200_v35 }
0x159f   :  { %v4181_v16 = vpop.f32.mrb[128].mxu1 }
0x15a0   :  { %v4201_v58 = vadd.f32 %v4181_v16, %v7851_v53  ;;  %v5380_v44 = vpop.f32.mrb[129].mxu1 }
0x15a2   :  { %v4210_v63 = vadd.f32 %v4208_v59, %v4201_v58 }
0x15a3   :  { %v4186_v54 = vpop.f32.mrb[130].mxu1 }
0x15a4   :  { %v5636_v9 = vpack.c.bf16 %v4210_v63, %v4209_v51  ;;  %v5383_v57 = vpop.f32.mrb[131].mxu1  ;;  %v4202_v24 = vadd.f32 %v4186_v54, %v7856_v30 }
0x15a6   :  { %5637 = vmatpush3.bf16.msra.mxu0 %v5636_v9  ;;  %v4211_v14 = vadd.f32 %v4208_v59, %v4202_v24 }
0x15a7   :  { %5638 = vmatprep.subr.bf16.mxu0 %v6076_v0  ;;  %v4315_v0 = vsel %vm60_vm13, 1.0, %v6078_v41 }
0x15a8   :  { %v4191_v27 = vpop.f32.mrb[132].mxu1 }
0x15a9   :  { %v4203_v46 = vadd.f32 %v4191_v27, %v7861_v55  ;;  %v5386_v56 = vpop.f32.mrb[133].mxu1 }
0x15ab   :  { %v4212_v21 = vadd.f32 %v4208_v59, %v4203_v46 }
0x15ad   :  { %v5639_v53 = vpack.c.bf16 %v4212_v21, %v4211_v14 }
0x15af   :  { %v4196_v45 = vpop.f32.mrb[134].mxu1  ;;  %5640 = vmatpush3.bf16.msra.mxu0 %v5639_v53 }
0x15b0   :  { %v4204_v19 = vadd.f32 %v4196_v45, %v7866_v18  ;;  %v5389_v62 = vpop.f32.mrb[135].mxu1  ;;  %5398 = vmatprep.subr.mxu0 %v6078_v41  ;;  %v4303_v41 = vrot.slane %v7840_v61, %v2207_v6 }
0x15b2   :  { %v4213_v30 = vadd.f32 %v4208_v59, %v4204_v19 }
0x15b4   :  { %5399 = vmatpush3.msra.mxu0 %v4213_v30 }
0x15b5   :  { %5401 = vmatmul.mubr.msk.f32.vlgmr.msra.gmra.mrb[114].mxu0 %vm560_vm6, %v4315_v0 }
0x1688   :  { %v4283_v55 = vpop.f32.mrb[114].mxu0 }
0x1689   :  { %v4287_v47 = vsel %vm234_vm1, %v4283_v55, 0.0  ;;  %v5402_v42 = vpop.f32.mrb[115].mxu0 }
0x168a   :  { %4288 = vadd.xlane.f32.xlu0 %v4287_v47 }
0x1717   :  { %v4289_v10 = vpop.xlane.xlu0 %4288 }
0x1718   :  { %v4290_v60 = vmul.f32 0.03125, %v4289_v10 }
0x171a   :  { %v4291_v7 = vsub.f32 %v4283_v55, %v4290_v60 }
0x171c   :  { %v4292_v3 = vmul.f32 %v4291_v7, %v4291_v7 }
0x171e   :  { %v4293_v18 = vsel %vm234_vm1, %v4292_v3, 0.0 }
0x171f   :  { %4294 = vadd.xlane.f32.xlu1 %v4293_v18 }
0x17ac   :  { %v4295_v34 = vpop.xlane.xlu1 %4294 }
0x17ad   :  { %v4296_v39 = vmul.f32 0.03125, %v4295_v34 }
0x17af   :  { %v4297_v38 = vadd.f32 1e-05, %v4296_v39 }
0x17b1   :  { %6066 = vrsqrt.f32 %v4297_v38 }
0x17bb   :  { %v6067_v43 = vpop.eup %6066 }
0x17bc   :  { %v4299_v8 = vmul.f32 %v6067_v43, %v4291_v7 }
0x17be   :  { %v4304_v29 = vmul.f32 %v4303_v41, %v4299_v8 }
0x17c0   :  { %v4309_v32 = vadd.f32 %v4308_v25, %v4304_v29 }
0x17c2   :  { %4310 = vst.msk [vmem:[%s8038_s6] sm:$0xff] %vm234_vm1, %v4309_v32 }

</bundles_post_ra>
